<compile_context>
chip_gen: v6e
topology: v6e:2x2x1
jax: 0.10.0
libtpu: 0.0.40
codegen_flags: <defaults>
</compile_context>

<pallas_src>
import numpy as np

import jax
import jax.numpy as jnp
from jax.experimental import pallas as pl
from jax.experimental.pallas import tpu as pltpu


# ----------------------------------------------------------------------------
# Fused forward kernel: one grid step == one block of B samples.
#
# Row layouts (per sample):
#   conv1/conv2 stage (period 20): row 0 = top pad, rows 1..16 = image rows,
#     row 17 = bottom pad, rows 18..19 = unused.
#   conv3/conv4 stage (period 10): row 0 = top pad, rows 1..8 = image rows,
#     row 9 = bottom pad.
# Lane layouts: conv activations are row-images with lane = w*C + c; conv2 and
# conv4 output lanes are pre-permuted to [even-w | odd-w] so the pool's
# w-reduction is a max of the two 64-lane halves.
# ----------------------------------------------------------------------------
def _carlini_fused_kernel(
    x_ref,                                  # [B*20, 48]  f32 padded input stack
    w1_ref, b1_ref,                         # [3, 48, 128] bf16 banded, [1, 128] f32
    w2_ref, b2_ref,                         # [3, 128, 128] (pool-permuted cols), [1, 128]
    w3_ref, b3_ref,                         # [3, 64, 128], [1, 128]
    w4_ref, b4_ref,                         # [3, 128, 128] (pool-permuted cols), [1, 128]
    wf1_ref, bf1_ref,                       # [4, 64, 256] bf16 (NHWC-permuted rows), [1, 256]
    wf2_ref, bf2_ref,                       # [256, 256] bf16, [1, 256]
    wf3_ref, bf3_ref,                       # [256, 128] bf16 (padded from 10 cols), [1, 128]
    out_ref,                                # [B, 128] f32
    p2_ref, s2_ref, p3_ref, p4_ref, s4_ref, # VMEM scratch
):
    f32, bf16 = jnp.float32, jnp.bfloat16
    B = out_ref.shape[0]
    R1 = 20 * B                 # rows in the conv1/conv2 stacks
    R2 = 10 * B                 # rows in the conv3/conv4 stacks
    n1 = R1 - 2                 # conv1/conv2 output rows (valid where r % 20 < 16)
    n2 = R2 - 2                 # conv3/conv4 output rows (valid where r % 10 < 8)

    def conv3tap(tap, w_ref, b_ref):
        # 3x3 SAME conv over the whole sample stack = 3 accumulated MXU matmuls
        # of row-shifted slices against banded [W*Cin, W*Cout] weights
        # (w-padding is baked into the band); bias + ReLU epilogue in f32.
        acc = jnp.dot(tap(0).astype(bf16), w_ref[0], preferred_element_type=f32)
        acc = acc + jnp.dot(tap(1).astype(bf16), w_ref[1], preferred_element_type=f32)
        acc = acc + jnp.dot(tap(2).astype(bf16), w_ref[2], preferred_element_type=f32)
        return jnp.maximum(acc + b_ref[...], 0.0)

    def valid_rows(rows, lanes, period, valid):
        # Boolean [rows, lanes] mask: (row % period) < valid.  Built from float
        # ops only (iota / mul / floor / sub / cmp) so it lowers everywhere.
        r = jax.lax.broadcasted_iota(jnp.int32, (rows, lanes), 0).astype(f32)
        q = jnp.floor(r * (1.0 / period))
        return (r - q * period) < valid

    # ---- conv1 (3 -> 8), 16x16 images, stack period 20 ----------------------
    a1 = conv3tap(lambda d: x_ref[pl.ds(d, n1), :], w1_ref, b1_ref)       # [n1, 128]
    p2_ref[pl.ds(1, n1), :] = jnp.where(valid_rows(n1, 128, 20.0, 16.0), a1, 0.0)
    p2_ref[0:1, :] = jnp.zeros((1, 128), f32)          # top pad of sample 0
    p2_ref[R1 - 1:R1, :] = jnp.zeros((1, 128), f32)    # tail row (never valid)

    # ---- conv2 (8 -> 8), output lanes pre-permuted to [even-w | odd-w] ------
    a2 = conv3tap(lambda d: p2_ref[pl.ds(d, n1), :], w2_ref, b2_ref)      # [n1, 128]

    # ---- 2x2 maxpool #1: w-reduction across lane halves, h-reduction via two
    # stride-2 row reads of the staging buffer; result lands directly in the
    # (zero-bordered) conv3 input stack.
    s2_ref[pl.ds(0, n1), :] = jnp.maximum(a2[:, 0:64], a2[:, 64:128])
    np1 = R2 - 1
    hmax = jnp.maximum(s2_ref[pl.ds(0, np1, stride=2), :],
                       s2_ref[pl.ds(1, np1, stride=2), :])                # [10B-1, 64]
    p3_ref[pl.ds(1, np1), :] = jnp.where(valid_rows(np1, 64, 10.0, 8.0), hmax, 0.0)
    p3_ref[0:1, :] = jnp.zeros((1, 64), f32)

    # ---- conv3 (8 -> 16), 8x8 images, stack period 10 -----------------------
    a3 = conv3tap(lambda d: p3_ref[pl.ds(d, n2), :], w3_ref, b3_ref)      # [n2, 128]
    p4_ref[pl.ds(1, n2), :] = jnp.where(valid_rows(n2, 128, 10.0, 8.0), a3, 0.0)
    p4_ref[0:1, :] = jnp.zeros((1, 128), f32)
    p4_ref[R2 - 1:R2, :] = jnp.zeros((1, 128), f32)

    # ---- conv4 (16 -> 16), output lanes pre-permuted -------------------------
    a4 = conv3tap(lambda d: p4_ref[pl.ds(d, n2), :], w4_ref, b4_ref)      # [n2, 128]
    s4_ref[pl.ds(0, n2), :] = jnp.maximum(a4[:, 0:64], a4[:, 64:128])

    # ---- 2x2 maxpool #2 folded into the fc1 feature gather + fc1 ------------
    # fc1 weight rows were permuted at setup so the NHWC feature layout
    # (row = pooled h, lane = w*16 + c) is consumed directly.
    acc = None
    for hf in range(4):
        fa = s4_ref[pl.ds(2 * hf, B, stride=10), :]       # conv4 row 2*hf of each sample
        fb = s4_ref[pl.ds(2 * hf + 1, B, stride=10), :]   # conv4 row 2*hf+1 of each sample
        feat = jnp.maximum(fa, fb).astype(bf16)           # [B, 64] pooled feature row hf
        d = jnp.dot(feat, wf1_ref[hf], preferred_element_type=f32)
        acc = d if acc is None else acc + d
    z = jnp.maximum(acc + bf1_ref[...], 0.0)              # [B, 256]
    # TODO(synk): nn.Dropout -> identity (inference semantics).
    z = jnp.maximum(
        jnp.dot(z.astype(bf16), wf2_ref[...], preferred_element_type=f32)
        + bf2_ref[...], 0.0)                               # [B, 256]
    logits = (jnp.dot(z.astype(bf16), wf3_ref[...], preferred_element_type=f32)
              + bf3_ref[...])                              # [B, 128]
    out_ref[...] = logits.astype(out_ref.dtype)


_PREP_ORDER = ("w1", "b1", "w2", "b2", "w3", "b3", "w4", "b4",
               "wf1", "bf1", "wf2", "bf2", "wf3", "bf3")


def carlini_forward(x_nchw, prep, block_b=16):
    """Full Carlini forward.  x_nchw: [N, 3, 16, 16] f32 -> logits [N, 10]."""
    N, C, H, W = x_nchw.shape
    assert (C, H, W) == (3, 16, 16), (C, H, W)
    B = int(block_b)
    assert B % 8 == 0, "block_b must be a multiple of 8"
    n_pad = (-N) % B
    Npad = N + n_pad

    # NCHW -> per-sample row image [N, 16, 48] (lane = w*3 + c), then pack each
    # sample into a 20-row block: [zero pad, 16 image rows, 3 zero rows], and
    # flatten the batch into one tall row stack.
    xr = jnp.transpose(x_nchw, (0, 2, 3, 1)).reshape(N, H, W * C)
    xp = jnp.pad(xr, ((0, n_pad), (1, 3), (0, 0)))         # [Npad, 20, 48]
    x_stack = xp.reshape(Npad * 20, W * C)                  # [Npad*20, 48]

    in_specs = [pl.BlockSpec((B * 20, W * C), lambda n: (n, 0))]
    args = [x_stack]
    for name in _PREP_ORDER:
        a = prep[name]
        in_specs.append(pl.BlockSpec(a.shape, lambda n, _nd=a.ndim: (0,) * _nd))
        args.append(a)

    out = pl.pallas_call(
        _carlini_fused_kernel,
        out_shape=jax.ShapeDtypeStruct((Npad, 128), jnp.float32),
        grid=(Npad // B,),
        in_specs=in_specs,
        out_specs=pl.BlockSpec((B, 128), lambda n: (n, 0)),
        scratch_shapes=[
            pltpu.VMEM((B * 20, 128), jnp.float32),   # p2: padded conv2 input stack
            pltpu.VMEM((B * 20, 64), jnp.float32),    # s2: pool1 w-reduced rows
            pltpu.VMEM((B * 10, 64), jnp.float32),    # p3: padded conv3 input stack
            pltpu.VMEM((B * 10, 128), jnp.float32),   # p4: padded conv4 input stack
            pltpu.VMEM((B * 10, 64), jnp.float32),    # s4: pool2 w-reduced rows
        ],
        compiler_params=pltpu.CompilerParams(dimension_semantics=("parallel",)),
    )(*args)
    return out[:N, :10]


# ----------------------------------------------------------------------------
# One-time parameter preparation (plain numpy glue, outside the hot path).
# ----------------------------------------------------------------------------
def prepare_params(p):
    def banded(w_hwio, W, perm=None):
        # [3,3,Cin,Cout] -> [3, W*Cin, W*Cout]: for tap dy, out row-image of a
        # whole image row is (shifted input row) @ banded matrix; SAME padding in
        # w is encoded by leaving out-of-range blocks zero.
        w = np.asarray(w_hwio, np.float32)
        Cin, Cout = w.shape[2], w.shape[3]
        M = np.zeros((3, W * Cin, W * Cout), np.float32)
        for dy in range(3):
            for dx in range(3):
                for wo in range(W):
                    wi = wo + dx - 1
                    if 0 <= wi < W:
                        M[dy, wi * Cin:(wi + 1) * Cin,
                          wo * Cout:(wo + 1) * Cout] = w[dy, dx]
        if perm is not None:
            M = M[:, :, perm]
        return jnp.asarray(M).astype(jnp.bfloat16)

    def tiled_bias(b, W, perm=None):
        t = np.tile(np.asarray(b, np.float32), W)
        if perm is not None:
            t = t[perm]
        return jnp.asarray(t.reshape(1, -1))

    def pool_perm(W, C):
        # Output-column permutation: [even-w block | odd-w block], w-major c-minor.
        c = np.arange(C)
        even = (np.arange(0, W, 2)[:, None] * C + c[None, :]).reshape(-1)
        odd = (np.arange(1, W, 2)[:, None] * C + c[None, :]).reshape(-1)
        return np.concatenate([even, odd])

    perm2 = pool_perm(16, 8)    # conv2: W=16, Cout=8
    perm4 = pool_perm(8, 16)    # conv4: W=8,  Cout=16

    # fc1: permute rows from PyTorch NCHW flatten (c*16 + h*4 + w) to the
    # kernel's NHWC feature layout (h-major, then w*16 + c), split per h row.
    Hf, Wf, Cf = 4, 4, 16
    fc1 = np.asarray(p["fc1_w"], np.float32)                 # [256, 256]
    src = np.empty((Hf, Wf, Cf), np.int64)
    for h in range(Hf):
        for w in range(Wf):
            for c in range(Cf):
                src[h, w, c] = c * (Hf * Wf) + h * Wf + w
    wf1 = fc1[src.reshape(-1), :].reshape(Hf, Wf * Cf, 256)

    # fc3: pad output dim 10 -> 128 for a lane-dense final store.
    fc3 = np.asarray(p["fc3_w"], np.float32)
    wf3 = np.zeros((256, 128), np.float32)
    wf3[:, :10] = fc3
    fb3 = np.zeros((1, 128), np.float32)
    fb3[0, :10] = np.asarray(p["fc3_b"], np.float32)

    return {
        "w1": banded(p["c1_w"], 16),        "b1": tiled_bias(p["c1_b"], 16),
        "w2": banded(p["c2_w"], 16, perm2), "b2": tiled_bias(p["c2_b"], 16, perm2),
        "w3": banded(p["c3_w"], 8),         "b3": tiled_bias(p["c3_b"], 8),
        "w4": banded(p["c4_w"], 8, perm4),  "b4": tiled_bias(p["c4_b"], 8, perm4),
        "wf1": jnp.asarray(wf1).astype(jnp.bfloat16),
        "bf1": jnp.asarray(np.asarray(p["fc1_b"], np.float32).reshape(1, 256)),
        "wf2": jnp.asarray(p["fc2_w"]).astype(jnp.bfloat16),
        "bf2": jnp.asarray(np.asarray(p["fc2_b"], np.float32).reshape(1, 256)),
        "wf3": jnp.asarray(wf3).astype(jnp.bfloat16),
        "bf3": jnp.asarray(fb3),
    }


# ----------------------------------------------------------------------------
# Pure-JAX f32 reference (correctness check only).
# ----------------------------------------------------------------------------
def reference_forward(x_nchw, p):
    x = jnp.transpose(x_nchw, (0, 2, 3, 1))

    def conv(h, w, b):
        y = jax.lax.conv_general_dilated(
            h, w, (1, 1), "SAME", dimension_numbers=("NHWC", "HWIO", "NHWC"))
        return jnp.maximum(y + b, 0.0)

    def pool(h):
        return jax.lax.reduce_window(
            h, -jnp.inf, jax.lax.max, (1, 2, 2, 1), (1, 2, 2, 1), "VALID")

    h = conv(x, p["c1_w"], p["c1_b"])
    h = conv(h, p["c2_w"], p["c2_b"])
    h = pool(h)
    h = conv(h, p["c3_w"], p["c3_b"])
    h = conv(h, p["c4_w"], p["c4_b"])
    h = pool(h)
    f = jnp.transpose(h, (0, 3, 1, 2)).reshape(h.shape[0], -1)   # NCHW flatten
    z = jnp.maximum(f @ p["fc1_w"] + p["fc1_b"], 0.0)
    z = jnp.maximum(z @ p["fc2_w"] + p["fc2_b"], 0.0)
    return z @ p["fc3_w"] + p["fc3_b"]


# ----------------------------------------------------------------------------
# Deterministic synthetic parameters (shapes implied by the module).
# ----------------------------------------------------------------------------
def init_params():
    key = jax.random.PRNGKey(0)
    ks = jax.random.split(key, 14)

    def conv_w(k, cin, cout):
        return (jax.random.normal(k, (3, 3, cin, cout), jnp.float32)
                / jnp.sqrt(9.0 * cin))

    def lin_w(k, cin, cout):
        return jax.random.normal(k, (cin, cout), jnp.float32) / jnp.sqrt(1.0 * cin)

    def bias(k, n):
        return 0.1 * jax.random.normal(k, (n,), jnp.float32)

    n_channel = 16 * 4 * 4   # flattened feature size for 16x16 input
    return {
        "c1_w": conv_w(ks[0], 3, 8),   "c1_b": bias(ks[1], 8),
        "c2_w": conv_w(ks[2], 8, 8),   "c2_b": bias(ks[3], 8),
        "c3_w": conv_w(ks[4], 8, 16),  "c3_b": bias(ks[5], 16),
        "c4_w": conv_w(ks[6], 16, 16), "c4_b": bias(ks[7], 16),
        "fc1_w": lin_w(ks[8], n_channel, 256), "fc1_b": bias(ks[9], 256),
        "fc2_w": lin_w(ks[10], 256, 256),      "fc2_b": bias(ks[11], 256),
        "fc3_w": lin_w(ks[12], 256, 10),       "fc3_b": bias(ks[13], 10),
    }


if __name__ == "__main__":
    params = init_params()
    prep = prepare_params(params)
    fwd = jax.jit(carlini_forward, static_argnames=("block_b",))

    # Small check: batch 2 (padded to one 8-sample block, single grid step).
    x = jax.random.normal(jax.random.PRNGKey(0), (2, 3, 16, 16), jnp.float32)
    out = jax.block_until_ready(fwd(x, prep, block_b=8))
    assert out.shape == (2, 10), out.shape
    ref = reference_forward(x, params)
    err = float(jnp.max(jnp.abs(out - ref)))
    # bf16 MXU inputs vs f32 reference: error is well within this tolerance.
    assert jnp.allclose(out, ref, rtol=2e-2, atol=2e-2), err

    # Larger batch: 32 samples -> 2 "parallel" grid steps of 16 samples each.
    x2 = jax.random.normal(jax.random.PRNGKey(1), (32, 3, 16, 16), jnp.float32)
    out2 = jax.block_until_ready(fwd(x2, prep, block_b=16))
    assert out2.shape == (32, 10), out2.shape
    ref2 = reference_forward(x2, params)
    err2 = float(jnp.max(jnp.abs(out2 - ref2)))
    # Slightly looser: 16x more logits sampled from the same bf16 error tail.
    assert jnp.allclose(out2, ref2, rtol=2e-2, atol=4e-2), err2

    print("KERNEL_OK")
</pallas_src>

<mosaic_0001>
module attributes {stable_mosaic.version = 11 : i64} {
  func.func @_carlini_fused_kernel(%arg0: i32, %arg1: memref<160x48xf32, #tpu.memory_space<vmem>>, %arg2: memref<3x48x128xbf16, #tpu.memory_space<vmem>>, %arg3: memref<1x128xf32, #tpu.memory_space<vmem>>, %arg4: memref<3x128x128xbf16, #tpu.memory_space<vmem>>, %arg5: memref<1x128xf32, #tpu.memory_space<vmem>>, %arg6: memref<3x64x128xbf16, #tpu.memory_space<vmem>>, %arg7: memref<1x128xf32, #tpu.memory_space<vmem>>, %arg8: memref<3x128x128xbf16, #tpu.memory_space<vmem>>, %arg9: memref<1x128xf32, #tpu.memory_space<vmem>>, %arg10: memref<4x64x256xbf16, #tpu.memory_space<vmem>>, %arg11: memref<1x256xf32, #tpu.memory_space<vmem>>, %arg12: memref<256x256xbf16, #tpu.memory_space<vmem>>, %arg13: memref<1x256xf32, #tpu.memory_space<vmem>>, %arg14: memref<256x128xbf16, #tpu.memory_space<vmem>>, %arg15: memref<1x128xf32, #tpu.memory_space<vmem>>, %arg16: memref<8x128xf32, #tpu.memory_space<vmem>>, %arg17: memref<160x128xf32, #tpu.memory_space<vmem>>, %arg18: memref<160x64xf32, #tpu.memory_space<vmem>>, %arg19: memref<80x64xf32, #tpu.memory_space<vmem>>, %arg20: memref<80x128xf32, #tpu.memory_space<vmem>>, %arg21: memref<80x64xf32, #tpu.memory_space<vmem>>) attributes {dimension_semantics = [#tpu.dimension_semantics<parallel>], iteration_bounds = array<i64: 1>, scalar_prefetch = 0 : i64, scratch_operands = 5 : i64, tpu.core_type = #tpu.core_type<tc>, window_params = [{transform_indices = @transform_0, window_bounds = array<i64: 160, 48>}, {pipeline_mode = #tpu.pipeline_mode<synchronous>, transform_indices = @transform_1, window_bounds = array<i64: 3, 48, 128>}, {pipeline_mode = #tpu.pipeline_mode<synchronous>, transform_indices = @transform_2, window_bounds = array<i64: 1, 128>}, {pipeline_mode = #tpu.pipeline_mode<synchronous>, transform_indices = @transform_3, window_bounds = array<i64: 3, 128, 128>}, {pipeline_mode = #tpu.pipeline_mode<synchronous>, transform_indices = @transform_4, window_bounds = array<i64: 1, 128>}, {pipeline_mode = #tpu.pipeline_mode<synchronous>, transform_indices = @transform_5, window_bounds = array<i64: 3, 64, 128>}, {pipeline_mode = #tpu.pipeline_mode<synchronous>, transform_indices = @transform_6, window_bounds = array<i64: 1, 128>}, {pipeline_mode = #tpu.pipeline_mode<synchronous>, transform_indices = @transform_7, window_bounds = array<i64: 3, 128, 128>}, {pipeline_mode = #tpu.pipeline_mode<synchronous>, transform_indices = @transform_8, window_bounds = array<i64: 1, 128>}, {pipeline_mode = #tpu.pipeline_mode<synchronous>, transform_indices = @transform_9, window_bounds = array<i64: 4, 64, 256>}, {pipeline_mode = #tpu.pipeline_mode<synchronous>, transform_indices = @transform_10, window_bounds = array<i64: 1, 256>}, {pipeline_mode = #tpu.pipeline_mode<synchronous>, transform_indices = @transform_11, window_bounds = array<i64: 256, 256>}, {pipeline_mode = #tpu.pipeline_mode<synchronous>, transform_indices = @transform_12, window_bounds = array<i64: 1, 256>}, {pipeline_mode = #tpu.pipeline_mode<synchronous>, transform_indices = @transform_13, window_bounds = array<i64: 256, 128>}, {pipeline_mode = #tpu.pipeline_mode<synchronous>, transform_indices = @transform_14, window_bounds = array<i64: 1, 128>}, {transform_indices = @transform_15, window_bounds = array<i64: 8, 128>}]} {
    %c0 = arith.constant 0 : index
    %c0_0 = arith.constant 0 : index
    %0 = vector.load %arg1[%c0, %c0_0] : memref<160x48xf32, #tpu.memory_space<vmem>>, vector<158x48xf32>
    %1 = arith.truncf %0 : vector<158x48xf32> to vector<158x48xbf16>
    %c0_1 = arith.constant 0 : index
    %c0_2 = arith.constant 0 : index
    %c0_3 = arith.constant 0 : index
    %2 = vector.load %arg2[%c0_1, %c0_2, %c0_3] : memref<3x48x128xbf16, #tpu.memory_space<vmem>>, vector<1x48x128xbf16>
    %3 = vector.shape_cast %2 : vector<1x48x128xbf16> to vector<48x128xbf16>
    %cst = arith.constant dense<0.000000e+00> : vector<158x128xf32>
    %4 = tpu.matmul %1, %3, %cst {dimension_numbers = #tpu.dot_dimension_numbers<[1], [0], [0], [1], [0, 0, 1, 1], [], []>} : vector<158x48xbf16>, vector<48x128xbf16>, vector<158x128xf32> -> vector<158x128xf32>
    %c1 = arith.constant 1 : index
    %c0_4 = arith.constant 0 : index
    %5 = vector.load %arg1[%c1, %c0_4] : memref<160x48xf32, #tpu.memory_space<vmem>>, vector<158x48xf32>
    %6 = arith.truncf %5 : vector<158x48xf32> to vector<158x48xbf16>
    %c1_5 = arith.constant 1 : index
    %c0_6 = arith.constant 0 : index
    %c0_7 = arith.constant 0 : index
    %7 = vector.load %arg2[%c1_5, %c0_6, %c0_7] : memref<3x48x128xbf16, #tpu.memory_space<vmem>>, vector<1x48x128xbf16>
    %8 = vector.shape_cast %7 : vector<1x48x128xbf16> to vector<48x128xbf16>
    %cst_8 = arith.constant dense<0.000000e+00> : vector<158x128xf32>
    %9 = tpu.matmul %6, %8, %cst_8 {dimension_numbers = #tpu.dot_dimension_numbers<[1], [0], [0], [1], [0, 0, 1, 1], [], []>} : vector<158x48xbf16>, vector<48x128xbf16>, vector<158x128xf32> -> vector<158x128xf32>
    %10 = arith.addf %4, %9 : vector<158x128xf32>
    %c2 = arith.constant 2 : index
    %c0_9 = arith.constant 0 : index
    %11 = vector.load %arg1[%c2, %c0_9] : memref<160x48xf32, #tpu.memory_space<vmem>>, vector<158x48xf32>
    %12 = arith.truncf %11 : vector<158x48xf32> to vector<158x48xbf16>
    %c2_10 = arith.constant 2 : index
    %c0_11 = arith.constant 0 : index
    %c0_12 = arith.constant 0 : index
    %13 = vector.load %arg2[%c2_10, %c0_11, %c0_12] : memref<3x48x128xbf16, #tpu.memory_space<vmem>>, vector<1x48x128xbf16>
    %14 = vector.shape_cast %13 : vector<1x48x128xbf16> to vector<48x128xbf16>
    %cst_13 = arith.constant dense<0.000000e+00> : vector<158x128xf32>
    %15 = tpu.matmul %12, %14, %cst_13 {dimension_numbers = #tpu.dot_dimension_numbers<[1], [0], [0], [1], [0, 0, 1, 1], [], []>} : vector<158x48xbf16>, vector<48x128xbf16>, vector<158x128xf32> -> vector<158x128xf32>
    %16 = arith.addf %10, %15 : vector<158x128xf32>
    %c0_14 = arith.constant 0 : index
    %c0_15 = arith.constant 0 : index
    %17 = vector.load %arg3[%c0_14, %c0_15] : memref<1x128xf32, #tpu.memory_space<vmem>>, vector<1x128xf32>
    %18 = vector.broadcast %17 : vector<1x128xf32> to vector<158x128xf32>
    %19 = arith.addf %16, %18 : vector<158x128xf32>
    %cst_16 = arith.constant 0.000000e+00 : f32
    %20 = vector.broadcast %cst_16 : f32 to vector<158x128xf32>
    %21 = arith.maximumf %19, %20 : vector<158x128xf32>
    %22 = tpu.iota {dimensions = array<i32: 0>} : vector<158x128xi32>
    %23 = arith.sitofp %22 : vector<158x128xi32> to vector<158x128xf32>
    %cst_17 = arith.constant 5.000000e-02 : f32
    %24 = vector.broadcast %cst_17 : f32 to vector<158x128xf32>
    %25 = arith.mulf %23, %24 : vector<158x128xf32>
    %26 = math.floor %25 : vector<158x128xf32>
    %cst_18 = arith.constant 2.000000e+01 : f32
    %27 = vector.broadcast %cst_18 : f32 to vector<158x128xf32>
    %28 = arith.mulf %26, %27 : vector<158x128xf32>
    %29 = arith.subf %23, %28 : vector<158x128xf32>
    %cst_19 = arith.constant 1.600000e+01 : f32
    %30 = vector.broadcast %cst_19 : f32 to vector<158x128xf32>
    %31 = arith.cmpf olt, %29, %30 : vector<158x128xf32>
    %cst_20 = arith.constant 0.000000e+00 : f32
    %32 = vector.broadcast %cst_20 : f32 to vector<158x128xf32>
    %33 = arith.select %31, %21, %32 : vector<158x128xi1>, vector<158x128xf32>
    %c1_21 = arith.constant 1 : index
    %c0_22 = arith.constant 0 : index
    %34 = vector.load %arg17[%c1_21, %c0_22] : memref<160x128xf32, #tpu.memory_space<vmem>>, vector<158x128xf32>
    tpu.vector_store %arg17[%c1_21, %c0_22], %33 {strides = array<i32>} : memref<160x128xf32, #tpu.memory_space<vmem>>, vector<158x128xf32>,
    %cst_23 = arith.constant 0.000000e+00 : f32
    %35 = vector.broadcast %cst_23 : f32 to vector<1x128xf32>
    %c0_24 = arith.constant 0 : index
    %c0_25 = arith.constant 0 : index
    %36 = vector.load %arg17[%c0_24, %c0_25] : memref<160x128xf32, #tpu.memory_space<vmem>>, vector<1x128xf32>
    tpu.vector_store %arg17[%c0_24, %c0_25], %35 {strides = array<i32>} : memref<160x128xf32, #tpu.memory_space<vmem>>, vector<1x128xf32>,
    %cst_26 = arith.constant 0.000000e+00 : f32
    %37 = vector.broadcast %cst_26 : f32 to vector<1x128xf32>
    %c159 = arith.constant 159 : index
    %c0_27 = arith.constant 0 : index
    %38 = vector.load %arg17[%c159, %c0_27] : memref<160x128xf32, #tpu.memory_space<vmem>>, vector<1x128xf32>
    tpu.vector_store %arg17[%c159, %c0_27], %37 {strides = array<i32>} : memref<160x128xf32, #tpu.memory_space<vmem>>, vector<1x128xf32>,
    %c0_28 = arith.constant 0 : index
    %c0_29 = arith.constant 0 : index
    %39 = vector.load %arg17[%c0_28, %c0_29] : memref<160x128xf32, #tpu.memory_space<vmem>>, vector<158x128xf32>
    %40 = arith.truncf %39 : vector<158x128xf32> to vector<158x128xbf16>
    %c0_30 = arith.constant 0 : index
    %c0_31 = arith.constant 0 : index
    %c0_32 = arith.constant 0 : index
    %41 = vector.load %arg4[%c0_30, %c0_31, %c0_32] : memref<3x128x128xbf16, #tpu.memory_space<vmem>>, vector<1x128x128xbf16>
    %42 = vector.shape_cast %41 : vector<1x128x128xbf16> to vector<128x128xbf16>
    %cst_33 = arith.constant dense<0.000000e+00> : vector<158x128xf32>
    %43 = tpu.matmul %40, %42, %cst_33 {dimension_numbers = #tpu.dot_dimension_numbers<[1], [0], [0], [1], [0, 0, 1, 1], [], []>} : vector<158x128xbf16>, vector<128x128xbf16>, vector<158x128xf32> -> vector<158x128xf32>
    %c1_34 = arith.constant 1 : index
    %c0_35 = arith.constant 0 : index
    %44 = vector.load %arg17[%c1_34, %c0_35] : memref<160x128xf32, #tpu.memory_space<vmem>>, vector<158x128xf32>
    %45 = arith.truncf %44 : vector<158x128xf32> to vector<158x128xbf16>
    %c1_36 = arith.constant 1 : index
    %c0_37 = arith.constant 0 : index
    %c0_38 = arith.constant 0 : index
    %46 = vector.load %arg4[%c1_36, %c0_37, %c0_38] : memref<3x128x128xbf16, #tpu.memory_space<vmem>>, vector<1x128x128xbf16>
    %47 = vector.shape_cast %46 : vector<1x128x128xbf16> to vector<128x128xbf16>
    %cst_39 = arith.constant dense<0.000000e+00> : vector<158x128xf32>
    %48 = tpu.matmul %45, %47, %cst_39 {dimension_numbers = #tpu.dot_dimension_numbers<[1], [0], [0], [1], [0, 0, 1, 1], [], []>} : vector<158x128xbf16>, vector<128x128xbf16>, vector<158x128xf32> -> vector<158x128xf32>
    %49 = arith.addf %43, %48 : vector<158x128xf32>
    %c2_40 = arith.constant 2 : index
    %c0_41 = arith.constant 0 : index
    %50 = vector.load %arg17[%c2_40, %c0_41] : memref<160x128xf32, #tpu.memory_space<vmem>>, vector<158x128xf32>
    %51 = arith.truncf %50 : vector<158x128xf32> to vector<158x128xbf16>
    %c2_42 = arith.constant 2 : index
    %c0_43 = arith.constant 0 : index
    %c0_44 = arith.constant 0 : index
    %52 = vector.load %arg4[%c2_42, %c0_43, %c0_44] : memref<3x128x128xbf16, #tpu.memory_space<vmem>>, vector<1x128x128xbf16>
    %53 = vector.shape_cast %52 : vector<1x128x128xbf16> to vector<128x128xbf16>
    %cst_45 = arith.constant dense<0.000000e+00> : vector<158x128xf32>
    %54 = tpu.matmul %51, %53, %cst_45 {dimension_numbers = #tpu.dot_dimension_numbers<[1], [0], [0], [1], [0, 0, 1, 1], [], []>} : vector<158x128xbf16>, vector<128x128xbf16>, vector<158x128xf32> -> vector<158x128xf32>
    %55 = arith.addf %49, %54 : vector<158x128xf32>
    %c0_46 = arith.constant 0 : index
    %c0_47 = arith.constant 0 : index
    %56 = vector.load %arg5[%c0_46, %c0_47] : memref<1x128xf32, #tpu.memory_space<vmem>>, vector<1x128xf32>
    %57 = vector.broadcast %56 : vector<1x128xf32> to vector<158x128xf32>
    %58 = arith.addf %55, %57 : vector<158x128xf32>
    %cst_48 = arith.constant 0.000000e+00 : f32
    %59 = vector.broadcast %cst_48 : f32 to vector<158x128xf32>
    %60 = arith.maximumf %58, %59 : vector<158x128xf32>
    %61 = vector.extract_strided_slice %60 {offsets = [0, 0], sizes = [158, 64], strides = [1, 1]} : vector<158x128xf32> to vector<158x64xf32>
    %62 = vector.extract_strided_slice %60 {offsets = [0, 64], sizes = [158, 64], strides = [1, 1]} : vector<158x128xf32> to vector<158x64xf32>
    %63 = arith.maximumf %61, %62 : vector<158x64xf32>
    %c0_49 = arith.constant 0 : index
    %c0_50 = arith.constant 0 : index
    %64 = vector.load %arg18[%c0_49, %c0_50] : memref<160x64xf32, #tpu.memory_space<vmem>>, vector<158x64xf32>
    tpu.vector_store %arg18[%c0_49, %c0_50], %63 {strides = array<i32>} : memref<160x64xf32, #tpu.memory_space<vmem>>, vector<158x64xf32>,
    %c0_51 = arith.constant 0 : index
    %c0_52 = arith.constant 0 : index
    %65 = tpu.strided_load %arg18[%c0_51, %c0_52] {strides = array<i32: 2, 1>} : memref<160x64xf32, #tpu.memory_space<vmem>>, vector<79x64xf32>
    %c1_53 = arith.constant 1 : index
    %c0_54 = arith.constant 0 : index
    %66 = tpu.strided_load %arg18[%c1_53, %c0_54] {strides = array<i32: 2, 1>} : memref<160x64xf32, #tpu.memory_space<vmem>>, vector<79x64xf32>
    %67 = arith.maximumf %65, %66 : vector<79x64xf32>
    %68 = tpu.iota {dimensions = array<i32: 0>} : vector<79x64xi32>
    %69 = arith.sitofp %68 : vector<79x64xi32> to vector<79x64xf32>
    %cst_55 = arith.constant 1.000000e-01 : f32
    %70 = vector.broadcast %cst_55 : f32 to vector<79x64xf32>
    %71 = arith.mulf %69, %70 : vector<79x64xf32>
    %72 = math.floor %71 : vector<79x64xf32>
    %cst_56 = arith.constant 1.000000e+01 : f32
    %73 = vector.broadcast %cst_56 : f32 to vector<79x64xf32>
    %74 = arith.mulf %72, %73 : vector<79x64xf32>
    %75 = arith.subf %69, %74 : vector<79x64xf32>
    %cst_57 = arith.constant 8.000000e+00 : f32
    %76 = vector.broadcast %cst_57 : f32 to vector<79x64xf32>
    %77 = arith.cmpf olt, %75, %76 : vector<79x64xf32>
    %cst_58 = arith.constant 0.000000e+00 : f32
    %78 = vector.broadcast %cst_58 : f32 to vector<79x64xf32>
    %79 = arith.select %77, %67, %78 : vector<79x64xi1>, vector<79x64xf32>
    %c1_59 = arith.constant 1 : index
    %c0_60 = arith.constant 0 : index
    %80 = vector.load %arg19[%c1_59, %c0_60] : memref<80x64xf32, #tpu.memory_space<vmem>>, vector<79x64xf32>
    tpu.vector_store %arg19[%c1_59, %c0_60], %79 {strides = array<i32>} : memref<80x64xf32, #tpu.memory_space<vmem>>, vector<79x64xf32>,
    %cst_61 = arith.constant 0.000000e+00 : f32
    %81 = vector.broadcast %cst_61 : f32 to vector<1x64xf32>
    %c0_62 = arith.constant 0 : index
    %c0_63 = arith.constant 0 : index
    %82 = vector.load %arg19[%c0_62, %c0_63] : memref<80x64xf32, #tpu.memory_space<vmem>>, vector<1x64xf32>
    tpu.vector_store %arg19[%c0_62, %c0_63], %81 {strides = array<i32>} : memref<80x64xf32, #tpu.memory_space<vmem>>, vector<1x64xf32>,
    %c0_64 = arith.constant 0 : index
    %c0_65 = arith.constant 0 : index
    %83 = vector.load %arg19[%c0_64, %c0_65] : memref<80x64xf32, #tpu.memory_space<vmem>>, vector<78x64xf32>
    %84 = arith.truncf %83 : vector<78x64xf32> to vector<78x64xbf16>
    %c0_66 = arith.constant 0 : index
    %c0_67 = arith.constant 0 : index
    %c0_68 = arith.constant 0 : index
    %85 = vector.load %arg6[%c0_66, %c0_67, %c0_68] : memref<3x64x128xbf16, #tpu.memory_space<vmem>>, vector<1x64x128xbf16>
    %86 = vector.shape_cast %85 : vector<1x64x128xbf16> to vector<64x128xbf16>
    %cst_69 = arith.constant dense<0.000000e+00> : vector<78x128xf32>
    %87 = tpu.matmul %84, %86, %cst_69 {dimension_numbers = #tpu.dot_dimension_numbers<[1], [0], [0], [1], [0, 0, 1, 1], [], []>} : vector<78x64xbf16>, vector<64x128xbf16>, vector<78x128xf32> -> vector<78x128xf32>
    %c1_70 = arith.constant 1 : index
    %c0_71 = arith.constant 0 : index
    %88 = vector.load %arg19[%c1_70, %c0_71] : memref<80x64xf32, #tpu.memory_space<vmem>>, vector<78x64xf32>
    %89 = arith.truncf %88 : vector<78x64xf32> to vector<78x64xbf16>
    %c1_72 = arith.constant 1 : index
    %c0_73 = arith.constant 0 : index
    %c0_74 = arith.constant 0 : index
    %90 = vector.load %arg6[%c1_72, %c0_73, %c0_74] : memref<3x64x128xbf16, #tpu.memory_space<vmem>>, vector<1x64x128xbf16>
    %91 = vector.shape_cast %90 : vector<1x64x128xbf16> to vector<64x128xbf16>
    %cst_75 = arith.constant dense<0.000000e+00> : vector<78x128xf32>
    %92 = tpu.matmul %89, %91, %cst_75 {dimension_numbers = #tpu.dot_dimension_numbers<[1], [0], [0], [1], [0, 0, 1, 1], [], []>} : vector<78x64xbf16>, vector<64x128xbf16>, vector<78x128xf32> -> vector<78x128xf32>
    %93 = arith.addf %87, %92 : vector<78x128xf32>
    %c2_76 = arith.constant 2 : index
    %c0_77 = arith.constant 0 : index
    %94 = vector.load %arg19[%c2_76, %c0_77] : memref<80x64xf32, #tpu.memory_space<vmem>>, vector<78x64xf32>
    %95 = arith.truncf %94 : vector<78x64xf32> to vector<78x64xbf16>
    %c2_78 = arith.constant 2 : index
    %c0_79 = arith.constant 0 : index
    %c0_80 = arith.constant 0 : index
    %96 = vector.load %arg6[%c2_78, %c0_79, %c0_80] : memref<3x64x128xbf16, #tpu.memory_space<vmem>>, vector<1x64x128xbf16>
    %97 = vector.shape_cast %96 : vector<1x64x128xbf16> to vector<64x128xbf16>
    %cst_81 = arith.constant dense<0.000000e+00> : vector<78x128xf32>
    %98 = tpu.matmul %95, %97, %cst_81 {dimension_numbers = #tpu.dot_dimension_numbers<[1], [0], [0], [1], [0, 0, 1, 1], [], []>} : vector<78x64xbf16>, vector<64x128xbf16>, vector<78x128xf32> -> vector<78x128xf32>
    %99 = arith.addf %93, %98 : vector<78x128xf32>
    %c0_82 = arith.constant 0 : index
    %c0_83 = arith.constant 0 : index
    %100 = vector.load %arg7[%c0_82, %c0_83] : memref<1x128xf32, #tpu.memory_space<vmem>>, vector<1x128xf32>
    %101 = vector.broadcast %100 : vector<1x128xf32> to vector<78x128xf32>
    %102 = arith.addf %99, %101 : vector<78x128xf32>
    %cst_84 = arith.constant 0.000000e+00 : f32
    %103 = vector.broadcast %cst_84 : f32 to vector<78x128xf32>
    %104 = arith.maximumf %102, %103 : vector<78x128xf32>
    %105 = tpu.iota {dimensions = array<i32: 0>} : vector<78x128xi32>
    %106 = arith.sitofp %105 : vector<78x128xi32> to vector<78x128xf32>
    %cst_85 = arith.constant 1.000000e-01 : f32
    %107 = vector.broadcast %cst_85 : f32 to vector<78x128xf32>
    %108 = arith.mulf %106, %107 : vector<78x128xf32>
    %109 = math.floor %108 : vector<78x128xf32>
    %cst_86 = arith.constant 1.000000e+01 : f32
    %110 = vector.broadcast %cst_86 : f32 to vector<78x128xf32>
    %111 = arith.mulf %109, %110 : vector<78x128xf32>
    %112 = arith.subf %106, %111 : vector<78x128xf32>
    %cst_87 = arith.constant 8.000000e+00 : f32
    %113 = vector.broadcast %cst_87 : f32 to vector<78x128xf32>
    %114 = arith.cmpf olt, %112, %113 : vector<78x128xf32>
    %cst_88 = arith.constant 0.000000e+00 : f32
    %115 = vector.broadcast %cst_88 : f32 to vector<78x128xf32>
    %116 = arith.select %114, %104, %115 : vector<78x128xi1>, vector<78x128xf32>
    %c1_89 = arith.constant 1 : index
    %c0_90 = arith.constant 0 : index
    %117 = vector.load %arg20[%c1_89, %c0_90] : memref<80x128xf32, #tpu.memory_space<vmem>>, vector<78x128xf32>
    tpu.vector_store %arg20[%c1_89, %c0_90], %116 {strides = array<i32>} : memref<80x128xf32, #tpu.memory_space<vmem>>, vector<78x128xf32>,
    %cst_91 = arith.constant 0.000000e+00 : f32
    %118 = vector.broadcast %cst_91 : f32 to vector<1x128xf32>
    %c0_92 = arith.constant 0 : index
    %c0_93 = arith.constant 0 : index
    %119 = vector.load %arg20[%c0_92, %c0_93] : memref<80x128xf32, #tpu.memory_space<vmem>>, vector<1x128xf32>
    tpu.vector_store %arg20[%c0_92, %c0_93], %118 {strides = array<i32>} : memref<80x128xf32, #tpu.memory_space<vmem>>, vector<1x128xf32>,
    %cst_94 = arith.constant 0.000000e+00 : f32
    %120 = vector.broadcast %cst_94 : f32 to vector<1x128xf32>
    %c79 = arith.constant 79 : index
    %c0_95 = arith.constant 0 : index
    %121 = vector.load %arg20[%c79, %c0_95] : memref<80x128xf32, #tpu.memory_space<vmem>>, vector<1x128xf32>
    tpu.vector_store %arg20[%c79, %c0_95], %120 {strides = array<i32>} : memref<80x128xf32, #tpu.memory_space<vmem>>, vector<1x128xf32>,
    %c0_96 = arith.constant 0 : index
    %c0_97 = arith.constant 0 : index
    %122 = vector.load %arg20[%c0_96, %c0_97] : memref<80x128xf32, #tpu.memory_space<vmem>>, vector<78x128xf32>
    %123 = arith.truncf %122 : vector<78x128xf32> to vector<78x128xbf16>
    %c0_98 = arith.constant 0 : index
    %c0_99 = arith.constant 0 : index
    %c0_100 = arith.constant 0 : index
    %124 = vector.load %arg8[%c0_98, %c0_99, %c0_100] : memref<3x128x128xbf16, #tpu.memory_space<vmem>>, vector<1x128x128xbf16>
    %125 = vector.shape_cast %124 : vector<1x128x128xbf16> to vector<128x128xbf16>
    %cst_101 = arith.constant dense<0.000000e+00> : vector<78x128xf32>
    %126 = tpu.matmul %123, %125, %cst_101 {dimension_numbers = #tpu.dot_dimension_numbers<[1], [0], [0], [1], [0, 0, 1, 1], [], []>} : vector<78x128xbf16>, vector<128x128xbf16>, vector<78x128xf32> -> vector<78x128xf32>
    %c1_102 = arith.constant 1 : index
    %c0_103 = arith.constant 0 : index
    %127 = vector.load %arg20[%c1_102, %c0_103] : memref<80x128xf32, #tpu.memory_space<vmem>>, vector<78x128xf32>
    %128 = arith.truncf %127 : vector<78x128xf32> to vector<78x128xbf16>
    %c1_104 = arith.constant 1 : index
    %c0_105 = arith.constant 0 : index
    %c0_106 = arith.constant 0 : index
    %129 = vector.load %arg8[%c1_104, %c0_105, %c0_106] : memref<3x128x128xbf16, #tpu.memory_space<vmem>>, vector<1x128x128xbf16>
    %130 = vector.shape_cast %129 : vector<1x128x128xbf16> to vector<128x128xbf16>
    %cst_107 = arith.constant dense<0.000000e+00> : vector<78x128xf32>
    %131 = tpu.matmul %128, %130, %cst_107 {dimension_numbers = #tpu.dot_dimension_numbers<[1], [0], [0], [1], [0, 0, 1, 1], [], []>} : vector<78x128xbf16>, vector<128x128xbf16>, vector<78x128xf32> -> vector<78x128xf32>
    %132 = arith.addf %126, %131 : vector<78x128xf32>
    %c2_108 = arith.constant 2 : index
    %c0_109 = arith.constant 0 : index
    %133 = vector.load %arg20[%c2_108, %c0_109] : memref<80x128xf32, #tpu.memory_space<vmem>>, vector<78x128xf32>
    %134 = arith.truncf %133 : vector<78x128xf32> to vector<78x128xbf16>
    %c2_110 = arith.constant 2 : index
    %c0_111 = arith.constant 0 : index
    %c0_112 = arith.constant 0 : index
    %135 = vector.load %arg8[%c2_110, %c0_111, %c0_112] : memref<3x128x128xbf16, #tpu.memory_space<vmem>>, vector<1x128x128xbf16>
    %136 = vector.shape_cast %135 : vector<1x128x128xbf16> to vector<128x128xbf16>
    %cst_113 = arith.constant dense<0.000000e+00> : vector<78x128xf32>
    %137 = tpu.matmul %134, %136, %cst_113 {dimension_numbers = #tpu.dot_dimension_numbers<[1], [0], [0], [1], [0, 0, 1, 1], [], []>} : vector<78x128xbf16>, vector<128x128xbf16>, vector<78x128xf32> -> vector<78x128xf32>
    %138 = arith.addf %132, %137 : vector<78x128xf32>
    %c0_114 = arith.constant 0 : index
    %c0_115 = arith.constant 0 : index
    %139 = vector.load %arg9[%c0_114, %c0_115] : memref<1x128xf32, #tpu.memory_space<vmem>>, vector<1x128xf32>
    %140 = vector.broadcast %139 : vector<1x128xf32> to vector<78x128xf32>
    %141 = arith.addf %138, %140 : vector<78x128xf32>
    %cst_116 = arith.constant 0.000000e+00 : f32
    %142 = vector.broadcast %cst_116 : f32 to vector<78x128xf32>
    %143 = arith.maximumf %141, %142 : vector<78x128xf32>
    %144 = vector.extract_strided_slice %143 {offsets = [0, 0], sizes = [78, 64], strides = [1, 1]} : vector<78x128xf32> to vector<78x64xf32>
    %145 = vector.extract_strided_slice %143 {offsets = [0, 64], sizes = [78, 64], strides = [1, 1]} : vector<78x128xf32> to vector<78x64xf32>
    %146 = arith.maximumf %144, %145 : vector<78x64xf32>
    %c0_117 = arith.constant 0 : index
    %c0_118 = arith.constant 0 : index
    %147 = vector.load %arg21[%c0_117, %c0_118] : memref<80x64xf32, #tpu.memory_space<vmem>>, vector<78x64xf32>
    tpu.vector_store %arg21[%c0_117, %c0_118], %146 {strides = array<i32>} : memref<80x64xf32, #tpu.memory_space<vmem>>, vector<78x64xf32>,
    %c0_119 = arith.constant 0 : index
    %c0_120 = arith.constant 0 : index
    %148 = tpu.strided_load %arg21[%c0_119, %c0_120] {strides = array<i32: 10, 1>} : memref<80x64xf32, #tpu.memory_space<vmem>>, vector<8x64xf32>
    %c1_121 = arith.constant 1 : index
    %c0_122 = arith.constant 0 : index
    %149 = tpu.strided_load %arg21[%c1_121, %c0_122] {strides = array<i32: 10, 1>} : memref<80x64xf32, #tpu.memory_space<vmem>>, vector<8x64xf32>
    %150 = arith.maximumf %148, %149 : vector<8x64xf32>
    %151 = arith.truncf %150 : vector<8x64xf32> to vector<8x64xbf16>
    %c0_123 = arith.constant 0 : index
    %c0_124 = arith.constant 0 : index
    %c0_125 = arith.constant 0 : index
    %152 = vector.load %arg10[%c0_123, %c0_124, %c0_125] : memref<4x64x256xbf16, #tpu.memory_space<vmem>>, vector<1x64x256xbf16>
    %153 = vector.shape_cast %152 : vector<1x64x256xbf16> to vector<64x256xbf16>
    %cst_126 = arith.constant dense<0.000000e+00> : vector<8x256xf32>
    %154 = tpu.matmul %151, %153, %cst_126 {dimension_numbers = #tpu.dot_dimension_numbers<[1], [0], [0], [1], [0, 0, 1, 1], [], []>} : vector<8x64xbf16>, vector<64x256xbf16>, vector<8x256xf32> -> vector<8x256xf32>
    %c2_127 = arith.constant 2 : index
    %c0_128 = arith.constant 0 : index
    %155 = tpu.strided_load %arg21[%c2_127, %c0_128] {strides = array<i32: 10, 1>} : memref<80x64xf32, #tpu.memory_space<vmem>>, vector<8x64xf32>
    %c3 = arith.constant 3 : index
    %c0_129 = arith.constant 0 : index
    %156 = tpu.strided_load %arg21[%c3, %c0_129] {strides = array<i32: 10, 1>} : memref<80x64xf32, #tpu.memory_space<vmem>>, vector<8x64xf32>
    %157 = arith.maximumf %155, %156 : vector<8x64xf32>
    %158 = arith.truncf %157 : vector<8x64xf32> to vector<8x64xbf16>
    %c1_130 = arith.constant 1 : index
    %c0_131 = arith.constant 0 : index
    %c0_132 = arith.constant 0 : index
    %159 = vector.load %arg10[%c1_130, %c0_131, %c0_132] : memref<4x64x256xbf16, #tpu.memory_space<vmem>>, vector<1x64x256xbf16>
    %160 = vector.shape_cast %159 : vector<1x64x256xbf16> to vector<64x256xbf16>
    %cst_133 = arith.constant dense<0.000000e+00> : vector<8x256xf32>
    %161 = tpu.matmul %158, %160, %cst_133 {dimension_numbers = #tpu.dot_dimension_numbers<[1], [0], [0], [1], [0, 0, 1, 1], [], []>} : vector<8x64xbf16>, vector<64x256xbf16>, vector<8x256xf32> -> vector<8x256xf32>
    %162 = arith.addf %154, %161 : vector<8x256xf32>
    %c4 = arith.constant 4 : index
    %c0_134 = arith.constant 0 : index
    %163 = tpu.strided_load %arg21[%c4, %c0_134] {strides = array<i32: 10, 1>} : memref<80x64xf32, #tpu.memory_space<vmem>>, vector<8x64xf32>
    %c5 = arith.constant 5 : index
    %c0_135 = arith.constant 0 : index
    %164 = tpu.strided_load %arg21[%c5, %c0_135] {strides = array<i32: 10, 1>} : memref<80x64xf32, #tpu.memory_space<vmem>>, vector<8x64xf32>
    %165 = arith.maximumf %163, %164 : vector<8x64xf32>
    %166 = arith.truncf %165 : vector<8x64xf32> to vector<8x64xbf16>
    %c2_136 = arith.constant 2 : index
    %c0_137 = arith.constant 0 : index
    %c0_138 = arith.constant 0 : index
    %167 = vector.load %arg10[%c2_136, %c0_137, %c0_138] : memref<4x64x256xbf16, #tpu.memory_space<vmem>>, vector<1x64x256xbf16>
    %168 = vector.shape_cast %167 : vector<1x64x256xbf16> to vector<64x256xbf16>
    %cst_139 = arith.constant dense<0.000000e+00> : vector<8x256xf32>
    %169 = tpu.matmul %166, %168, %cst_139 {dimension_numbers = #tpu.dot_dimension_numbers<[1], [0], [0], [1], [0, 0, 1, 1], [], []>} : vector<8x64xbf16>, vector<64x256xbf16>, vector<8x256xf32> -> vector<8x256xf32>
    %170 = arith.addf %162, %169 : vector<8x256xf32>
    %c6 = arith.constant 6 : index
    %c0_140 = arith.constant 0 : index
    %171 = tpu.strided_load %arg21[%c6, %c0_140] {strides = array<i32: 10, 1>} : memref<80x64xf32, #tpu.memory_space<vmem>>, vector<8x64xf32>
    %c7 = arith.constant 7 : index
    %c0_141 = arith.constant 0 : index
    %172 = tpu.strided_load %arg21[%c7, %c0_141] {strides = array<i32: 10, 1>} : memref<80x64xf32, #tpu.memory_space<vmem>>, vector<8x64xf32>
    %173 = arith.maximumf %171, %172 : vector<8x64xf32>
    %174 = arith.truncf %173 : vector<8x64xf32> to vector<8x64xbf16>
    %c3_142 = arith.constant 3 : index
    %c0_143 = arith.constant 0 : index
    %c0_144 = arith.constant 0 : index
    %175 = vector.load %arg10[%c3_142, %c0_143, %c0_144] : memref<4x64x256xbf16, #tpu.memory_space<vmem>>, vector<1x64x256xbf16>
    %176 = vector.shape_cast %175 : vector<1x64x256xbf16> to vector<64x256xbf16>
    %cst_145 = arith.constant dense<0.000000e+00> : vector<8x256xf32>
    %177 = tpu.matmul %174, %176, %cst_145 {dimension_numbers = #tpu.dot_dimension_numbers<[1], [0], [0], [1], [0, 0, 1, 1], [], []>} : vector<8x64xbf16>, vector<64x256xbf16>, vector<8x256xf32> -> vector<8x256xf32>
    %178 = arith.addf %170, %177 : vector<8x256xf32>
    %c0_146 = arith.constant 0 : index
    %c0_147 = arith.constant 0 : index
    %179 = vector.load %arg11[%c0_146, %c0_147] : memref<1x256xf32, #tpu.memory_space<vmem>>, vector<1x256xf32>
    %180 = vector.broadcast %179 : vector<1x256xf32> to vector<8x256xf32>
    %181 = arith.addf %178, %180 : vector<8x256xf32>
    %cst_148 = arith.constant 0.000000e+00 : f32
    %182 = vector.broadcast %cst_148 : f32 to vector<8x256xf32>
    %183 = arith.maximumf %181, %182 : vector<8x256xf32>
    %184 = arith.truncf %183 : vector<8x256xf32> to vector<8x256xbf16>
    %c0_149 = arith.constant 0 : index
    %c0_150 = arith.constant 0 : index
    %185 = vector.load %arg12[%c0_149, %c0_150] : memref<256x256xbf16, #tpu.memory_space<vmem>>, vector<256x256xbf16>
    %cst_151 = arith.constant dense<0.000000e+00> : vector<8x256xf32>
    %186 = tpu.matmul %184, %185, %cst_151 {dimension_numbers = #tpu.dot_dimension_numbers<[1], [0], [0], [1], [0, 0, 1, 1], [], []>} : vector<8x256xbf16>, vector<256x256xbf16>, vector<8x256xf32> -> vector<8x256xf32>
    %c0_152 = arith.constant 0 : index
    %c0_153 = arith.constant 0 : index
    %187 = vector.load %arg13[%c0_152, %c0_153] : memref<1x256xf32, #tpu.memory_space<vmem>>, vector<1x256xf32>
    %188 = vector.broadcast %187 : vector<1x256xf32> to vector<8x256xf32>
    %189 = arith.addf %186, %188 : vector<8x256xf32>
    %cst_154 = arith.constant 0.000000e+00 : f32
    %190 = vector.broadcast %cst_154 : f32 to vector<8x256xf32>
    %191 = arith.maximumf %189, %190 : vector<8x256xf32>
    %192 = arith.truncf %191 : vector<8x256xf32> to vector<8x256xbf16>
    %c0_155 = arith.constant 0 : index
    %c0_156 = arith.constant 0 : index
    %193 = vector.load %arg14[%c0_155, %c0_156] : memref<256x128xbf16, #tpu.memory_space<vmem>>, vector<256x128xbf16>
    %cst_157 = arith.constant dense<0.000000e+00> : vector<8x128xf32>
    %194 = tpu.matmul %192, %193, %cst_157 {dimension_numbers = #tpu.dot_dimension_numbers<[1], [0], [0], [1], [0, 0, 1, 1], [], []>} : vector<8x256xbf16>, vector<256x128xbf16>, vector<8x128xf32> -> vector<8x128xf32>
    %c0_158 = arith.constant 0 : index
    %c0_159 = arith.constant 0 : index
    %195 = vector.load %arg15[%c0_158, %c0_159] : memref<1x128xf32, #tpu.memory_space<vmem>>, vector<1x128xf32>
    %196 = vector.broadcast %195 : vector<1x128xf32> to vector<8x128xf32>
    %197 = arith.addf %194, %196 : vector<8x128xf32>
    %c0_160 = arith.constant 0 : index
    %c0_161 = arith.constant 0 : index
    %198 = vector.load %arg16[%c0_160, %c0_161] : memref<8x128xf32, #tpu.memory_space<vmem>>, vector<8x128xf32>
    tpu.vector_store %arg16[%c0_160, %c0_161], %197 {strides = array<i32>} : memref<8x128xf32, #tpu.memory_space<vmem>>, vector<8x128xf32>,
    return
  }
  func.func @transform_0(%arg0: i32) -> (i32, i32) {
    %c0_i32 = arith.constant 0 : i32
    %c0_i32_0 = arith.constant 0 : i32
    return %arg0, %c0_i32 : i32, i32
  }
  func.func @transform_1(%arg0: i32) -> (i32, i32, i32) {
    %c0_i32 = arith.constant 0 : i32
    %c0_i32_0 = arith.constant 0 : i32
    %c0_i32_1 = arith.constant 0 : i32
    %c0_i32_2 = arith.constant 0 : i32
    return %c0_i32, %c0_i32_0, %c0_i32_1 : i32, i32, i32
  }
  func.func @transform_2(%arg0: i32) -> (i32, i32) {
    %c0_i32 = arith.constant 0 : i32
    %c0_i32_0 = arith.constant 0 : i32
    %c0_i32_1 = arith.constant 0 : i32
    return %c0_i32, %c0_i32_0 : i32, i32
  }
  func.func @transform_3(%arg0: i32) -> (i32, i32, i32) {
    %c0_i32 = arith.constant 0 : i32
    %c0_i32_0 = arith.constant 0 : i32
    %c0_i32_1 = arith.constant 0 : i32
    %c0_i32_2 = arith.constant 0 : i32
    return %c0_i32, %c0_i32_0, %c0_i32_1 : i32, i32, i32
  }
  func.func @transform_4(%arg0: i32) -> (i32, i32) {
    %c0_i32 = arith.constant 0 : i32
    %c0_i32_0 = arith.constant 0 : i32
    %c0_i32_1 = arith.constant 0 : i32
    return %c0_i32, %c0_i32_0 : i32, i32
  }
  func.func @transform_5(%arg0: i32) -> (i32, i32, i32) {
    %c0_i32 = arith.constant 0 : i32
    %c0_i32_0 = arith.constant 0 : i32
    %c0_i32_1 = arith.constant 0 : i32
    %c0_i32_2 = arith.constant 0 : i32
    return %c0_i32, %c0_i32_0, %c0_i32_1 : i32, i32, i32
  }
  func.func @transform_6(%arg0: i32) -> (i32, i32) {
    %c0_i32 = arith.constant 0 : i32
    %c0_i32_0 = arith.constant 0 : i32
    %c0_i32_1 = arith.constant 0 : i32
    return %c0_i32, %c0_i32_0 : i32, i32
  }
  func.func @transform_7(%arg0: i32) -> (i32, i32, i32) {
    %c0_i32 = arith.constant 0 : i32
    %c0_i32_0 = arith.constant 0 : i32
    %c0_i32_1 = arith.constant 0 : i32
    %c0_i32_2 = arith.constant 0 : i32
    return %c0_i32, %c0_i32_0, %c0_i32_1 : i32, i32, i32
  }
  func.func @transform_8(%arg0: i32) -> (i32, i32) {
    %c0_i32 = arith.constant 0 : i32
    %c0_i32_0 = arith.constant 0 : i32
    %c0_i32_1 = arith.constant 0 : i32
    return %c0_i32, %c0_i32_0 : i32, i32
  }
  func.func @transform_9(%arg0: i32) -> (i32, i32, i32) {
    %c0_i32 = arith.constant 0 : i32
    %c0_i32_0 = arith.constant 0 : i32
    %c0_i32_1 = arith.constant 0 : i32
    %c0_i32_2 = arith.constant 0 : i32
    return %c0_i32, %c0_i32_0, %c0_i32_1 : i32, i32, i32
  }
  func.func @transform_10(%arg0: i32) -> (i32, i32) {
    %c0_i32 = arith.constant 0 : i32
    %c0_i32_0 = arith.constant 0 : i32
    %c0_i32_1 = arith.constant 0 : i32
    return %c0_i32, %c0_i32_0 : i32, i32
  }
  func.func @transform_11(%arg0: i32) -> (i32, i32) {
    %c0_i32 = arith.constant 0 : i32
    %c0_i32_0 = arith.constant 0 : i32
    %c0_i32_1 = arith.constant 0 : i32
    return %c0_i32, %c0_i32_0 : i32, i32
  }
  func.func @transform_12(%arg0: i32) -> (i32, i32) {
    %c0_i32 = arith.constant 0 : i32
    %c0_i32_0 = arith.constant 0 : i32
    %c0_i32_1 = arith.constant 0 : i32
    return %c0_i32, %c0_i32_0 : i32, i32
  }
  func.func @transform_13(%arg0: i32) -> (i32, i32) {
    %c0_i32 = arith.constant 0 : i32
    %c0_i32_0 = arith.constant 0 : i32
    %c0_i32_1 = arith.constant 0 : i32
    return %c0_i32, %c0_i32_0 : i32, i32
  }
  func.func @transform_14(%arg0: i32) -> (i32, i32) {
    %c0_i32 = arith.constant 0 : i32
    %c0_i32_0 = arith.constant 0 : i32
    %c0_i32_1 = arith.constant 0 : i32
    return %c0_i32, %c0_i32_0 : i32, i32
  }
  func.func @transform_15(%arg0: i32) -> (i32, i32) {
    %c0_i32 = arith.constant 0 : i32
    %c0_i32_0 = arith.constant 0 : i32
    return %arg0, %c0_i32 : i32, i32
  }
}

</mosaic_0001>

<bundles_post_ra>
// kernel: carlini_forward.1
= control target key start
LH: loop header
LB: loop body
LE: loop exit
PB: predicated region body
PF: predicated region fallthrough
CT: control target
= control target key end

     0   :  { %vm142_vm0 = vcmask 392192   ;;  %s6708_s1 = inlined_call_operand.vmem [shape: bf16[3,48,128], index: 1, kind: input, shape index: {}]   ;;  %s6709_s0 = inlined_call_operand.vmem [shape: f32[160,48], index: 0, kind: input, shape index: {}]   ;;  %s6710_s3 = inlined_call_operand.vmem [shape: bf16[3,128,128], index: 3, kind: input, shape index: {}]   ;;  %s6711_s2 = inlined_call_operand.vmem [shape: f32[1,128], index: 2, kind: input, shape index: {}]   ;;  %s6712_s5 = inlined_call_operand.vmem [shape: bf16[3,64,128], index: 5, kind: input, shape index: {}]   ;;  %s6713_s4 = inlined_call_operand.vmem [shape: f32[1,128], index: 4, kind: input, shape index: {}]   ;;  %s6714_s7 = inlined_call_operand.vmem [shape: bf16[3,128,128], index: 7, kind: input, shape index: {}]   ;;  %s6715_s6 = inlined_call_operand.vmem [shape: f32[1,128], index: 6, kind: input, shape index: {}]   ;;  %s6716_s8 = inlined_call_operand.vmem [shape: f32[1,128], index: 8, kind: input, shape index: {}]   ;;  %s6717_s9 = inlined_call_operand.vmem [shape: bf16[4,64,256], index: 9, kind: input, shape index: {}]   ;;  %s6718_s11 = inlined_call_operand.vmem [shape: bf16[256,256], index: 11, kind: input, shape index: {}]   ;;  %s6719_s13 = inlined_call_operand.vmem [shape: bf16[256,128], index: 13, kind: input, shape index: {}]   ;;  %s6720_s10 = inlined_call_operand.vmem [shape: f32[1,256], index: 10, kind: input, shape index: {}]   ;;  %s6721_s12 = inlined_call_operand.vmem [shape: f32[1,256], index: 12, kind: input, shape index: {}]   ;;  %s6722_s14 = inlined_call_operand.vmem [shape: f32[1,128], index: 14, kind: input, shape index: {}]   ;;  %s6723_s15 = inlined_call_operand.vmem [shape: f32[8,128], index: 15, kind: output, shape index: {}]  }
   0x1   :  { %v4583_v0 = vld [vmem:[%s6708_s1 + $0x28] sm:$0xff]   ;;  %v4584_v1 = vld [vmem:[%s6708_s1 + $0x20] sm:$0xff]   ;;  %v4585_v5 = vld [vmem:[%s6708_s1 + $0x18] sm:$0xff]  }
   0x2   :  { %4195 = vmatprep.subr.bf16.mxu0 %v4583_v0  ;;  %4573 = vmatprep.subr.bf16.mxu1 %v4583_v0  ;;  %v87_v2 = vld [vmem:[%s6709_s0 + $0x1] sm:$0xff]  ;;  %v88_v3 = vld [vmem:[%s6709_s0 + $0x9] sm:$0xff]  ;;  %v89_v9 = vld [vmem:[%s6709_s0 + $0x11] sm:$0xff] }
   0x3   :  { %4196 = vmatpush3.bf16.msra.mxu0 %v4583_v0  ;;  %4576 = vmatpush3.bf16.msra.mxu1 %v4583_v0  ;;  %v99_v4 = vld [vmem:[%s6709_s0 + $0x61] sm:$0xff]  ;;  %v107_v6 = vpack.c.bf16 %v88_v3, %v87_v2  ;;  %v100_v7 = vld [vmem:[%s6709_s0 + $0x69] sm:$0xff]  ;;  %v90_v10 = vld [vmem:[%s6709_s0 + $0x19] sm:$0xff] }
   0x4   :  { %4197 = vmatprep.subr.bf16.mxu0 %v4584_v1  ;;  %4574 = vmatprep.subr.bf16.mxu1 %v4584_v1  ;;  %v113_v8 = vpack.c.bf16 %v100_v7, %v99_v4  ;;  %v101_v11 = vld [vmem:[%s6709_s0 + $0x71] sm:$0xff]  ;;  %v102_v12 = vld [vmem:[%s6709_s0 + $0x79] sm:$0xff]  ;;  %v91_v15 = vld [vmem:[%s6709_s0 + $0x21] sm:$0xff]  ;;  %v108_v19 = vpack.c.bf16 %v90_v10, %v89_v9 }
   0x5   :  { %4201 = vmatprep.mubr.msk.bf16.mxu0 %vm142_vm0, %v107_v6  ;;  %v4586_v13 = vld [vmem:[%s6708_s1 + $0x40] sm:$0xff]   ;;  %v4587_v14 = vld [vmem:[%s6708_s1 + $0x10] sm:$0xff]   ;;  %v114_v20 = vpack.c.bf16 %v102_v12, %v101_v11  ;;  %v4588_v24 = vld [vmem:[%s6708_s1 + $0x8] sm:$0xff]  }
   0x6   :  { %4213 = vmatprep.mubr.msk.bf16.mxu1 %vm142_vm0, %v113_v8  ;;  %v92_v16 = vld [vmem:[%s6709_s0 + $0x29] sm:$0xff]  ;;  %v103_v17 = vld [vmem:[%s6709_s0 + $0x81] sm:$0xff]  ;;  %v93_v23 = vld [vmem:[%s6709_s0 + $0x31] sm:$0xff] }
   0x7   :  { %4198 = vmatpush3.bf16.msra.mxu0 %v4584_v1  ;;  %4577 = vmatpush3.bf16.msra.mxu1 %v4584_v1  ;;  %v104_v18 = vld [vmem:[%s6709_s0 + $0x89] sm:$0xff]  ;;  %v109_v21 = vpack.c.bf16 %v92_v16, %v91_v15  ;;  %v4589_v25 = vld [vmem:[%s6708_s1 + $0x38] sm:$0xff]   ;;  %v4590_v29 = vld [vmem:[%s6708_s1] sm:$0xff]  }
   0x8   :  { %4199 = vmatprep.subr.bf16.mxu0 %v4585_v5  ;;  %4575 = vmatprep.subr.bf16.mxu1 %v4585_v5  ;;  %v115_v22 = vpack.c.bf16 %v104_v18, %v103_v17  ;;  %v94_v26 = vld [vmem:[%s6709_s0 + $0x39] sm:$0xff]  ;;  %v105_v27 = vld [vmem:[%s6709_s0 + $0x91] sm:$0xff]  ;;  %v95_v30 = vld [vmem:[%s6709_s0 + $0x41] sm:$0xff] }
   0x9   :  { %v106_v28 = vld [vmem:[%s6709_s0 + $0x99] sm:$0x3f]  ;;  %v96_v31 = vld [vmem:[%s6709_s0 + $0x49] sm:$0xff]  ;;  %v51_v33 = vld [vmem:[%s6709_s0] sm:$0xff]  ;;  %v110_v35 = vpack.c.bf16 %v94_v26, %v93_v23 }
   0xa   :  { %v4591_v32 = vld [vmem:[%s6708_s1 + $0x30] sm:$0xff]   ;;  %v52_v34 = vld [vmem:[%s6709_s0 + $0x8] sm:$0xff]  ;;  %v116_v36 = vpack.c.bf16 %v106_v28, %v105_v27  ;;  %v111_v37 = vpack.c.bf16 %v96_v31, %v95_v30  ;;  %v98_v40 = vld [vmem:[%s6709_s0 + $0x59] sm:$0xff] }
   0xb   :  { %4200 = vmatpush3.bf16.msra.mxu0 %v4585_v5  ;;  %4578 = vmatpush3.bf16.msra.mxu1 %v4585_v5  ;;  %v71_v38 = vpack.c.bf16 %v52_v34, %v51_v33  ;;  %v97_v39 = vld [vmem:[%s6709_s0 + $0x51] sm:$0xff]  ;;  %v55_v43 = vld [vmem:[%s6709_s0 + $0x20] sm:$0xff]  ;;  %v56_v44 = vld [vmem:[%s6709_s0 + $0x28] sm:$0xff] }
   0xc   :  { %4247 = vmatprep.subr.bf16.mxu0 %v4586_v13  ;;  %4221 = vmatprep.subr.bf16.mxu1 %v4587_v14  ;;  %v53_v41 = vld [vmem:[%s6709_s0 + $0x10] sm:$0xff]  ;;  %v54_v42 = vld [vmem:[%s6709_s0 + $0x18] sm:$0xff]  ;;  %v447_v45 = vld [vmem:[%s6709_s0 + $0x2] sm:$0xff]  ;;  %v112_v47 = vpack.c.bf16 %v98_v40, %v97_v39  ;;  %v73_v49 = vpack.c.bf16 %v56_v44, %v55_v43 }
   0xd   :  { %v448_v46 = vld [vmem:[%s6709_s0 + $0xa] sm:$0xff]  ;;  %v72_v48 = vpack.c.bf16 %v54_v42, %v53_v41  ;;  %v58_v52 = vld [vmem:[%s6709_s0 + $0x38] sm:$0xff]  ;;  %v59_v55 = vld [vmem:[%s6709_s0 + $0x40] sm:$0xff] }
   0xe   :  { %4202 = vmatmul.mubr.msk.bf16.vlgmr.msra.gmra.mxu0 %vm142_vm0, %v108_v19  ;;  %4214 = vmatmul.mubr.msk.bf16.vlgmr.msra.gmra.mxu1 %vm142_vm0, %v114_v20  ;;  %v467_v50 = vpack.c.bf16 %v448_v46, %v447_v45  ;;  %v57_v51 = vld [vmem:[%s6709_s0 + $0x30] sm:$0xff]  ;;  %v450_v54 = vld [vmem:[%s6709_s0 + $0x1a] sm:$0xff]  ;;  %v60_v56 = vld [vmem:[%s6709_s0 + $0x48] sm:$0xff] }
   0xf   :  { %4248 = vmatpush3.bf16.msra.mxu0 %v4586_v13  ;;  %4222 = vmatpush3.bf16.msra.mxu1 %v4587_v14  ;;  %v449_v53 = vld [vmem:[%s6709_s0 + $0x12] sm:$0xff]  ;;  %v451_v57 = vld [vmem:[%s6709_s0 + $0x22] sm:$0xff]  ;;  %v452_v58 = vld [vmem:[%s6709_s0 + $0x2a] sm:$0xff]  ;;  %v74_v59 = vpack.c.bf16 %v58_v52, %v57_v51  ;;  %v75_v61 = vpack.c.bf16 %v60_v56, %v59_v55  ;;  %v6724_v52 = vmov 0.0  }
  0x10   :  { %4205 = vmatprep.mubr.msk.bf16.mxu0 %vm142_vm0, %v109_v21  ;;  %4217 = vmatprep.mubr.msk.bf16.mxu1 %vm142_vm0, %v115_v22  ;;  %v468_v60 = vpack.c.bf16 %v450_v54, %v449_v53  ;;  %v469_v62 = vpack.c.bf16 %v452_v58, %v451_v57  ;;  %v61_v63 = vld [vmem:[%s6709_s0 + $0x50] sm:$0xff]  ;;  %v62_v0 = vld [vmem:[%s6709_s0 + $0x58] sm:$0xff]  ;;  %v63_v3 = vld [vmem:[%s6709_s0 + $0x60] sm:$0xff]  ;;  %893 = vst [vmem:[#allocation2] sm:$0x1] %v6724_v52  ;;  %v712_v53 = vlaneseq }
  0x11   :  { %4223 = vmatprep.subr.bf16.mxu1 %v4588_v24  ;;  %4249 = vmatprep.subr.bf16.mxu0 %v4589_v25  ;;  %v453_v1 = vld [vmem:[%s6709_s0 + $0x32] sm:$0xff]  ;;  %v454_v2 = vld [vmem:[%s6709_s0 + $0x3a] sm:$0xff]  ;;  %v64_v4 = vld [vmem:[%s6709_s0 + $0x68] sm:$0xff]  ;;  %v76_v7 = vpack.c.bf16 %v62_v0, %v61_v63  ;;  %894 = vst [vmem:[#allocation2 + $0x9f] sm:$0x1] %v6724_v52 }
  0x12   :  { %v455_v5 = vld [vmem:[%s6709_s0 + $0x42] sm:$0xff]  ;;  %v456_v6 = vld [vmem:[%s6709_s0 + $0x4a] sm:$0xff]  ;;  %v470_v8 = vpack.c.bf16 %v454_v2, %v453_v1  ;;  %v77_v9 = vpack.c.bf16 %v64_v4, %v63_v3  ;;  %v66_v12 = vld [vmem:[%s6709_s0 + $0x78] sm:$0xff]  ;;  %2293 = vst [vmem:[#allocation5] sm:$0x1] %v6724_v52  ;;  %v5190_v54 = vshrl.u32 %v712_v53, 7 }
  0x13   :  { %4224 = vmatpush3.bf16.msra.mxu1 %v4588_v24  ;;  %4250 = vmatpush3.bf16.msra.mxu0 %v4589_v25  ;;  %v471_v10 = vpack.c.bf16 %v456_v6, %v455_v5  ;;  %v65_v11 = vld [vmem:[%s6709_s0 + $0x70] sm:$0xff]  ;;  %v458_v14 = vld [vmem:[%s6709_s0 + $0x5a] sm:$0xff]  ;;  %v68_v16 = vld [vmem:[%s6709_s0 + $0x88] sm:$0xff]  ;;  %2294 = vst [vmem:[#allocation5 + $0x4f] sm:$0x1] %v6724_v52 }
  0x14   :  { %4225 = vmatprep.subr.bf16.mxu1 %v4590_v29  ;;  %4251 = vmatprep.subr.bf16.mxu0 %v4591_v32  ;;  %v457_v13 = vld [vmem:[%s6709_s0 + $0x52] sm:$0xff]  ;;  %v67_v15 = vld [vmem:[%s6709_s0 + $0x80] sm:$0xff]  ;;  %v460_v18 = vld [vmem:[%s6709_s0 + $0x6a] sm:$0xff]  ;;  %v78_v19 = vpack.c.bf16 %v66_v12, %v65_v11  ;;  %v715_v55 = vadd.s32 16, %v5190_v54  ;;  %v716_v56 = vadd.s32 24, %v5190_v54  ;;  %v714_v63 = vadd.s32 8, %v5190_v54 }
  0x15   :  { %v459_v17 = vld [vmem:[%s6709_s0 + $0x62] sm:$0xff]  ;;  %v472_v20 = vpack.c.bf16 %v458_v14, %v457_v13  ;;  %v79_v21 = vpack.c.bf16 %v68_v16, %v67_v15  ;;  %v69_v23 = vld [vmem:[%s6709_s0 + $0x90] sm:$0xff]  ;;  %v70_v24 = vld [vmem:[%s6709_s0 + $0x98] sm:$0x3f]  ;;  %v719_v1 = vadd.s32 48, %v5190_v54  ;;  %v717_v2 = vadd.s32 32, %v5190_v54 }
  0x16   :  { %4206 = vmatmul.mubr.msk.bf16.gmra.mxu0 %vm142_vm0, %v110_v35  ;;  %4218 = vmatmul.mubr.msk.bf16.gmra.mxu1 %vm142_vm0, %v116_v36  ;;  %v473_v22 = vpack.c.bf16 %v460_v18, %v459_v17  ;;  %v461_v25 = vld [vmem:[%s6709_s0 + $0x72] sm:$0xff]  ;;  %v462_v26 = vld [vmem:[%s6709_s0 + $0x7a] sm:$0xff]  ;;  %v463_v27 = vld [vmem:[%s6709_s0 + $0x82] sm:$0xff]  ;;  %v5208_v0 = vcvt.s32.f32 %v716_v56  ;;  %v720_v5 = vadd.s32 56, %v5190_v54  ;;  %v5224_v11 = vcvt.s32.f32 %v714_v63 }
  0x17   :  { %4226 = vmatpush3.bf16.msra.mxu1 %v4590_v29  ;;  %4209 = vmatprep.mubr.msk.bf16.mxu0 %vm142_vm0, %v111_v37  ;;  %v464_v28 = vld [vmem:[%s6709_s0 + $0x8a] sm:$0xff]  ;;  %v80_v29 = vpack.c.bf16 %v70_v24, %v69_v23  ;;  %v474_v30 = vpack.c.bf16 %v462_v26, %v461_v25  ;;  %v466_v33 = vld [vmem:[%s6709_s0 + $0x9a] sm:$0x3f]  ;;  %v4597_v40 = vld [vmem:[%s6710_s3 + $0x60] sm:$0xff]   ;;  %v5227_v12 = vadd.s32 80, %v5190_v54  ;;  %v5230_v14 = vcvt.s32.f32 %v719_v1 }
  0x18   :  { %4227 = vmatprep.mubr.msk.bf16.mxu1 %vm142_vm0, %v71_v38  ;;  %4252 = vmatpush3.bf16.msra.mxu0 %v4591_v32  ;;  %v475_v31 = vpack.c.bf16 %v464_v28, %v463_v27  ;;  %v465_v32 = vld [vmem:[%s6709_s0 + $0x92] sm:$0xff]  ;;  %v4595_v38 = vld [vmem:[%s6710_s3 + $0x68] sm:$0xff]   ;;  %v4600_v43 = vld [vmem:[%s6710_s3 + $0x20] sm:$0xff]   ;;  %6752 = vst [vmem:[#allocation9_spill] sm:$0xff] %v5208_v0  ;;  %v756_v13 = vmul.f32 0.05, %v5208_v0  ;;  %v5232_v15 = vcvt.s32.f32 %v717_v2 }
  0x19   :  { %v476_v34 = vpack.c.bf16 %v466_v33, %v465_v32  ;;  %v4592_v35 = vld [vmem:[%s6710_s3 + $0x78] sm:$0xff]   ;;  %v4593_v36 = vld [vmem:[%s6710_s3 + $0x70] sm:$0xff]   ;;  %v4598_v41 = vld [vmem:[%s6710_s3 + $0x28] sm:$0xff]   ;;  %6753 = vst [vmem:[#allocation10_spill] sm:$0xff] %v5224_v11  ;;  %v721_v16 = vadd.s32 64, %v5190_v54  ;;  %v6728_v28 = vcvt.s32.f32 %v5227_v12 }
  0x1a   :  { %4273 = vmatprep.subr.bf16.mxu1 %v4592_v35  ;;  %v4594_v37 = vld [vmem:[%s6710_s3 + $0x38] sm:$0xff]   ;;  %v4596_v39 = vld [vmem:[%s6710_s3 + $0x30] sm:$0xff]   ;;  %v4604_v46 = vld [vmem:[%s6710_s3 + $0x48] sm:$0xff]   ;;  %6754 = vst [vmem:[#allocation11_spill] sm:$0xff] %v5230_v14  ;;  %v754_v27 = vmul.f32 0.05, %v5224_v11 }
  0x1b   :  { %4309 = vmatprep.subr.bf16.mxu0 %v4594_v37  ;;  %v4599_v42 = vld [vmem:[%s6710_s3 + $0x58] sm:$0xff]   ;;  %v4602_v44 = vld [vmem:[%s6710_s3 + $0x50] sm:$0xff]   ;;  %6755 = vst [vmem:[#allocation12_spill] sm:$0xff] %v5232_v15  ;;  %v5255_v32 = vcvt.s32.f32 %v721_v16 }
  0x1c   :  { %v4601_v45 = vld [vmem:[%s6710_s3 + $0x18] sm:$0xff]  }
  0x1d   :  { %v5182_v51 = vld [vmem:[%s6710_s3 + $0xb8] sm:$0xff]   ;;  %6758 = vst [vmem:[#allocation15_spill] sm:$0xff] %v5255_v32 }
  0x1e   :  { %4210 = vmatmul.mubr.msk.bf16.gmra.mxu0 %vm142_vm0, %v112_v47  ;;  %4228 = vmatmul.mubr.msk.bf16.vlgmr.msra.gmra.mxu1 %vm142_vm0, %v72_v48  ;;  %v4603_v47 = vld [vmem:[%s6710_s3 + $0x10] sm:$0xff]   ;;  %v4606_v48 = vld [vmem:[%s6710_s3 + $0x40] sm:$0xff]  }
  0x1f   :  { %4231 = vmatprep.mubr.msk.bf16.mxu1 %vm142_vm0, %v73_v49  ;;  %4253 = vmatprep.mubr.msk.bf16.mxu0 %vm142_vm0, %v467_v50  ;;  %v4605_v49 = vld [vmem:[%s6710_s3 + $0x8] sm:$0xff]   ;;  %v4607_v50 = vld [vmem:[%s6710_s3] sm:$0xff]  }
  0x20   :  { %4274 = vmatpush3.bf16.msra.mxu1 %v4592_v35 }
  0x21   :  { %4275 = vmatprep.subr.bf16.mxu1 %v4593_v36 }
  0x24   :  { %4276 = vmatpush3.bf16.msra.mxu1 %v4593_v36 }
  0x25   :  { %4277 = vmatprep.subr.bf16.mxu1 %v4595_v38 }
  0x26   :  { %4232 = vmatmul.mubr.msk.bf16.gmra.mxu1 %vm142_vm0, %v74_v59  ;;  %4254 = vmatmul.mubr.msk.bf16.vlgmr.msra.gmra.mxu0 %vm142_vm0, %v468_v60  ;;  %v5198_v59 = vcvt.s32.f32 %v715_v55 }
  0x27   :  { %4235 = vmatprep.mubr.msk.bf16.mxu1 %vm142_vm0, %v75_v61  ;;  %4257 = vmatprep.mubr.msk.bf16.mxu0 %vm142_vm0, %v469_v62  ;;  %v5205_v62 = vcvt.s32.f32 %v5190_v54 }
  0x28   :  { %4310 = vmatpush3.bf16.msra.mxu0 %v4594_v37  ;;  %4278 = vmatpush3.bf16.msra.mxu1 %v4595_v38  ;;  %6750 = vst [vmem:[#allocation7_spill] sm:$0xff] %v5198_v59  ;;  %v755_v6 = vmul.f32 0.05, %v5198_v59 }
  0x29   :  { %4311 = vmatprep.subr.bf16.mxu0 %v4596_v39  ;;  %4279 = vmatprep.subr.bf16.mxu1 %v4597_v40  ;;  %6751 = vst [vmem:[#allocation8_spill] sm:$0xff] %v5205_v62 }
  0x2c   :  { %4312 = vmatpush3.bf16.msra.mxu0 %v4596_v39  ;;  %4280 = vmatpush3.bf16.msra.mxu1 %v4597_v40  ;;  %v5267_v40 = vadd.s32 112, %v5190_v54 }
  0x2d   :  { %4313 = vmatprep.subr.bf16.mxu0 %v4598_v41  ;;  %4281 = vmatprep.subr.bf16.mxu1 %v4599_v42 }
  0x2e   :  { %4236 = vmatmul.mubr.msk.bf16.gmra.mxu1 %vm142_vm0, %v76_v7  ;;  %4258 = vmatmul.mubr.msk.bf16.gmra.mxu0 %vm142_vm0, %v470_v8  ;;  %v718_v7 = vadd.s32 40, %v5190_v54 }
  0x2f   :  { %4239 = vmatprep.mubr.msk.bf16.mxu1 %vm142_vm0, %v77_v9  ;;  %4261 = vmatprep.mubr.msk.bf16.mxu0 %vm142_vm0, %v471_v10  ;;  %v753_v10 = vmul.f32 0.05, %v5205_v62 }
  0x30   :  { %4314 = vmatpush3.bf16.msra.mxu0 %v4598_v41  ;;  %4282 = vmatpush3.bf16.msra.mxu1 %v4599_v42  ;;  %v5245_v23 = vcvt.s32.f32 %v718_v7 }
  0x31   :  { %4315 = vmatprep.subr.bf16.mxu0 %v4600_v43  ;;  %4283 = vmatprep.subr.bf16.mxu1 %v4602_v44  ;;  %v773_v26 = vfloor.f32 %v753_v10 }
  0x32   :  { %6757 = vst [vmem:[#allocation14_spill] sm:$0xff] %v5245_v23  ;;  %v758_v39 = vmul.f32 0.05, %v5245_v23 }
  0x34   :  { %4316 = vmatpush3.bf16.msra.mxu0 %v4600_v43  ;;  %4284 = vmatpush3.bf16.msra.mxu1 %v4602_v44  ;;  %v793_v43 = vmul.f32 20.0, %v773_v26  ;;  %v774_v44 = vfloor.f32 %v754_v27  ;;  %v778_v2 = vfloor.f32 %v758_v39 }
  0x35   :  { %4317 = vmatprep.subr.bf16.mxu0 %v4601_v45  ;;  %4285 = vmatprep.subr.bf16.mxu1 %v4604_v46 }
  0x36   :  { %4240 = vmatmul.mubr.msk.bf16.gmra.mxu1 %vm142_vm0, %v78_v19  ;;  %4262 = vmatmul.mubr.msk.bf16.gmra.mxu0 %vm142_vm0, %v472_v20  ;;  %v5239_v19 = vcvt.s32.f32 %v720_v5  ;;  %v5242_v20 = vadd.s32 88, %v5190_v54  ;;  %v6727_v5 = vcvt.s32.f32 %v5267_v40  ;;  %v813_v10 = vsub.f32 %v5205_v62, %v793_v43 }
  0x37   :  { %4243 = vmatprep.mubr.msk.bf16.mxu1 %vm142_vm0, %v79_v21  ;;  %4265 = vmatprep.mubr.msk.bf16.mxu0 %vm142_vm0, %v473_v22  ;;  %v722_v21 = vadd.s32 72, %v5190_v54  ;;  %v775_v22 = vfloor.f32 %v755_v6 }
  0x38   :  { %4318 = vmatpush3.bf16.msra.mxu0 %v4601_v45  ;;  %4286 = vmatpush3.bf16.msra.mxu1 %v4604_v46  ;;  %6756 = vst [vmem:[#allocation13_spill] sm:$0xff] %v5239_v19  ;;  %v760_v35 = vmul.f32 0.05, %v5239_v19  ;;  %v6726_v36 = vcvt.s32.f32 %v5242_v20  ;;  %v763_v45 = vmul.f32 0.05, %v6728_v28  ;;  %vm5307_vm2 = vcmp.lt.f32.partialorder %v813_v10, 16.0 }
  0x39   :  { %4319 = vmatprep.subr.bf16.mxu0 %v4603_v47  ;;  %4287 = vmatprep.subr.bf16.mxu1 %v4606_v48  ;;  %v5263_v37 = vcvt.s32.f32 %v722_v21  ;;  %v795_v38 = vmul.f32 20.0, %v775_v22  ;;  %v5287_v21 = vadd.s32 96, %v5190_v54  ;;  %v5321_v10 = vld [vmem:[%s6711_s2] ss:$0 sm:$0xff] }
  0x3a   :  { %v780_v55 = vfloor.f32 %v760_v35  ;;  %v764_v56 = vmul.f32 0.05, %v6726_v36  ;;  %v783_v16 = vfloor.f32 %v763_v45  ;;  %v767_v45 = vmul.f32 0.05, %v6727_v5 }
  0x3b   :  { %v762_v63 = vmul.f32 0.05, %v5263_v37  ;;  %v815_v1 = vsub.f32 %v5198_v59, %v795_v38  ;;  %v6765_v59 = vcvt.s32.f32 %v5227_v12 }
  0x3c   :  { %4320 = vmatpush3.bf16.msra.mxu0 %v4603_v47  ;;  %4288 = vmatpush3.bf16.msra.mxu1 %v4606_v48  ;;  %v5292_v35 = vmul.f32 20.0, %v780_v55  ;;  %v784_v38 = vfloor.f32 %v764_v56  ;;  %v803_v55 = vmul.f32 20.0, %v783_v16 }
  0x3d   :  { %4321 = vmatprep.subr.bf16.mxu0 %v4605_v49  ;;  %4345 = vmatprep.subr.bf16.mxu1 %v5182_v51  ;;  %v782_v39 = vfloor.f32 %v762_v63  ;;  %vm5297_vm1 = vcmp.lt.f32.partialorder %v815_v1, 16.0 }
  0x3e   :  { %4244 = vmatmul.mubr.msk.bf16.gmra.mxu1 %vm142_vm0, %v80_v29  ;;  %4266 = vmatmul.mubr.msk.bf16.gmra.mxu0 %vm142_vm0, %v474_v30  ;;  %v776_v29 = vfloor.f32 %v756_v13  ;;  %v759_v30 = vmul.f32 0.05, %v5230_v14  ;;  %v794_v13 = vmul.f32 20.0, %v774_v44  ;;  %v5301_v44 = vmul.f32 20.0, %v778_v2 }
  0x3f   :  { %4269 = vmatprep.mubr.msk.bf16.mxu0 %vm142_vm0, %v475_v31  ;;  %v757_v31 = vmul.f32 0.05, %v5232_v15  ;;  %v5329_v16 = vmul.f32 20.0, %v782_v39  ;;  %v5342_v39 = vadd.s32 104, %v5190_v54 }
  0x40   :  { %4322 = vmatpush3.bf16.msra.mxu0 %v4605_v49  ;;  %v796_v46 = vmul.f32 20.0, %v776_v29  ;;  %v779_v47 = vfloor.f32 %v759_v30  ;;  %v761_v49 = vmul.f32 0.05, %v5255_v32  ;;  %v818_v56 = vsub.f32 %v5245_v23, %v5301_v44 }
  0x41   :  { %4323 = vmatprep.subr.bf16.mxu0 %v4607_v50  ;;  %v777_v48 = vfloor.f32 %v757_v31  ;;  %v6779_v23 = vcvt.s32.f32 %v5342_v39 }
  0x42   :  { %v816_v22 = vsub.f32 %v5208_v0, %v796_v46  ;;  %v799_v26 = vmul.f32 20.0, %v779_v47  ;;  %v781_v29 = vfloor.f32 %v761_v49  ;;  %v814_v49 = vsub.f32 %v5224_v11, %v794_v13 }
  0x43   :  { %v797_v27 = vmul.f32 20.0, %v777_v48  ;;  %v5337_v0 = vsub.f32 %v6765_v59, %v803_v55  ;;  %vm5427_vm8 = vcmp.lt.f32.partialorder %v818_v56, 16.0 }
  0x44   :  { %4324 = vmatpush3.bf16.msra.mxu0 %v4607_v50  ;;  %v819_v1 = vsub.f32 %v5230_v14, %v799_v26  ;;  %v5316_v36 = vmul.f32 20.0, %v781_v29  ;;  %vm5323_vm3 = vcmp.lt.f32.partialorder %v816_v22, 16.0  ;;  %v787_v14 = vfloor.f32 %v767_v45 }
  0x45   :  { %4381 = vmatprep.subr.bf16.mxu0 %v6724_v52  ;;  %v5295_v52 = vadd.s32 120, %v5190_v54  ;;  %v817_v2 = vsub.f32 %v5232_v15, %v797_v27  ;;  %v5345_v26 = vadd.s32 144, %v5190_v54  ;;  %vm5351_vm4 = vcmp.lt.f32.partialorder %v814_v49, 16.0  ;;  %vm4767_vm14 = vmpackc.low %vm5323_vm3, %vm5297_vm1 }
  0x46   :  { %4270 = vmatmul.mubr.msk.bf16.gmra.mxu0 %vm142_vm0, %v476_v34  ;;  %v821_v59 = vsub.f32 %v5255_v32, %v5316_v36  ;;  %vm5357_vm5 = vcmp.lt.f32.partialorder %v819_v1, 16.0  ;;  %vm843_vm9 = vcmp.lt.f32.partialorder %v5337_v0, 16.0  ;;  %vm4764_vm12 = vmpackc.low %vm5351_vm4, %vm5307_vm2 }
  0x47   :  { %v6772_v49 = vcvt.s32.f32 %v5295_v52  ;;  %vm5377_vm6 = vcmp.lt.f32.partialorder %v817_v2, 16.0 }
  0x48   :  { %vm5444_vm10 = vcmp.lt.f32.partialorder %v821_v59, 16.0 }
  0xce   :  { %v5194_v57 = vpop.f32.mrf.mxu0  ;;  %v5196_v58 = vpop.f32.mrf.mxu1 }
  0xd0   :  { %v5200_v60 = vpop.f32.mrf.mxu0  ;;  %v5202_v61 = vpop.f32.mrf.mxu1 }
  0xd2   :  { %v5212_v3 = vpop.f32.mrf.mxu0  ;;  %v5214_v4 = vpop.f32.mrf.mxu1 }
  0xd4   :  { %v5219_v8 = vpop.f32.mrf.mxu0  ;;  %v5221_v9 = vpop.f32.mrf.mxu1 }
  0xd6   :  { %v5235_v17 = vpop.f32.mrf.mxu0  ;;  %v5237_v18 = vpop.f32.mrf.mxu1 }
  0xd8   :  { %v5247_v24 = vpop.f32.mrf.mxu0  ;;  %v5249_v25 = vpop.f32.mrf.mxu1 }
  0xda   :  { %v5257_v33 = vpop.f32.mrf.mxu0  ;;  %v5259_v34 = vpop.f32.mrf.mxu1 }
  0xdc   :  { %v5269_v41 = vpop.f32.mrf.mxu0  ;;  %v5271_v42 = vpop.f32.mrf.mxu1 }
  0xde   :  { %v5276_v50 = vpop.f32.mrf.mxu0  ;;  %v4229_v53 = vpop.f32.mrf.mxu1 }
  0xdf   :  { %v377_v63 = vadd.f32 %v4229_v53, %v5194_v57  ;;  %v820_v57 = vsub.f32 %v5239_v19, %v5292_v35  ;;  %v804_v53 = vmul.f32 20.0, %v784_v38  ;;  %v6766_v35 = vcvt.s32.f32 %v5287_v21 }
  0xe0   :  { %v5283_v6 = vpop.f32.mrf.mxu0  ;;  %v368_v7 = vpop.f32.mrf.mxu1 }
  0xe1   :  { %v369_v27 = vadd.f32 %v368_v7, %v5200_v60  ;;  %v765_v38 = vmul.f32 0.05, %v6766_v35  ;;  %v807_v35 = vmul.f32 20.0, %v787_v14  ;;  %vm5392_vm7 = vcmp.lt.f32.partialorder %v820_v57, 16.0 }
  0xe2   :  { %v5290_v30 = vpop.f32.mrf.mxu0  ;;  %v4230_v31 = vpop.f32.mrf.mxu1 }
  0xe3   :  { %v380_v60 = vadd.f32 %v4230_v31, %v5212_v3  ;;  %v785_v31 = vfloor.f32 %v765_v38 }
  0xe4   :  { %v5305_v46 = vpop.f32.mrf.mxu0  ;;  %v371_v47 = vpop.f32.mrf.mxu1 }
  0xe6   :  { %v4233_v5 = vpop.f32.mrf.mxu1  ;;  %v4255_v28 = vpop.f32.mrf.mxu0 }
  0xe7   :  { %v647_v29 = vadd.f32 %v4255_v28, %v377_v63  ;;  %v6771_v63 = vcvt.s32.f32 %v5242_v20  ;;  %v372_v20 = vadd.f32 %v371_v47, %v5219_v8  ;;  %v393_v36 = vadd.f32 %v4233_v5, %v5235_v17 }
  0xe8   :  { %v384_v15 = vpop.f32.mrf.mxu1  ;;  %v566_v22 = vpop.f32.mrf.mxu0  ;;  %v5398_v5 = vadd.s32 152, %v5190_v54  ;;  %v6778_v17 = vcvt.s32.f32 %v5267_v40 }
  0xe9   :  { %v5349_v28 = vadd.f32 %v5321_v10, %v647_v29  ;;  %v645_v7 = vadd.f32 %v566_v22, %v369_v27  ;;  %v5363_v3 = vsub.f32 %v6771_v63, %v804_v53  ;;  %v768_v27 = vmul.f32 0.05, %v6772_v49 }
  0xea   :  { %v4234_v12 = vpop.f32.mrf.mxu1  ;;  %v4256_v45 = vpop.f32.mrf.mxu0  ;;  %v5370_v29 = vadd.s32 128, %v5190_v54  ;;  %v5409_v49 = vsub.f32 %v6778_v17, %v807_v35 }
  0xeb   :  { %v5374_v1 = vadd.f32 %v5321_v10, %v645_v7  ;;  %v648_v22 = vadd.f32 %v4256_v45, %v380_v60  ;;  %v6775_v7 = vmax.f32 %v5349_v28, 0.0  ;;  %v788_v19 = vfloor.f32 %v768_v27 }
  0xec   :  { %v387_v53 = vpop.f32.mrf.mxu1  ;;  %v569_v63 = vpop.f32.mrf.mxu0  ;;  %vm844_vm11 = vcmp.lt.f32.partialorder %v5363_v3, 16.0  ;;  %vm847_vm15 = vcmp.lt.f32.partialorder %v5409_v49, 16.0 }
  0xed   :  { %v855_v14 = vsel %vm5297_vm1, %v6775_v7, 0.0  ;;  %v6745_v8 = vmax.f32 %v5374_v1, 0.0  ;;  %v5390_v47 = vadd.f32 %v5321_v10, %v648_v22  ;;  %v646_v2 = vadd.f32 %v569_v63, %v372_v20 }
  0xee   :  { %875 = vst [vmem:[#allocation2 + $0x11] sm:$0xff] %v855_v14  ;;  %v4237_v60 = vpop.f32.mrf.mxu1  ;;  %v4259_v38 = vpop.f32.mrf.mxu0  ;;  %v385_v7 = vadd.f32 %v384_v15, %v5247_v24  ;;  %v5413_v15 = vmul.f32 0.05, %v6779_v23  ;;  %v6780_v24 = vcvt.s32.f32 %v5345_v26 }
  0xef   :  { %v853_v22 = vsel %vm5307_vm2, %v6745_v8, 0.0  ;;  %v6746_v20 = vmax.f32 %v5390_v47, 0.0  ;;  %v651_v63 = vadd.f32 %v4259_v38, %v393_v36  ;;  %v673_v57 = vadd.f32 %v5321_v10, %v646_v2  ;;  %vm4770_vm2 = vmpackc.low %vm5427_vm8, %vm5377_vm6 }
  0xf0   :  { %873 = vst [vmem:[#allocation2 + $0x1] sm:$0xff] %v853_v22  ;;  %v400_v14 = vpop.f32.mrf.mxu1  ;;  %v582_v27 = vpop.f32.mrf.mxu0  ;;  %v5417_v62 = vmul.f32 0.05, %v6780_v24  ;;  %v396_v8 = vadd.f32 %v4234_v12, %v5257_v33  ;;  %v805_v33 = vmul.f32 20.0, %v785_v31  ;;  %v808_v12 = vmul.f32 20.0, %v788_v19 }
  0xf1   :  { %v856_v36 = vsel %vm5323_vm3, %v6746_v20, 0.0  ;;  %v5425_v2 = vadd.f32 %v5321_v10, %v651_v63  ;;  %v649_v40 = vadd.f32 %v582_v27, %v385_v7  ;;  %v693_v23 = vmax.f32 %v673_v57, 0.0  ;;  %vm4773_vm3 = vmpackc.low %vm5392_vm7, %vm5357_vm5 }
  0xf2   :  { %876 = vst [vmem:[#allocation2 + $0x19] sm:$0xff] %v856_v36  ;;  %v4238_v38 = vpop.f32.mrf.mxu1  ;;  %v4260_v17 = vpop.f32.mrf.mxu0  ;;  %v6783_v22 = vcvt.s32.f32 %v5370_v29  ;;  %v388_v57 = vadd.f32 %v387_v53, %v5269_v41  ;;  %v791_v63 = vfloor.f32 %v5417_v62  ;;  %v401_v59 = vadd.f32 %v400_v14, %v5283_v6  ;;  %v4609_v6 = vld [vmem:[%s6710_s3 + $0xb0] sm:$0xff]  }
  0xf3   :  { %v5438_v7 = vadd.f32 %v5321_v10, %v649_v40  ;;  %v652_v56 = vadd.f32 %v4260_v17, %v396_v8  ;;  %v854_v36 = vsel %vm5351_vm4, %v693_v23, 0.0  ;;  %v409_v8 = vadd.f32 %v4237_v60, %v5276_v50 }
  0xf4   :  { %v5434_v24 = vmul.f32 0.05, %v6783_v22  ;;  %v403_v20 = vpop.f32.mrf.mxu1  ;;  %v585_v31 = vpop.f32.mrf.mxu0  ;;  %v786_v22 = vfloor.f32 %v5413_v15  ;;  %874 = vst [vmem:[#allocation2 + $0x9] sm:$0xff] %v854_v36  ;;  %v6786_v40 = vmax.f32 %v5425_v2, 0.0  ;;  %v5462_v62 = vadd.s32 136, %v5190_v54 }
  0xf5   :  { %v6749_v53 = vmax.f32 %v5438_v7, 0.0  ;;  %v5457_v17 = vadd.f32 %v5321_v10, %v652_v56  ;;  %v650_v27 = vadd.f32 %v585_v31, %v388_v57  ;;  %v6787_v31 = vmax.f32 %v5374_v1, 0.0 }
  0xf6   :  { %v859_v41 = vsel %vm5357_vm5, %v6786_v40, 0.0  ;;  %v4241_v15 = vpop.f32.mrf.mxu1  ;;  %v4263_v11 = vpop.f32.mrf.mxu0  ;;  %v412_v48 = vadd.f32 %v4238_v38, %v5290_v30  ;;  %v6794_v30 = vmax.f32 %v5349_v28, 0.0  ;;  %v6795_v38 = vmax.f32 %v5390_v47, 0.0 }
  0xf7   :  { %879 = vst [vmem:[#allocation2 + $0x31] sm:$0xff] %v859_v41  ;;  %v857_v50 = vsel %vm5377_vm6, %v6749_v53, 0.0  ;;  %v699_v60 = vmax.f32 %v5457_v17, 0.0  ;;  %v655_v56 = vadd.f32 %v4263_v11, %v409_v8  ;;  %v5473_v14 = vadd.f32 %v5321_v10, %v650_v27  ;;  %vm4779_vm6 = vmpackc.low %vm844_vm11, %vm843_vm9 }
  0xf8   :  { %877 = vst [vmem:[#allocation2 + $0x21] sm:$0xff] %v857_v50  ;;  %v416_v57 = vpop.f32.mrf.mxu1  ;;  %v598_v36 = vpop.f32.mrf.mxu0  ;;  %v4765_v40 = vpack.c.bf16 %v693_v23, %v6787_v31  ;;  %v6788_v11 = vcvt.s32.f32 %v5287_v21  ;;  %v6789_v41 = vcvt.s32.f32 %v5295_v52  ;;  %v6790_v27 = vcvt.s32.f32 %v5398_v5 }
  0xf9   :  { %v860_v44 = vsel %vm5392_vm7, %v699_v60, 0.0  ;;  %v5499_v1 = vadd.f32 %v5321_v10, %v655_v56  ;;  %v653_v21 = vadd.f32 %v598_v36, %v401_v59  ;;  %v6791_v52 = vsub.f32 %v5263_v37, %v5329_v16 }
  0xfa   :  { %4766 = vmatprep.mubr.msk.bf16.mxu1 %vm4764_vm12, %v4765_v40  ;;  %v5483_v8 = vsub.f32 %v6788_v11, %v805_v33  ;;  %v5487_v50 = vsub.f32 %v6789_v41, %v808_v12  ;;  %v5491_v53 = vmul.f32 0.05, %v6790_v27  ;;  %v4768_v33 = vpack.c.bf16 %v6795_v38, %v6794_v30  ;;  %880 = vst [vmem:[#allocation2 + $0x39] sm:$0xff] %v860_v44  ;;  %v4242_v59 = vpop.f32.mrf.mxu1  ;;  %v4264_v16 = vpop.f32.mrf.mxu0 }
  0xfb   :  { %vm5504_vm13 = vcmp.lt.f32.partialorder %v6791_v52, 16.0  ;;  %v697_v12 = vmax.f32 %v5473_v14, 0.0  ;;  %v806_v56 = vmul.f32 20.0, %v786_v22  ;;  %v811_v43 = vmul.f32 20.0, %v791_v63  ;;  %v4610_v14 = vld [vmem:[%s6710_s3 + $0xa8] sm:$0xff]   ;;  %v897_v41 = vld [vmem:[#allocation2 + $0x10] sm:$0xff] }
  0xfc   :  { %4769 = vmatmul.mubr.msk.bf16.vlgmr.msra.gmra.mxu1 %vm4767_vm14, %v4768_v33  ;;  %v789_v13 = vfloor.f32 %v5434_v24  ;;  %v702_v36 = vmax.f32 %v5499_v1, 0.0  ;;  %v5522_v28 = vadd.f32 %v5321_v10, %v653_v21  ;;  %v656_v47 = vadd.f32 %v4264_v16, %v412_v48  ;;  %v419_v63 = vpop.f32.mrf.mxu1  ;;  %v601_v22 = vpop.f32.mrf.mxu0  ;;  %v896_v11 = vld [vmem:[#allocation2 + $0x8] sm:$0xff]  ;;  %v4611_v16 = vld [vmem:[%s6710_s3 + $0xa0] sm:$0xff]   ;;  %vm4776_vm5 = vmpackc.low %vm5504_vm13, %vm5444_vm10 }
  0xfd   :  { %4346 = vmatpush3.bf16.msra.mxu1 %v5182_v51  ;;  %v750_v31 = vcvt.s32.f32 %v5462_v62  ;;  %v404_v40 = vadd.f32 %v403_v20, %v5305_v46  ;;  %v858_v51 = vsel %vm5427_vm8, %v697_v12, 0.0  ;;  %v425_v24 = vadd.f32 %v4241_v15, %v5196_v58  ;;  %v895_v58 = vld [vmem:[#allocation2] sm:$0xff]  ;;  %v898_v15 = vld [vmem:[#allocation2 + $0x18] sm:$0xff] }
  0xfe   :  { %4347 = vmatprep.subr.bf16.mxu1 %v4609_v6  ;;  %v792_v27 = vfloor.f32 %v5491_v53  ;;  %878 = vst [vmem:[#allocation2 + $0x29] sm:$0xff] %v858_v51  ;;  %v863_v48 = vsel %vm843_vm9, %v702_v36, 0.0  ;;  %v417_v44 = vadd.f32 %v416_v57, %v5202_v61  ;;  %v700_v46 = vmax.f32 %v5522_v28, 0.0  ;;  %v4245_v52 = vpop.f32.mrf.mxu1  ;;  %v4267_v30 = vpop.f32.mrf.mxu0 }
  0xff   :  { %v5540_v20 = vadd.f32 %v5321_v10, %v656_v47  ;;  %883 = vst [vmem:[#allocation2 + $0x51] sm:$0xff] %v863_v48  ;;  %v654_v21 = vadd.f32 %v601_v22, %v404_v40  ;;  %v915_v53 = vpack.c.bf16 %v896_v11, %v895_v58  ;;  %v916_v38 = vpack.c.bf16 %v898_v15, %v897_v41 }
 0x100   :  { %v861_v33 = vsel %vm5444_vm10, %v700_v46, 0.0  ;;  %v659_v57 = vadd.f32 %v4267_v30, %v425_v24  ;;  %v432_v40 = vpop.f32.mrf.mxu1  ;;  %vm845_vm0 = vcmp.lt.f32.partialorder %v5483_v8, 16.0  ;;  %vm848_vm1 = vcmp.lt.f32.partialorder %v5487_v50, 16.0 }
 0x101   :  { %4348 = vmatpush3.bf16.msra.mxu1 %v4609_v6  ;;  %v703_v61 = vmax.f32 %v5540_v20, 0.0  ;;  %881 = vst [vmem:[#allocation2 + $0x41] sm:$0xff] %v861_v33  ;;  %v5551_v47 = vadd.f32 %v5321_v10, %v654_v21  ;;  %4325 = vmatprep.mubr.bf16.mxu0 %v915_v53  ;;  %v614_v6 = vpop.f32.mrf.mxu0  ;;  %v6796_v51 = vmax.f32 %v5438_v7, 0.0  ;;  %v770_v22 = vmul.f32 0.05, %v750_v31  ;;  %v899_v33 = vld [vmem:[#allocation2 + $0x20] sm:$0xff]  ;;  %vm4785_vm12 = vmpackc.low %vm848_vm1, %vm847_vm15 }
 0x102   :  { %4349 = vmatprep.subr.bf16.mxu1 %v4610_v14  ;;  %v428_v11 = vadd.f32 %v4242_v59, %v5214_v4  ;;  %v5569_v48 = vadd.f32 %v5321_v10, %v659_v57  ;;  %4326 = vmatmul.mubr.bf16.vlgmr.msra.gmra.mxu0 %v916_v38  ;;  %v657_v32 = vadd.f32 %v614_v6, %v417_v44  ;;  %v6797_v35 = vmax.f32 %v5425_v2, 0.0 }
 0x103   :  { %v4771_v24 = vpack.c.bf16 %v697_v12, %v6796_v51  ;;  %v864_v41 = vsel %vm844_vm11, %v703_v61, 0.0  ;;  %v701_v7 = vmax.f32 %v5551_v47, 0.0  ;;  %v4268_v12 = vpop.f32.mrf.mxu0  ;;  %v6798_v59 = vcvt.s32.f32 %v5342_v39  ;;  %v4612_v39 = vld [vmem:[%s6710_s3 + $0x98] sm:$0xff]  }
 0x104   :  { %v4774_v4 = vpack.c.bf16 %v699_v60, %v6797_v35  ;;  %884 = vst [vmem:[#allocation2 + $0x59] sm:$0xff] %v864_v41  ;;  %v6799_v44 = vcvt.s32.f32 %v5345_v26  ;;  %v809_v45 = vmul.f32 20.0, %v789_v13  ;;  %v706_v2 = vmax.f32 %v5569_v48, 0.0  ;;  %v4246_v13 = vpop.f32.mrf.mxu1 }
 0x105   :  { %4772 = vmatprep.mubr.msk.bf16.mxu1 %vm4770_vm2, %v4771_v24  ;;  %v5582_v58 = vsub.f32 %v6798_v59, %v806_v56  ;;  %4350 = vmatpush3.bf16.msra.mxu1 %v4610_v14  ;;  %v5590_v17 = vadd.f32 %v5321_v10, %v657_v32  ;;  %v660_v60 = vadd.f32 %v4268_v12, %v428_v11  ;;  %v812_v15 = vmul.f32 20.0, %v792_v27  ;;  %v617_v14 = vpop.f32.mrf.mxu0  ;;  %v900_v21 = vld [vmem:[#allocation2 + $0x28] sm:$0xff]  ;;  %v901_v30 = vld [vmem:[#allocation2 + $0x30] sm:$0xff] }
 0x106   :  { %4775 = vmatmul.mubr.msk.bf16.gmra.mxu1 %vm4773_vm3, %v4774_v4  ;;  %v5586_v55 = vsub.f32 %v6799_v44, %v811_v43  ;;  %4351 = vmatprep.subr.bf16.mxu1 %v4611_v16  ;;  %v420_v56 = vadd.f32 %v419_v63, %v5221_v9  ;;  %v862_v26 = vsel %vm5504_vm13, %v701_v7, 0.0  ;;  %v441_v43 = vadd.f32 %v4245_v52, %v5237_v18  ;;  %v902_v18 = vld [vmem:[#allocation2 + $0x38] sm:$0xff]  ;;  %v4613_v24 = vld [vmem:[%s6710_s3 + $0x90] sm:$0xff]  }
 0x107   :  { %v790_v53 = vfloor.f32 %v770_v22  ;;  %882 = vst [vmem:[#allocation2 + $0x49] sm:$0xff] %v862_v26  ;;  %v867_v27 = vsel %vm847_vm15, %v706_v2, 0.0  ;;  %v433_v38 = vadd.f32 %v432_v40, %v5249_v25  ;;  %v704_v9 = vmax.f32 %v5590_v17, 0.0  ;;  %v4271_v57 = vpop.f32.mrf.mxu0  ;;  %v435_v22 = vpop.f32.mrf.mxu1 }
 0x108   :  { %v5606_v63 = vadd.f32 %v5321_v10, %v660_v60  ;;  %887 = vst [vmem:[#allocation2 + $0x71] sm:$0xff] %v867_v27  ;;  %v658_v52 = vadd.f32 %v617_v14, %v420_v56  ;;  %v917_v47 = vpack.c.bf16 %v900_v21, %v899_v33  ;;  %v918_v6 = vpack.c.bf16 %v902_v18, %v901_v30  ;;  %v903_v26 = vld [vmem:[#allocation2 + $0x40] sm:$0xff] }
 0x109   :  { %4352 = vmatpush3.bf16.msra.mxu1 %v4611_v16  ;;  %v865_v51 = vsel %vm845_vm0, %v704_v9, 0.0  ;;  %v663_v40 = vadd.f32 %v4271_v57, %v441_v43  ;;  %vm846_vm4 = vcmp.lt.f32.partialorder %v5582_v58, 16.0  ;;  %v630_v16 = vpop.f32.mrf.mxu0  ;;  %v6800_v41 = vcvt.s32.f32 %v5370_v29  ;;  %v4615_v30 = vld [vmem:[%s6710_s3 + $0x80] sm:$0xff]  }
 0x10a   :  { %v707_v25 = vmax.f32 %v5606_v63, 0.0  ;;  %4353 = vmatprep.subr.bf16.mxu1 %v4612_v39  ;;  %885 = vst [vmem:[#allocation2 + $0x61] sm:$0xff] %v865_v51  ;;  %v685_v11 = vadd.f32 %v5321_v10, %v658_v52  ;;  %4329 = vmatprep.mubr.bf16.mxu0 %v917_v47  ;;  %v810_v35 = vmul.f32 20.0, %v790_v53  ;;  %v4777_v4 = vpack.c.bf16 %v701_v7, %v700_v46  ;;  %vm4782_vm11 = vmpackc.low %vm846_vm4, %vm845_vm0  ;;  %v1311_v63 = vld [vmem:[#allocation2 + $0xa] sm:$0xff] }
 0x10b   :  { %v5620_v32 = vsub.f32 %v6800_v41, %v809_v45  ;;  %v444_v12 = vadd.f32 %v4246_v13, %v5259_v34  ;;  %v5634_v29 = vadd.f32 %v5321_v10, %v663_v40  ;;  %4330 = vmatmul.mubr.bf16.gmra.mxu0 %v918_v6  ;;  %v661_v44 = vadd.f32 %v630_v16, %v433_v38  ;;  %v4272_v23 = vpop.f32.mrf.mxu0  ;;  %v906_v43 = vld [vmem:[#allocation2 + $0x58] sm:$0xff]  ;;  %v1314_v16 = vld [vmem:[#allocation2 + $0x22] sm:$0xff]  ;;  %v1315_v41 = vld [vmem:[#allocation2 + $0x2a] sm:$0xff] }
 0x10c   :  { %4778 = vmatprep.mubr.msk.bf16.mxu1 %vm4776_vm5, %v4777_v4  ;;  %v868_v59 = vsel %vm848_vm1, %v707_v25, 0.0  ;;  %v4780_v34 = vpack.c.bf16 %v703_v61, %v702_v36  ;;  %v705_v19 = vmax.f32 %v685_v11, 0.0  ;;  %vm851_vm7 = vcmp.lt.f32.partialorder %v5586_v55, 16.0  ;;  %v4614_v36 = vld [vmem:[%s6710_s3 + $0x88] sm:$0xff]   ;;  %v1313_v11 = vld [vmem:[#allocation2 + $0x1a] sm:$0xff] }
 0x10d   :  { %888 = vst [vmem:[#allocation2 + $0x79] sm:$0xff] %v868_v59  ;;  %v6801_v28 = vcvt.s32.f32 %v5398_v5  ;;  %4354 = vmatpush3.bf16.msra.mxu1 %v4612_v39  ;;  %v436_v0 = vadd.f32 %v435_v22, %v5271_v42  ;;  %v710_v3 = vmax.f32 %v5634_v29, 0.0  ;;  %v688_v7 = vadd.f32 %v5321_v10, %v661_v44  ;;  %v633_v5 = vpop.f32.mrf.mxu0  ;;  %v1317_v55 = vld [vmem:[#allocation2 + $0x3a] sm:$0xff]  ;;  %v1316_v44 = vld [vmem:[#allocation2 + $0x32] sm:$0xff] }
 0x10e   :  { %4781 = vmatmul.mubr.msk.bf16.gmra.mxu1 %vm4779_vm6, %v4780_v34  ;;  %v664_v1 = vadd.f32 %v4272_v23, %v444_v12  ;;  %4355 = vmatprep.subr.bf16.mxu1 %v4613_v24  ;;  %v866_v20 = vsel %vm846_vm4, %v705_v19, 0.0  ;;  %vm849_vm8 = vcmp.lt.f32.partialorder %v5620_v32, 16.0  ;;  %v830_v61 = vsub.f32 %v750_v31, %v810_v35  ;;  %v904_v42 = vld [vmem:[#allocation2 + $0x48] sm:$0xff]  ;;  %v905_v45 = vld [vmem:[#allocation2 + $0x50] sm:$0xff] }
 0x10f   :  { %v832_v46 = vsub.f32 %v6801_v28, %v812_v15  ;;  %886 = vst [vmem:[#allocation2 + $0x69] sm:$0xff] %v866_v20  ;;  %v871_v60 = vsel %vm851_vm7, %v710_v3, 0.0  ;;  %v708_v15 = vmax.f32 %v688_v7, 0.0  ;;  %v662_v56 = vadd.f32 %v633_v5, %v436_v0  ;;  %v1312_v32 = vld [vmem:[#allocation2 + $0x12] sm:$0xff]  ;;  %v1318_v12 = vld [vmem:[#allocation2 + $0x42] sm:$0xff]  ;;  %v1319_v59 = vld [vmem:[#allocation2 + $0x4a] sm:$0xff] }
 0x110   :  { %v691_v39 = vadd.f32 %v5321_v10, %v664_v1  ;;  %891 = vst [vmem:[#allocation2 + $0x91] sm:$0xff] %v871_v60  ;;  %v919_v13 = vpack.c.bf16 %v904_v42, %v903_v26  ;;  %v920_v14 = vpack.c.bf16 %v906_v43, %v905_v45  ;;  %vm850_vm10 = vcmp.lt.f32.partialorder %v830_v61, 16.0 }
 0x111   :  { %vm852_vm9 = vcmp.lt.f32.partialorder %v832_v46, 16.0  ;;  %4356 = vmatpush3.bf16.msra.mxu1 %v4613_v24  ;;  %v869_v62 = vsel %vm849_vm8, %v708_v15, 0.0  ;;  %v689_v21 = vadd.f32 %v5321_v10, %v662_v56  ;;  %v4783_v53 = vpack.c.bf16 %v705_v19, %v704_v9  ;;  %v907_v58 = vld [vmem:[#allocation2 + $0x60] sm:$0xff]  ;;  %vm4788_vm13 = vmpackc.low %vm850_vm10, %vm849_vm8  ;;  %v1320_v46 = vld [vmem:[#allocation2 + $0x52] sm:$0xff] }
 0x112   :  { %v711_v31 = vmax.f32 %v691_v39, 0.0  ;;  %4357 = vmatprep.subr.bf16.mxu1 %v4614_v36  ;;  %889 = vst [vmem:[#allocation2 + $0x81] sm:$0xff] %v869_v62  ;;  %4333 = vmatprep.mubr.bf16.mxu0 %v919_v13  ;;  %v4786_v10 = vpack.c.bf16 %v707_v25, %v706_v2  ;;  %v6802_v48 = vmov 0.0   ;;  %v1310_v2 = vld [vmem:[#allocation2 + $0x2] sm:$0xff]  ;;  %vm4810_vm14 = vmmov 1   ;;  %v1321_v19 = vld [vmem:[#allocation2 + $0x5a] sm:$0xff] }
 0x113   :  { %4784 = vmatprep.mubr.msk.bf16.mxu1 %vm4782_vm11, %v4783_v53  ;;  %v709_v38 = vmax.f32 %v689_v21, 0.0  ;;  %4334 = vmatmul.mubr.bf16.gmra.mxu0 %v920_v14  ;;  %v1330_v51 = vpack.c.bf16 %v1311_v63, %v1310_v2  ;;  %vm4791_vm15 = vmpackc.low %vm4810_vm14, %vm851_vm7  ;;  %v1331_v35 = vpack.c.bf16 %v1313_v11, %v1312_v32  ;;  %v1332_v4 = vpack.c.bf16 %v1315_v41, %v1314_v16  ;;  %v5728_v11 = vld [vmem:[%s6713_s4] ss:$0 sm:$0xff]  ;;  %s4811_s4 = smov 64  }
 0x114   :  { %v872_v27 = vsel %vm852_vm9, %v711_v31, 0.0  ;;  %v910_v33 = vld [vmem:[#allocation2 + $0x78] sm:$0xff]  ;;  %v1333_v29 = vpack.c.bf16 %v1317_v55, %v1316_v44  ;;  %v1334_v34 = vpack.c.bf16 %v1319_v59, %v1318_v12  ;;  %v1335_v0 = vpack.c.bf16 %v1321_v19, %v1320_v46 }
 0x115   :  { %892 = vst [vmem:[#allocation2 + $0x99] sm:$0x3f] %v872_v27  ;;  %4358 = vmatpush3.bf16.msra.mxu1 %v4614_v36  ;;  %v870_v8 = vsel %vm850_vm10, %v709_v38, 0.0  ;;  %v4789_v50 = vpack.c.bf16 %v709_v38, %v708_v15  ;;  %v1324_v20 = vld [vmem:[#allocation2 + $0x72] sm:$0xff]  ;;  %vm1827_vm0 = vcmask 516096   ;;  %vm4812_vm1 = vmmov 0  }
 0x116   :  { %4787 = vmatmul.mubr.msk.bf16.gmra.mxu1 %vm4785_vm12, %v4786_v10  ;;  %4359 = vmatprep.subr.bf16.mxu1 %v4615_v30  ;;  %890 = vst [vmem:[#allocation2 + $0x89] sm:$0xff] %v870_v8  ;;  %v908_v17 = vld [vmem:[#allocation2 + $0x68] sm:$0xff]  ;;  %v909_v9 = vld [vmem:[#allocation2 + $0x70] sm:$0xff]  ;;  %v4616_v15 = vld [vmem:[%s6712_s5 + $0x38] sm:$0xff]   ;;  %vm1685_vm2 = vcmask 523264   ;;  %vm1705_vm11 = vcmask 521216  }
 0x117   :  { %v921_v49 = vpack.c.bf16 %v908_v17, %v907_v58  ;;  %v922_v18 = vpack.c.bf16 %v910_v33, %v909_v9  ;;  %4790 = vmatprep.mubr.msk.bf16.mxu1 %vm4788_vm13, %v4789_v50  ;;  %v1322_v23 = vld [vmem:[#allocation2 + $0x62] sm:$0xff]  ;;  %v1323_v28 = vld [vmem:[#allocation2 + $0x6a] sm:$0xff]  ;;  %4382 = vmatpush3.bf16.msra.mxu0 %v4616_v15  ;;  %1828 = vst.msk [vmem:[#allocation4] sm:$0x1] %vm1827_vm0, %v6802_v48 }
 0x118   :  { %4383 = vmatprep.subr.bf16.mxu0 %v6802_v48 }
 0x119   :  { %4360 = vmatpush3.bf16.msra.mxu1 %v4615_v30  ;;  %4337 = vmatprep.mubr.bf16.mxu0 %v921_v49  ;;  %v911_v57 = vld [vmem:[#allocation2 + $0x80] sm:$0xff] }
 0x11a   :  { %4409 = vmatprep.subr.bf16.mxu1 %v6802_v48  ;;  %v1325_v7 = vld [vmem:[#allocation2 + $0x7a] sm:$0xff] }
 0x11b   :  { %4338 = vmatmul.mubr.bf16.gmra.mxu0 %v922_v18  ;;  %v1337_v5 = vpack.c.bf16 %v1325_v7, %v1324_v20 }
 0x11c   :  { %v960_v52 = vld [vmem:[#allocation2 + $0x99] sm:$0x3f] }
 0x11d   :  { %v912_v47 = vld [vmem:[#allocation2 + $0x88] sm:$0xff]  ;;  %v913_v6 = vld [vmem:[#allocation2 + $0x90] sm:$0xff]  ;;  %v4792_v40 = vpack.c.bf16 %v960_v52, %v710_v3  ;;  %v914_v24 = vld [vmem:[#allocation2 + $0x98] sm:$0x3f]  ;;  %v1336_v3 = vpack.c.bf16 %v1323_v28, %v1322_v23 }
 0x11e   :  { %v923_v25 = vpack.c.bf16 %v912_v47, %v911_v57  ;;  %v924_v22 = vpack.c.bf16 %v914_v24, %v913_v6  ;;  %v1326_v1 = vld [vmem:[#allocation2 + $0x82] sm:$0xff]  ;;  %v1327_v36 = vld [vmem:[#allocation2 + $0x8a] sm:$0xff]  ;;  %v1328_v42 = vld [vmem:[#allocation2 + $0x92] sm:$0xff] }
 0x11f   :  { %4793 = vmatmul.mubr.msk.bf16.gmra.mxu1 %vm4791_vm15, %v4792_v40  ;;  %v1338_v61 = vpack.c.bf16 %v1327_v36, %v1326_v1  ;;  %v1329_v45 = vld [vmem:[#allocation2 + $0x9a] sm:$0x3f]  ;;  %vm1825_vm15 = vcmask 522240  }
 0x120   :  { %4361 = vmatprep.mubr.bf16.mxu1 %v1330_v51  ;;  %4341 = vmatprep.mubr.bf16.mxu0 %v923_v25  ;;  %v1339_v60 = vpack.c.bf16 %v1329_v45, %v1328_v42 }
 0x123   :  { %4342 = vmatmul.mubr.bf16.gmra.mxu0 %v924_v22 }
 0x124   :  { %4389 = vmatprep.mubr.msk.bf16.mxu0 %vm4812_vm1, %v6802_v48 }
 0x127   :  { %4362 = vmatmul.mubr.bf16.vlgmr.msra.gmra.mxu1 %v1331_v35 }
 0x128   :  { %4365 = vmatprep.mubr.bf16.mxu1 %v1332_v4 }
 0x12f   :  { %4366 = vmatmul.mubr.bf16.gmra.mxu1 %v1333_v29 }
 0x130   :  { %4369 = vmatprep.mubr.bf16.mxu1 %v1334_v34 }
 0x137   :  { %4370 = vmatmul.mubr.bf16.gmra.mxu1 %v1335_v0 }
 0x138   :  { %4373 = vmatprep.mubr.bf16.mxu1 %v1336_v3 }
 0x13f   :  { %4374 = vmatmul.mubr.bf16.gmra.mxu1 %v1337_v5 }
 0x140   :  { %4377 = vmatprep.mubr.bf16.mxu1 %v1338_v61 }
 0x147   :  { %4378 = vmatmul.mubr.bf16.gmra.mxu1 %v1339_v60  ;;  %v4619_v60 = vld [vmem:[%s6712_s5 + $0x18] sm:$0xff]  }
 0x148   :  { %4410 = vmatpush3.bf16.msra.mxu1 %v4619_v60  ;;  %4417 = vmatprep.mubr.msk.bf16.mxu1 %vm4812_vm1, %v6802_v48 }
 0x149   :  { %4411 = vmatprep.subr.bf16.mxu1 %v6802_v48 }
 0x1bc   :  { %v4291_v39 = vpop.f32.mrf.mxu1 }
 0x1be   :  { %v1070_v56 = vpop.f32.mrf.mxu1 }
 0x1c0   :  { %v4292_v26 = vpop.f32.mrf.mxu1 }
 0x1c2   :  { %v1073_v43 = vpop.f32.mrf.mxu1  ;;  %v4327_v13 = vpop.f32.mrf.mxu0 }
 0x1c3   :  { %v1240_v24 = vadd.f32 %v4327_v13, %v4291_v39 }
 0x1c4   :  { %v1231_v62 = vpop.f32.mrf.mxu0 }
 0x1c5   :  { %v1232_v16 = vadd.f32 %v1231_v62, %v1070_v56 }
 0x1c6   :  { %v4295_v14 = vpop.f32.mrf.mxu1  ;;  %v4328_v21 = vpop.f32.mrf.mxu0 }
 0x1c7   :  { %v1243_v4 = vadd.f32 %v4328_v21, %v4292_v26 }
 0x1c8   :  { %v1086_v31 = vpop.f32.mrf.mxu1  ;;  %v1234_v53 = vpop.f32.mrf.mxu0 }
 0x1c9   :  { %v1235_v44 = vadd.f32 %v1234_v53, %v1073_v43  ;;  %v4617_v43 = vld [vmem:[%s6712_s5 + $0x30] sm:$0xff]  }
 0x1ca   :  { %v4296_v30 = vpop.f32.mrf.mxu1  ;;  %4384 = vmatpush3.bf16.msra.mxu0 %v4617_v43  ;;  %v4620_v53 = vld [vmem:[%s6712_s5 + $0x10] sm:$0xff]  }
 0x1cb   :  { %v4331_v10 = vpop.f32.mrf.mxu0  ;;  %4385 = vmatprep.subr.bf16.mxu0 %v6802_v48  ;;  %4412 = vmatpush3.bf16.msra.mxu1 %v4620_v53 }
 0x1cc   :  { %v1089_v27 = vpop.f32.mrf.mxu1  ;;  %v1256_v46 = vadd.f32 %v4331_v10, %v4295_v14  ;;  %4413 = vmatprep.subr.bf16.mxu1 %v6802_v48 }
 0x1cd   :  { %v1247_v17 = vpop.f32.mrf.mxu0 }
 0x1ce   :  { %v5697_v38 = vpop.f32.mrf.mxu1  ;;  %v1248_v36 = vadd.f32 %v1247_v17, %v1086_v31 }
 0x1cf   :  { %v4332_v49 = vpop.f32.mrf.mxu0 }
 0x1d0   :  { %v5699_v8 = vpop.f32.mrf.mxu1  ;;  %v1259_v15 = vadd.f32 %v4332_v49, %v4296_v30 }
 0x1d1   :  { %v1250_v50 = vpop.f32.mrf.mxu0 }
 0x1d2   :  { %v5701_v58 = vpop.f32.mrf.mxu1  ;;  %v1251_v14 = vadd.f32 %v1250_v50, %v1089_v27 }
 0x1d3   :  { %v4335_v63 = vpop.f32.mrf.mxu0 }
 0x1d4   :  { %v5703_v9 = vpop.f32.mrf.mxu1  ;;  %v1272_v31 = vadd.f32 %v4335_v63, %v5697_v38 }
 0x1d5   :  { %v5715_v47 = vpop.f32.mrf.mxu0 }
 0x1d6   :  { %v5705_v33 = vpop.f32.mrf.mxu1  ;;  %v1264_v50 = vadd.f32 %v5715_v47, %v5699_v8  ;;  %v4618_v8 = vld [vmem:[%s6712_s5 + $0x28] sm:$0xff]  }
 0x1d7   :  { %v5721_v25 = vpop.f32.mrf.mxu0  ;;  %v4621_v47 = vld [vmem:[%s6712_s5 + $0x8] sm:$0xff]   ;;  %4386 = vmatpush3.bf16.msra.mxu0 %v4618_v8 }
 0x1d8   :  { %v5707_v18 = vpop.f32.mrf.mxu1  ;;  %4414 = vmatpush3.bf16.msra.mxu1 %v4621_v47  ;;  %4387 = vmatprep.subr.bf16.mxu0 %v6802_v48 }
 0x1d9   :  { %v5730_v32 = vpop.f32.mrf.mxu0  ;;  %4415 = vmatprep.subr.bf16.mxu1 %v6802_v48 }
 0x1da   :  { %v5709_v2 = vpop.f32.mrf.mxu1 }
 0x1db   :  { %v5739_v23 = vpop.f32.mrf.mxu0 }
 0x1dc   :  { %v5711_v52 = vpop.f32.mrf.mxu1 }
 0x1dd   :  { %v5755_v42 = vpop.f32.mrf.mxu0 }
 0x1df   :  { %v5713_v57 = vpop.f32.mrf.mxu1  ;;  %v4340_v21 = vpop.f32.mrf.mxu0 }
 0x1e1   :  { %v5717_v6 = vpop.f32.mrf.mxu1 }
 0x1e3   :  { %v5719_v51 = vpop.f32.mrf.mxu1 }
 0x1e5   :  { %v5723_v40 = vpop.f32.mrf.mxu1 }
 0x1e7   :  { %v4363_v22 = vpop.f32.mrf.mxu1 }
 0x1e8   :  { %v1520_v41 = vadd.f32 %v4363_v22, %v1240_v24 }
 0x1e9   :  { %v1439_v35 = vpop.f32.mrf.mxu1 }
 0x1ea   :  { %v1518_v55 = vadd.f32 %v1439_v35, %v1232_v16  ;;  %v5733_v12 = vadd.f32 %v5728_v11, %v1520_v41  ;;  %v1282_v16 = vpop.f32.mrf.mxu0  ;;  %v1275_v35 = vadd.f32 %v5721_v25, %v5701_v58  ;;  %v1288_v58 = vadd.f32 %v5739_v23, %v5705_v33 }
 0x1eb   :  { %v4364_v59 = vpop.f32.mrf.mxu1  ;;  %v1280_v23 = vadd.f32 %v5755_v42, %v5707_v18  ;;  %v1291_v18 = vadd.f32 %v4340_v21, %v5709_v2 }
 0x1ec   :  { %v1521_v29 = vadd.f32 %v4364_v59, %v1243_v4  ;;  %v1567_v34 = vmax.f32 %v5733_v12, 0.0  ;;  %v5737_v19 = vadd.f32 %v5728_v11, %v1518_v55  ;;  %v4343_v25 = vpop.f32.mrf.mxu0 }
 0x1ed   :  { %v1442_v28 = vpop.f32.mrf.mxu1 }
 0x1ee   :  { %v5742_v0 = vadd.f32 %v5728_v11, %v1521_v29  ;;  %v1519_v3 = vadd.f32 %v1442_v28, %v1235_v44  ;;  %1609 = vrot.lane.b32.xlu1 %v1567_v34, %s4811_s4  ;;  %v1565_v7 = vmax.f32 %v5737_v19, 0.0  ;;  %v1267_v29 = vadd.f32 %v5730_v32, %v5703_v9  ;;  %v4623_v9 = vld [vmem:[%s6712_s5] sm:$0xff]   ;;  %v1295_v43 = vpop.f32.mrf.mxu0 }
 0x1ef   :  { %v4367_v1 = vpop.f32.mrf.mxu1  ;;  %4416 = vmatpush3.bf16.msra.mxu1 %v4623_v9  ;;  %v1296_v8 = vadd.f32 %v1295_v43, %v5717_v6 }
 0x1f0   :  { %v1568_v20 = vmax.f32 %v5742_v0, 0.0  ;;  %v5750_v5 = vadd.f32 %v5728_v11, %v1519_v3  ;;  %v1524_v61 = vadd.f32 %v4367_v1, %v1256_v46  ;;  %1605 = vrot.lane.b32.xlu0 %v1565_v7, %s4811_s4  ;;  %v4622_v1 = vld [vmem:[%s6712_s5 + $0x20] sm:$0xff]   ;;  %4465 = vmatprep.subr.bf16.mxu1 %v6802_v48  ;;  %v4344_v2 = vpop.f32.mrf.mxu0 }
 0x1f1   :  { %v1455_v45 = vpop.f32.mrf.mxu1  ;;  %4388 = vmatpush3.bf16.msra.mxu0 %v4622_v1  ;;  %v1307_v6 = vadd.f32 %v4344_v2, %v5719_v51 }
 0x1f2   :  { %v1566_v39 = vmax.f32 %v5750_v5, 0.0  ;;  %v5762_v56 = vadd.f32 %v5728_v11, %v1524_v61  ;;  %v1522_v26 = vadd.f32 %v1455_v45, %v1248_v36  ;;  %1611 = vrot.lane.b32.xlu1 %v1568_v20, %s4811_s4  ;;  %4437 = vmatprep.subr.bf16.mxu0 %v6802_v48 }
 0x1f3   :  { %v4368_v13 = vpop.f32.mrf.mxu1 }
 0x1f4   :  { %v1525_v62 = vadd.f32 %v4368_v13, %v1259_v15  ;;  %1607 = vrot.lane.b32.xlu0 %v1566_v39, %s4811_s4  ;;  %v1571_v27 = vmax.f32 %v5762_v56, 0.0  ;;  %v5781_v10 = vadd.f32 %v5728_v11, %v1522_v26 }
 0x1f5   :  { %v1458_v30 = vpop.f32.mrf.mxu1 }
 0x1f6   :  { %v5784_v17 = vadd.f32 %v5728_v11, %v1525_v62  ;;  %v1523_v49 = vadd.f32 %v1458_v30, %v1251_v14  ;;  %v1569_v4 = vmax.f32 %v5781_v10, 0.0  ;;  %v1283_v30 = vadd.f32 %v1282_v16, %v5711_v52 }
 0x1f7   :  { %v4371_v38 = vpop.f32.mrf.mxu1  ;;  %v1304_v16 = vadd.f32 %v4343_v25, %v5713_v57 }
 0x1f8   :  { %v1572_v63 = vmax.f32 %v5784_v17, 0.0  ;;  %v5790_v24 = vadd.f32 %v5728_v11, %v1523_v49  ;;  %v1528_v22 = vadd.f32 %v4371_v38, %v1272_v31  ;;  %1617 = vrot.lane.b32.xlu0 %v1571_v27, %s4811_s4 }
 0x1f9   :  { %v1471_v41 = vpop.f32.mrf.mxu1 }
 0x1fa   :  { %v5807_v55 = vadd.f32 %v5728_v11, %v1528_v22  ;;  %v1526_v59 = vadd.f32 %v1471_v41, %v1264_v50  ;;  %1619 = vrot.lane.b32.xlu1 %v1572_v63, %s4811_s4  ;;  %v1570_v28 = vmax.f32 %v5790_v24, 0.0 }
 0x1fb   :  { %v4372_v44 = vpop.f32.mrf.mxu1 }
 0x1fc   :  { %v1529_v46 = vadd.f32 %v4372_v44, %v1275_v35  ;;  %1613 = vrot.lane.b32.xlu0 %v1569_v4, %s4811_s4  ;;  %v1575_v32 = vmax.f32 %v5807_v55, 0.0  ;;  %v5830_v36 = vadd.f32 %v5728_v11, %v1526_v59  ;;  %v1298_v59 = vpop.f32.mrf.mxu0 }
 0x1fd   :  { %v1474_v3 = vpop.f32.mrf.mxu1  ;;  %v1299_v25 = vadd.f32 %v1298_v59, %v5723_v40  ;;  %v6805_v59 = vld [vmem:[#allocation9_spill] sm:$0xff] }
 0x1fe   :  { %v5833_v61 = vadd.f32 %v5728_v11, %v1529_v46  ;;  %v1527_v33 = vadd.f32 %v1474_v3, %v1267_v29  ;;  %1615 = vrot.lane.b32.xlu1 %v1570_v28, %s4811_s4  ;;  %v1573_v42 = vmax.f32 %v5830_v36, 0.0  ;;  %v4624_v36 = vld [vmem:[%s6712_s5 + $0x58] sm:$0xff]  }
 0x1ff   :  { %v4375_v45 = vpop.f32.mrf.mxu1 }
 0x200   :  { %v1576_v60 = vmax.f32 %v5833_v61, 0.0  ;;  %v5842_v15 = vadd.f32 %v5728_v11, %v1527_v33  ;;  %v1532_v26 = vadd.f32 %v4375_v45, %v1288_v58  ;;  %1625 = vrot.lane.b32.xlu0 %v1575_v32, %s4811_s4  ;;  %v6818_v61 = vld [vmem:[#allocation11_spill] sm:$0xff] }
 0x201   :  { %v1487_v13 = vpop.f32.mrf.mxu1 }
 0x202   :  { %v5855_v14 = vadd.f32 %v5728_v11, %v1532_v26  ;;  %v1530_v62 = vadd.f32 %v1487_v13, %v1280_v23  ;;  %1627 = vrot.lane.b32.xlu1 %v1576_v60, %s4811_s4  ;;  %v1574_v53 = vmax.f32 %v5842_v15, 0.0 }
 0x203   :  { %v4376_v31 = vpop.f32.mrf.mxu1 }
 0x204   :  { %v1533_v49 = vadd.f32 %v4376_v31, %v1291_v18  ;;  %1621 = vrot.lane.b32.xlu0 %v1573_v42, %s4811_s4  ;;  %v1579_v38 = vmax.f32 %v5855_v14, 0.0  ;;  %v5868_v50 = vadd.f32 %v5728_v11, %v1530_v62  ;;  %v6803_v62 = vld [vmem:[#allocation10_spill] sm:$0xff] }
 0x205   :  { %v1490_v21 = vpop.f32.mrf.mxu1  ;;  %v1757_v31 = vmul.f32 0.1, %v6803_v62 }
 0x206   :  { %v5871_v22 = vadd.f32 %v5728_v11, %v1533_v49  ;;  %v1531_v41 = vadd.f32 %v1490_v21, %v1283_v30  ;;  %1623 = vrot.lane.b32.xlu1 %v1574_v53, %s4811_s4  ;;  %v1577_v29 = vmax.f32 %v5868_v50, 0.0 }
 0x207   :  { %v4379_v52 = vpop.f32.mrf.mxu1  ;;  %v1767_v2 = vfloor.f32 %v1757_v31 }
 0x208   :  { %v1580_v47 = vmax.f32 %v5871_v22, 0.0  ;;  %v5880_v35 = vadd.f32 %v5728_v11, %v1531_v41  ;;  %1633 = vrot.lane.b32.xlu0 %v1579_v38, %s4811_s4  ;;  %v1536_v46 = vadd.f32 %v4379_v52, %v1304_v16 }
 0x209   :  { %v1503_v44 = vpop.f32.mrf.mxu1 }
 0x20a   :  { %v1534_v58 = vadd.f32 %v1503_v44, %v1296_v8  ;;  %1635 = vrot.lane.b32.xlu1 %v1580_v47, %s4811_s4  ;;  %v1578_v3 = vmax.f32 %v5880_v35, 0.0  ;;  %v5899_v33 = vadd.f32 %v5728_v11, %v1536_v46  ;;  %v1759_v44 = vmul.f32 0.1, %v6805_v59 }
 0x20b   :  { %v4380_v57 = vpop.f32.mrf.mxu1  ;;  %v1777_v46 = vmul.f32 10.0, %v1767_v2 }
 0x20c   :  { %v5893_v1 = vadd.f32 %v5728_v11, %v1534_v58  ;;  %1629 = vrot.lane.b32.xlu0 %v1577_v29, %s4811_s4  ;;  %v1537_v45 = vadd.f32 %v4380_v57, %v1307_v6  ;;  %v1583_v40 = vmax.f32 %v5899_v33, 0.0  ;;  %v6806_v6 = vld [vmem:[#allocation7_spill] sm:$0xff] }
 0x20d   :  { %v1506_v9 = vpop.f32.mrf.mxu1  ;;  %v1758_v19 = vmul.f32 0.1, %v6806_v6 }
 0x20e   :  { %v1581_v23 = vmax.f32 %v5893_v1, 0.0  ;;  %v1535_v26 = vadd.f32 %v1506_v9, %v1299_v25  ;;  %1631 = vrot.lane.b32.xlu1 %v1578_v3, %s4811_s4  ;;  %v5913_v43 = vadd.f32 %v5728_v11, %v1537_v45  ;;  %v1787_v25 = vsub.f32 %v6803_v62, %v1777_v46  ;;  %v6809_v62 = vld [vmem:[#allocation14_spill] sm:$0xff] }
 0x210   :  { %v5906_v51 = vadd.f32 %v5728_v11, %v1535_v26  ;;  %1637 = vrot.lane.b32.xlu0 %v1581_v23, %s4811_s4  ;;  %v1584_v18 = vmax.f32 %v5913_v43, 0.0  ;;  %v6804_v11 = vld [vmem:[#allocation8_spill] sm:$0xff]  ;;  %v1768_v26 = vfloor.f32 %v1758_v19  ;;  %vm5946_vm3 = vcmp.lt.f32.partialorder %v1787_v25, 8.0 }
 0x211   :  { %v1756_v30 = vmul.f32 0.1, %v6804_v11 }
 0x212   :  { %v1582_v13 = vmax.f32 %v5906_v51, 0.0  ;;  %v1778_v17 = vmul.f32 10.0, %v1768_v26 }
 0x213   :  { %v1766_v16 = vfloor.f32 %v1756_v30  ;;  %v1761_v30 = vmul.f32 0.1, %v6809_v62 }
 0x214   :  { %1639 = vrot.lane.b32.xlu1 %v1582_v13, %s4811_s4  ;;  %1641 = vrot.lane.b32.xlu0 %v1583_v40, %s4811_s4 }
 0x218   :  { %1643 = vrot.lane.b32.xlu1 %v1584_v18, %s4811_s4 }
 0x260   :  { %v1610_v49 = vpop.permute.xlu1 %1609 }
 0x261   :  { %v1667_v21 = vmax.f32 %v1567_v34, %v1610_v49  ;;  %v1776_v34 = vmul.f32 10.0, %v1766_v16 }
 0x262   :  { %v1606_v41 = vpop.permute.xlu0 %1605 }
 0x263   :  { %1688 = vst.msk [vmem:[#allocation3 + $0x10] sm:$0xff] %vm1685_vm2, %v1667_v21  ;;  %v1665_v52 = vmax.f32 %v1565_v7, %v1606_v41  ;;  %v1769_v7 = vfloor.f32 %v1759_v44  ;;  %v1786_v0 = vsub.f32 %v6804_v11, %v1776_v34 }
 0x264   :  { %v1612_v8 = vpop.permute.xlu1 %1611 }
 0x265   :  { %1686 = vst.msk [vmem:[#allocation3] sm:$0xff] %vm1685_vm2, %v1665_v52  ;;  %v1668_v58 = vmax.f32 %v1568_v20, %v1612_v8  ;;  %v1779_v31 = vmul.f32 10.0, %v1769_v7  ;;  %vm5957_vm4 = vcmp.lt.f32.partialorder %v1786_v0, 8.0 }
 0x266   :  { %v1608_v57 = vpop.permute.xlu0 %1607  ;;  %vm4794_vm0 = vmpackc.low %vm5946_vm3, %vm5957_vm4 }
 0x267   :  { %1689 = vst.msk [vmem:[#allocation3 + $0x18] sm:$0xff] %vm1685_vm2, %v1668_v58  ;;  %v1666_v12 = vmax.f32 %v1566_v39, %v1608_v57  ;;  %v1789_v10 = vsub.f32 %v6805_v59, %v1779_v31  ;;  %v1771_v58 = vfloor.f32 %v1761_v30  ;;  %v6813_v59 = vld [vmem:[#allocation13_spill] sm:$0xff] }
 0x268   :  { %v1763_v19 = vmul.f32 0.1, %v6813_v59  ;;  %v4647_v31 = vld [vmem:[%s6714_s7 + $0xa0] sm:$0xff]  }
 0x269   :  { %1687 = vst.msk [vmem:[#allocation3 + $0x8] sm:$0xff] %vm1685_vm2, %v1666_v12  ;;  %vm5980_vm5 = vcmp.lt.f32.partialorder %v1789_v10, 8.0 }
 0x26a   :  { %v1618_v9 = vpop.permute.xlu0 %1617 }
 0x26b   :  { %v1671_v45 = vmax.f32 %v1571_v27, %v1618_v9 }
 0x26c   :  { %v1620_v20 = vpop.permute.xlu1 %1619 }
 0x26d   :  { %1692 = vst.msk [vmem:[#allocation3 + $0x30] sm:$0xff] %vm1685_vm2, %v1671_v45  ;;  %v1672_v39 = vmax.f32 %v1572_v63, %v1620_v20  ;;  %v1781_v45 = vmul.f32 10.0, %v1771_v58 }
 0x26e   :  { %v1709_v49 = vld [vmem:[#allocation3 + $0x10] ss:$2 sm:$0xff]  ;;  %v1729_v2 = vld [vmem:[#allocation3 + $0x11] ss:$2 sm:$0xff]  ;;  %v1614_v56 = vpop.permute.xlu0 %1613 }
 0x26f   :  { %v1747_v27 = vmax.f32 %v1709_v49, %v1729_v2  ;;  %1693 = vst.msk [vmem:[#allocation3 + $0x38] sm:$0xff] %vm1685_vm2, %v1672_v39  ;;  %v1669_v11 = vmax.f32 %v1569_v4, %v1614_v56  ;;  %v6812_v4 = vld [vmem:[#allocation12_spill] sm:$0xff]  ;;  %v1773_v49 = vfloor.f32 %v1763_v19  ;;  %v1791_v2 = vsub.f32 %v6809_v62, %v1781_v45 }
 0x270   :  { %v1707_v41 = vld [vmem:[#allocation3] ss:$2 sm:$0xff]  ;;  %v1727_v52 = vld [vmem:[#allocation3 + $0x1] ss:$2 sm:$0xff]  ;;  %v1616_v16 = vpop.permute.xlu1 %1615  ;;  %v1760_v46 = vmul.f32 0.1, %v6812_v4 }
 0x271   :  { %v1807_v63 = vsel %vm5946_vm3, %v1747_v27, 0.0  ;;  %v1746_v8 = vmax.f32 %v1707_v41, %v1727_v52  ;;  %1690 = vst.msk [vmem:[#allocation3 + $0x20] sm:$0xff] %vm1685_vm2, %v1669_v11  ;;  %v1670_v44 = vmax.f32 %v1570_v28, %v1616_v16  ;;  %v1788_v28 = vsub.f32 %v6806_v6, %v1778_v17 }
 0x272   :  { %1817 = vst.msk [vmem:[#allocation4 + $0x9] sm:$0xff] %vm1685_vm2, %v1807_v63  ;;  %v1626_v57 = vpop.permute.xlu0 %1625  ;;  %v1770_v9 = vfloor.f32 %v1760_v46  ;;  %vm6011_vm7 = vcmp.lt.f32.partialorder %v1791_v2, 8.0 }
 0x273   :  { %v1806_v12 = vsel %vm5957_vm4, %v1746_v8, 0.0  ;;  %1691 = vst.msk [vmem:[#allocation3 + $0x28] sm:$0xff] %vm1685_vm2, %v1670_v44  ;;  %v1675_v34 = vmax.f32 %v1575_v32, %v1626_v57  ;;  %vm5987_vm6 = vcmp.lt.f32.partialorder %v1788_v28, 8.0  ;;  %v1783_v57 = vmul.f32 10.0, %v1773_v49 }
 0x274   :  { %1816 = vst.msk [vmem:[#allocation4 + $0x1] sm:$0xff] %vm1685_vm2, %v1806_v12  ;;  %v1628_v24 = vpop.permute.xlu1 %1627 }
 0x275   :  { %1696 = vst.msk [vmem:[#allocation3 + $0x50] sm:$0xff] %vm1685_vm2, %v1675_v34  ;;  %v1676_v7 = vmax.f32 %v1576_v60, %v1628_v24  ;;  %v1762_v60 = vmul.f32 0.1, %v6818_v61  ;;  %v1793_v45 = vsub.f32 %v6813_v59, %v1783_v57 }
 0x276   :  { %v1713_v55 = vld [vmem:[#allocation3 + $0x30] ss:$2 sm:$0xff]  ;;  %v1733_v32 = vld [vmem:[#allocation3 + $0x31] ss:$2 sm:$0xff]  ;;  %v1622_v0 = vpop.permute.xlu0 %1621 }
 0x277   :  { %v1749_v20 = vmax.f32 %v1713_v55, %v1733_v32  ;;  %1697 = vst.msk [vmem:[#allocation3 + $0x58] sm:$0xff] %vm1685_vm2, %v1676_v7  ;;  %v1673_v6 = vmax.f32 %v1573_v42, %v1622_v0  ;;  %v1780_v42 = vmul.f32 10.0, %v1770_v9  ;;  %v1772_v46 = vfloor.f32 %v1762_v60  ;;  %v4649_v9 = vld [vmem:[%s6714_s7 + $0x90] sm:$0xff]  }
 0x278   :  { %v1624_v26 = vpop.permute.xlu1 %1623  ;;  %vm6053_vm9 = vcmp.lt.f32.partialorder %v1793_v45, 8.0 }
 0x279   :  { %v1809_v39 = vsel %vm5980_vm5, %v1749_v20, 0.0  ;;  %1694 = vst.msk [vmem:[#allocation3 + $0x40] sm:$0xff] %vm1685_vm2, %v1673_v6  ;;  %v1674_v30 = vmax.f32 %v1574_v53, %v1624_v26  ;;  %v1853_v41 = vld [vmem:[#allocation4 + $0x9] sm:$0xff]  ;;  %v1790_v58 = vsub.f32 %v6812_v4, %v1780_v42  ;;  %v1782_v7 = vmul.f32 10.0, %v1772_v46 }
 0x27a   :  { %1819 = vst.msk [vmem:[#allocation4 + $0x19] sm:$0xff] %vm1685_vm2, %v1809_v39  ;;  %v1711_v56 = vld [vmem:[#allocation3 + $0x20] ss:$2 sm:$0xff]  ;;  %v1731_v27 = vld [vmem:[#allocation3 + $0x21] ss:$2 sm:$0xff]  ;;  %v1634_v11 = vpop.permute.xlu0 %1633  ;;  %v6821_v4 = vld [vmem:[#allocation15_spill] sm:$0xff] }
 0x27b   :  { %v1748_v52 = vmax.f32 %v1711_v56, %v1731_v27  ;;  %1695 = vst.msk [vmem:[#allocation3 + $0x48] sm:$0xff] %vm1685_vm2, %v1674_v30  ;;  %v1679_v15 = vmax.f32 %v1579_v38, %v1634_v11  ;;  %v1852_v53 = vld [vmem:[#allocation4 + $0x1] sm:$0xff]  ;;  %v1764_v28 = vmul.f32 0.1, %v6821_v4  ;;  %vm6035_vm8 = vcmp.lt.f32.partialorder %v1790_v58, 8.0 }
 0x27c   :  { %v1829_v16 = vld [vmem:[#allocation4] sm:$0xff]  ;;  %v1830_v17 = vld [vmem:[#allocation4 + $0x8] sm:$0xff]  ;;  %v1636_v63 = vpop.permute.xlu1 %1635  ;;  %v1862_v8 = vpack.c.bf16 %v1853_v41, %v1852_v53  ;;  %v1765_v20 = vmul.f32 0.1, %v5263_v37  ;;  %v1792_v1 = vsub.f32 %v6818_v61, %v1782_v7 }
 0x27d   :  { %v1839_v44 = vpack.c.bf16 %v1830_v17, %v1829_v16  ;;  %v1808_v62 = vsel %vm5987_vm6, %v1748_v52, 0.0  ;;  %1700 = vst.msk [vmem:[#allocation3 + $0x70] sm:$0xff] %vm1685_vm2, %v1679_v15  ;;  %v1680_v10 = vmax.f32 %v1580_v47, %v1636_v63  ;;  %v4625_v47 = vld [vmem:[%s6712_s5 + $0x50] sm:$0xff]   ;;  %v1774_v26 = vfloor.f32 %v1764_v28  ;;  %v4627_v53 = vld [vmem:[%s6712_s5 + $0x40] sm:$0xff]  }
 0x27e   :  { %1818 = vst.msk [vmem:[#allocation4 + $0x11] sm:$0xff] %vm1685_vm2, %v1808_v62  ;;  %v1717_v38 = vld [vmem:[#allocation3 + $0x50] ss:$2 sm:$0xff]  ;;  %v1737_v12 = vld [vmem:[#allocation3 + $0x51] ss:$2 sm:$0xff]  ;;  %4390 = vmatmul.mubr.msk.bf16.vlgmr.msra.gmra.mxu0 %vm1685_vm2, %v1862_v8  ;;  %v1630_v34 = vpop.permute.xlu0 %1629  ;;  %v1775_v41 = vfloor.f32 %v1765_v20  ;;  %vm6075_vm10 = vcmp.lt.f32.partialorder %v1792_v1, 8.0 }
 0x27f   :  { %4418 = vmatmul.mubr.msk.bf16.vlgmr.msra.gmra.mxu1 %vm1685_vm2, %v1839_v44  ;;  %v1751_v24 = vmax.f32 %v1717_v38, %v1737_v12  ;;  %1701 = vst.msk [vmem:[#allocation3 + $0x78] sm:$0xff] %vm1685_vm2, %v1680_v10  ;;  %v1677_v22 = vmax.f32 %v1577_v29, %v1630_v34  ;;  %4438 = vmatpush3.bf16.msra.mxu0 %v4624_v36  ;;  %v1784_v16 = vmul.f32 10.0, %v1774_v26 }
 0x280   :  { %4393 = vmatprep.mubr.msk.bf16.mxu0 %vm4812_vm1, %v6802_v48  ;;  %v1632_v19 = vpop.permute.xlu1 %1631  ;;  %4421 = vmatprep.mubr.msk.bf16.mxu1 %vm4812_vm1, %v6802_v48  ;;  %v1785_v63 = vmul.f32 10.0, %v1775_v41 }
 0x281   :  { %4439 = vmatprep.subr.bf16.mxu0 %v6802_v48  ;;  %v1811_v50 = vsel %vm6011_vm7, %v1751_v24, 0.0  ;;  %1698 = vst.msk [vmem:[#allocation3 + $0x60] sm:$0xff] %vm1685_vm2, %v1677_v22  ;;  %v1678_v29 = vmax.f32 %v1578_v3, %v1632_v19  ;;  %v4626_v3 = vld [vmem:[%s6712_s5 + $0x48] sm:$0xff]   ;;  %v1855_v59 = vld [vmem:[#allocation4 + $0x19] sm:$0xff]  ;;  %v1794_v62 = vsub.f32 %v6821_v4, %v1784_v16 }
 0x282   :  { %1821 = vst.msk [vmem:[#allocation4 + $0x29] sm:$0xff] %vm1685_vm2, %v1811_v50  ;;  %v1715_v55 = vld [vmem:[#allocation3 + $0x40] ss:$2 sm:$0xff]  ;;  %v1735_v32 = vld [vmem:[#allocation3 + $0x41] ss:$2 sm:$0xff]  ;;  %v1638_v0 = vpop.permute.xlu0 %1637  ;;  %v1795_v43 = vsub.f32 %v5263_v37, %v1785_v63  ;;  %v4628_v16 = vld [vmem:[%s6714_s7 + $0x78] sm:$0xff]  }
 0x283   :  { %v1750_v6 = vmax.f32 %v1715_v55, %v1735_v32  ;;  %1699 = vst.msk [vmem:[#allocation3 + $0x68] sm:$0xff] %vm1685_vm2, %v1678_v29  ;;  %v1681_v35 = vmax.f32 %v1581_v23, %v1638_v0  ;;  %4440 = vmatpush3.bf16.msra.mxu0 %v4625_v47  ;;  %vm6090_vm12 = vcmp.lt.f32.partialorder %v1794_v62, 8.0  ;;  %4466 = vmatpush3.bf16.msra.mxu1 %v4628_v16  ;;  %v4633_v63 = vld [vmem:[%s6714_s7 + $0x60] sm:$0xff]  }
 0x284   :  { %4441 = vmatprep.subr.bf16.mxu0 %v6802_v48  ;;  %vm6100_vm13 = vcmp.lt.f32.partialorder %v1795_v43, 8.0  ;;  %4467 = vmatprep.subr.bf16.mxu1 %v6802_v48  ;;  %v4636_v62 = vld [vmem:[%s6714_s7 + $0x20] sm:$0xff]  }
 0x285   :  { %v1810_v60 = vsel %vm6035_vm8, %v1750_v6, 0.0  ;;  %1702 = vst.msk [vmem:[#allocation3 + $0x80] sm:$0xff] %vm1685_vm2, %v1681_v35  ;;  %v1854_v39 = vld [vmem:[#allocation4 + $0x11] sm:$0xff]  ;;  %v4651_v23 = vld [vmem:[%s6714_s7 + $0x80] sm:$0xff]  }
 0x286   :  { %v1831_v30 = vld [vmem:[#allocation4 + $0x10] sm:$0xff]  ;;  %v1832_v36 = vld [vmem:[#allocation4 + $0x18] sm:$0xff]  ;;  %1820 = vst.msk [vmem:[#allocation4 + $0x21] sm:$0xff] %vm1685_vm2, %v1810_v60  ;;  %v1640_v2 = vpop.permute.xlu1 %1639  ;;  %v1642_v56 = vpop.permute.xlu0 %1641  ;;  %v1863_v27 = vpack.c.bf16 %v1855_v59, %v1854_v39 }
 0x287   :  { %v1721_v42 = vld [vmem:[#allocation3 + $0x70] ss:$2 sm:$0xff]  ;;  %v1741_v49 = vld [vmem:[#allocation3 + $0x71] ss:$2 sm:$0xff]  ;;  %v1840_v11 = vpack.c.bf16 %v1832_v36, %v1831_v30  ;;  %v1682_v15 = vmax.f32 %v1582_v13, %v1640_v2  ;;  %v1683_v61 = vmax.f32 %v1583_v40, %v1642_v56  ;;  %4442 = vmatpush3.bf16.msra.mxu0 %v4626_v3  ;;  %v2100_v30 = vld [vmem:[#allocation4 + $0x2] sm:$0xff] }
 0x288   :  { %v1753_v52 = vmax.f32 %v1721_v42, %v1741_v49  ;;  %4394 = vmatmul.mubr.msk.bf16.gmra.mxu0 %vm1685_vm2, %v1863_v27  ;;  %4443 = vmatprep.subr.bf16.mxu0 %v6802_v48  ;;  %v2101_v39 = vld [vmem:[#allocation4 + $0xa] sm:$0xff]  ;;  %v2102_v42 = vld [vmem:[#allocation4 + $0x12] sm:$0xff] }
 0x289   :  { %4422 = vmatmul.mubr.msk.bf16.gmra.mxu1 %vm1685_vm2, %v1840_v11  ;;  %1703 = vst.msk [vmem:[#allocation3 + $0x88] sm:$0xff] %vm1685_vm2, %v1682_v15  ;;  %1704 = vst.msk [vmem:[#allocation3 + $0x90] sm:$0xff] %vm1685_vm2, %v1683_v61  ;;  %4397 = vmatprep.mubr.msk.bf16.mxu0 %vm4812_vm1, %v6802_v48  ;;  %v1857_v10 = vld [vmem:[#allocation4 + $0x29] sm:$0xff]  ;;  %v2110_v36 = vpack.c.bf16 %v2101_v39, %v2100_v30 }
 0x28a   :  { %v1813_v17 = vsel %vm6053_vm9, %v1753_v52, 0.0  ;;  %4425 = vmatprep.mubr.msk.bf16.mxu1 %vm4812_vm1, %v6802_v48  ;;  %v1719_v51 = vld [vmem:[#allocation3 + $0x60] ss:$2 sm:$0xff]  ;;  %v1739_v40 = vld [vmem:[#allocation3 + $0x61] ss:$2 sm:$0xff]  ;;  %v1644_v13 = vpop.permute.xlu1 %1643 }
 0x28b   :  { %1823 = vst.msk [vmem:[#allocation4 + $0x39] sm:$0xff] %vm1685_vm2, %v1813_v17  ;;  %v1752_v8 = vmax.f32 %v1719_v51, %v1739_v40  ;;  %v1684_v44 = vmax.f32 %v1584_v18, %v1644_v13  ;;  %4444 = vmatpush3.bf16.msra.mxu0 %v4627_v53  ;;  %v4629_v17 = vld [vmem:[%s6714_s7 + $0x70] sm:$0xff]   ;;  %v4630_v51 = vld [vmem:[%s6714_s7 + $0x38] sm:$0xff]   ;;  %v4631_v40 = vld [vmem:[%s6714_s7 + $0x68] sm:$0xff]  }
 0x28c   :  { %4501 = vmatprep.subr.bf16.mxu0 %v6802_v48  ;;  %4468 = vmatpush3.bf16.msra.mxu1 %v4629_v17  ;;  %v4632_v13 = vld [vmem:[%s6714_s7 + $0x30] sm:$0xff]  }
 0x28d   :  { %v1812_v46 = vsel %vm6075_vm10, %v1752_v8, 0.0  ;;  %1706 = vst.msk [vmem:[#allocation3 + $0x98] sm:$0x3f] %vm1705_vm11, %v1684_v44  ;;  %v1856_v58 = vld [vmem:[#allocation4 + $0x21] sm:$0xff]  ;;  %4469 = vmatprep.subr.bf16.mxu1 %v6802_v48  ;;  %v4635_v44 = vld [vmem:[%s6714_s7 + $0x58] sm:$0xff]  }
 0x28e   :  { %v1833_v57 = vld [vmem:[#allocation4 + $0x20] sm:$0xff]  ;;  %v1834_v38 = vld [vmem:[#allocation4 + $0x28] sm:$0xff]  ;;  %1822 = vst.msk [vmem:[#allocation4 + $0x31] sm:$0xff] %vm1685_vm2, %v1812_v46  ;;  %v1864_v12 = vpack.c.bf16 %v1857_v10, %v1856_v58  ;;  %v4638_v10 = vld [vmem:[%s6714_s7 + $0x50] sm:$0xff]  }
 0x28f   :  { %v1841_v34 = vpack.c.bf16 %v1834_v38, %v1833_v57  ;;  %v2103_v1 = vld [vmem:[#allocation4 + $0x1a] sm:$0xff]  ;;  %v2104_v56 = vld [vmem:[#allocation4 + $0x22] sm:$0xff]  ;;  %v4639_v57 = vld [vmem:[%s6714_s7 + $0x10] sm:$0xff]  }
 0x290   :  { %v1723_v24 = vld [vmem:[#allocation3 + $0x80] ss:$2 sm:$0xff]  ;;  %v1743_v22 = vld [vmem:[#allocation3 + $0x81] ss:$2 sm:$0xff]  ;;  %4398 = vmatmul.mubr.msk.bf16.gmra.mxu0 %vm1685_vm2, %v1864_v12  ;;  %v2111_v49 = vpack.c.bf16 %v2103_v1, %v2102_v42  ;;  %4470 = vmatpush3.bf16.msra.mxu1 %v4631_v40  ;;  %v4637_v46 = vld [vmem:[%s6714_s7 + $0x18] sm:$0xff]  }
 0x291   :  { %4426 = vmatmul.mubr.msk.bf16.gmra.mxu1 %vm1685_vm2, %v1841_v34  ;;  %v1754_v47 = vmax.f32 %v1723_v24, %v1743_v22  ;;  %4401 = vmatprep.mubr.msk.bf16.mxu0 %vm4812_vm1, %v6802_v48  ;;  %v4634_v8 = vld [vmem:[%s6714_s7 + $0x28] sm:$0xff]   ;;  %v4642_v38 = vld [vmem:[%s6714_s7 + $0x40] sm:$0xff]  }
 0x292   :  { %4429 = vmatprep.mubr.msk.bf16.mxu1 %vm4812_vm1, %v6802_v48  ;;  %v1859_v28 = vld [vmem:[#allocation4 + $0x39] sm:$0xff]  ;;  %4471 = vmatprep.subr.bf16.mxu1 %v6802_v48  ;;  %v4640_v58 = vld [vmem:[%s6714_s7 + $0x48] sm:$0xff]  }
 0x293   :  { %v1814_v37 = vsel %vm6090_vm12, %v1754_v47, 0.0  ;;  %v4641_v12 = vld [vmem:[%s6714_s7 + $0x8] sm:$0xff]   ;;  %v4643_v34 = vld [vmem:[%s6714_s7] sm:$0xff]  }
 0x294   :  { %1824 = vst.msk [vmem:[#allocation4 + $0x41] sm:$0xff] %vm1685_vm2, %v1814_v37  ;;  %v1725_v19 = vld [vmem:[#allocation3 + $0x90] ss:$2 sm:$0x7f]  ;;  %4472 = vmatpush3.bf16.msra.mxu1 %v4633_v63 }
 0x295   :  { %v1745_v50 = vld [vmem:[#allocation3 + $0x91] ss:$2 sm:$0x7f]  ;;  %4473 = vmatprep.subr.bf16.mxu1 %v6802_v48 }
 0x296   :  { %v1755_v29 = vmax.f32 %v1725_v19, %v1745_v50  ;;  %v1858_v7 = vld [vmem:[#allocation4 + $0x31] sm:$0xff] }
 0x297   :  { %v1835_v45 = vld [vmem:[#allocation4 + $0x30] sm:$0xff]  ;;  %v1836_v55 = vld [vmem:[#allocation4 + $0x38] sm:$0xff]  ;;  %v1865_v32 = vpack.c.bf16 %v1859_v28, %v1858_v7 }
 0x298   :  { %v1842_v0 = vpack.c.bf16 %v1836_v55, %v1835_v45  ;;  %v1815_v20 = vsel %vm6100_vm13, %v1755_v29, 0.0  ;;  %v2105_v2 = vld [vmem:[#allocation4 + $0x2a] sm:$0xff]  ;;  %v2106_v41 = vld [vmem:[#allocation4 + $0x32] sm:$0xff]  ;;  %4474 = vmatpush3.bf16.msra.mxu1 %v4635_v44 }
 0x299   :  { %1826 = vst.msk [vmem:[#allocation4 + $0x49] sm:$0x7f] %vm1825_vm15, %v1815_v20  ;;  %4402 = vmatmul.mubr.msk.bf16.gmra.mxu0 %vm1685_vm2, %v1865_v32  ;;  %v2112_v27 = vpack.c.bf16 %v2105_v2, %v2104_v56  ;;  %4475 = vmatprep.subr.bf16.mxu1 %v6802_v48 }
 0x29a   :  { %4430 = vmatmul.mubr.msk.bf16.gmra.mxu1 %vm1685_vm2, %v1842_v0  ;;  %4405 = vmatprep.mubr.msk.bf16.mxu0 %vm4812_vm1, %v6802_v48 }
 0x29b   :  { %4433 = vmatprep.mubr.msk.bf16.mxu1 %vm4812_vm1, %v6802_v48  ;;  %v1860_v6 = vld [vmem:[#allocation4 + $0x41] sm:$0xff] }
 0x29c   :  { %v1837_v3 = vld [vmem:[#allocation4 + $0x40] sm:$0xff]  ;;  %4476 = vmatpush3.bf16.msra.mxu1 %v4638_v10 }
 0x29d   :  { %v2107_v11 = vld [vmem:[#allocation4 + $0x3a] sm:$0xff]  ;;  %4477 = vmatprep.subr.bf16.mxu1 %v6802_v48 }
 0x29e   :  { %v2113_v52 = vpack.c.bf16 %v2107_v11, %v2106_v41 }
 0x2a0   :  { %v1861_v35 = vld [vmem:[#allocation4 + $0x49] sm:$0x3f]  ;;  %4478 = vmatpush3.bf16.msra.mxu1 %v4640_v58 }
 0x2a1   :  { %v1838_v26 = vld [vmem:[#allocation4 + $0x48] sm:$0x3f]  ;;  %v1866_v59 = vpack.c.bf16 %v1861_v35, %v1860_v6  ;;  %4479 = vmatprep.subr.bf16.mxu1 %v6802_v48 }
 0x2a2   :  { %v1843_v60 = vpack.c.bf16 %v1838_v26, %v1837_v3  ;;  %v2108_v15 = vld [vmem:[#allocation4 + $0x42] sm:$0xff]  ;;  %v2109_v61 = vld [vmem:[#allocation4 + $0x4a] sm:$0x3f] }
 0x2a3   :  { %4406 = vmatmul.mubr.msk.bf16.gmra.mxu0 %vm1685_vm2, %v1866_v59  ;;  %v2114_v53 = vpack.c.bf16 %v2109_v61, %v2108_v15 }
 0x2a4   :  { %4434 = vmatmul.mubr.msk.bf16.gmra.mxu1 %vm1685_vm2, %v1843_v60  ;;  %4445 = vmatprep.mubr.msk.bf16.mxu0 %vm4812_vm1, %v6802_v48 }
 0x2a5   :  { %4481 = vmatprep.mubr.msk.bf16.mxu1 %vm4812_vm1, %v6802_v48  ;;  %4480 = vmatpush3.bf16.msra.mxu1 %v4642_v38 }
 0x2a6   :  { %4537 = vmatprep.subr.bf16.mxu1 %v6802_v48 }
 0x2ab   :  { %4446 = vmatmul.mubr.msk.bf16.vlgmr.msra.gmra.mxu0 %vm1685_vm2, %v2110_v36 }
 0x2ac   :  { %4449 = vmatprep.mubr.msk.bf16.mxu0 %vm4812_vm1, %v6802_v48  ;;  %4502 = vmatpush3.bf16.msra.mxu0 %v4630_v51 }
 0x2ad   :  { %4503 = vmatprep.subr.bf16.mxu0 %v6802_v48 }
 0x2b0   :  { %4504 = vmatpush3.bf16.msra.mxu0 %v4632_v13 }
 0x2b1   :  { %4505 = vmatprep.subr.bf16.mxu0 %v6802_v48 }
 0x2b3   :  { %4450 = vmatmul.mubr.msk.bf16.gmra.mxu0 %vm1685_vm2, %v2111_v49 }
 0x2b4   :  { %4453 = vmatprep.mubr.msk.bf16.mxu0 %vm4812_vm1, %v6802_v48  ;;  %4506 = vmatpush3.bf16.msra.mxu0 %v4634_v8  ;;  %v6222_v8 = vld [vmem:[%s6715_s6] ss:$0 sm:$0xff] }
 0x2b5   :  { %4507 = vmatprep.subr.bf16.mxu0 %v6802_v48 }
 0x2b8   :  { %4508 = vmatpush3.bf16.msra.mxu0 %v4636_v62 }
 0x2b9   :  { %4509 = vmatprep.subr.bf16.mxu0 %v6802_v48 }
 0x2bb   :  { %4454 = vmatmul.mubr.msk.bf16.gmra.mxu0 %vm1685_vm2, %v2112_v27 }
 0x2bc   :  { %4457 = vmatprep.mubr.msk.bf16.mxu0 %vm4812_vm1, %v6802_v48  ;;  %4510 = vmatpush3.bf16.msra.mxu0 %v4637_v46 }
 0x2bd   :  { %4511 = vmatprep.subr.bf16.mxu0 %v6802_v48 }
 0x2c0   :  { %4512 = vmatpush3.bf16.msra.mxu0 %v4639_v57 }
 0x2c1   :  { %4513 = vmatprep.subr.bf16.mxu0 %v6802_v48 }
 0x2c3   :  { %4458 = vmatmul.mubr.msk.bf16.gmra.mxu0 %vm1685_vm2, %v2113_v52 }
 0x2c4   :  { %4461 = vmatprep.mubr.msk.bf16.mxu0 %vm4812_vm1, %v6802_v48  ;;  %4514 = vmatpush3.bf16.msra.mxu0 %v4641_v12 }
 0x2c5   :  { %4515 = vmatprep.subr.bf16.mxu0 %v6802_v48 }
 0x2c8   :  { %4516 = vmatpush3.bf16.msra.mxu0 %v4643_v34 }
 0x2cb   :  { %4462 = vmatmul.mubr.msk.bf16.gmra.mxu0 %vm1685_vm2, %v2114_v53 }
 0x2cc   :  { %4517 = vmatprep.mubr.msk.bf16.mxu0 %vm4812_vm1, %v6802_v48 }
 0x33e   :  { %v1949_v43 = vpop.f32.mrf.mxu0 }
 0x33f   :  { %v2061_v24 = vpop.f32.mrf.mxu1 }
 0x340   :  { %v4391_v22 = vpop.f32.mrf.mxu0  ;;  %v2062_v13 = vadd.f32 %v2061_v24, %v1949_v43 }
 0x341   :  { %v4419_v47 = vpop.f32.mrf.mxu1 }
 0x342   :  { %v1952_v37 = vpop.f32.mrf.mxu0 }
 0x343   :  { %v2064_v28 = vpop.f32.mrf.mxu1 }
 0x344   :  { %v4392_v19 = vpop.f32.mrf.mxu0  ;;  %v2065_v10 = vadd.f32 %v2064_v28, %v1952_v37 }
 0x345   :  { %v4420_v50 = vpop.f32.mrf.mxu1 }
 0x348   :  { %v1957_v29 = vpop.f32.mrf.mxu0 }
 0x349   :  { %v2069_v7 = vpop.f32.mrf.mxu1 }
 0x34a   :  { %v4395_v45 = vpop.f32.mrf.mxu0  ;;  %v2070_v34 = vadd.f32 %v2069_v7, %v1957_v29  ;;  %v4644_v29 = vld [vmem:[%s6714_s7 + $0xb8] sm:$0xff]  }
 0x34b   :  { %v4423_v55 = vpop.f32.mrf.mxu1 }
 0x34c   :  { %v1960_v32 = vpop.f32.mrf.mxu0 }
 0x34d   :  { %v2072_v0 = vpop.f32.mrf.mxu1 }
 0x34e   :  { %v4396_v20 = vpop.f32.mrf.mxu0  ;;  %v2073_v45 = vadd.f32 %v2072_v0, %v1960_v32 }
 0x34f   :  { %v4424_v6 = vpop.f32.mrf.mxu1 }
 0x350   :  { %v1965_v35 = vpop.f32.mrf.mxu0 }
 0x351   :  { %v2077_v3 = vpop.f32.mrf.mxu1 }
 0x352   :  { %v4399_v26 = vpop.f32.mrf.mxu0  ;;  %v2078_v0 = vadd.f32 %v2077_v3, %v1965_v35 }
 0x353   :  { %v4427_v59 = vpop.f32.mrf.mxu1 }
 0x354   :  { %v6199_v60 = vpop.f32.mrf.mxu0 }
 0x355   :  { %v6201_v39 = vpop.f32.mrf.mxu1 }
 0x356   :  { %v4400_v30 = vpop.f32.mrf.mxu0  ;;  %v2081_v3 = vadd.f32 %v6201_v39, %v6199_v60 }
 0x357   :  { %v4428_v36 = vpop.f32.mrf.mxu1  ;;  %v4645_v30 = vld [vmem:[%s6714_s7 + $0xb0] sm:$0xff]  }
 0x359   :  { %v6203_v1 = vpop.f32.mrf.mxu0 }
 0x35a   :  { %v6205_v42 = vpop.f32.mrf.mxu1 }
 0x35b   :  { %v4403_v49 = vpop.f32.mrf.mxu0 }
 0x35c   :  { %v4431_v2 = vpop.f32.mrf.mxu1 }
 0x35d   :  { %v6207_v56 = vpop.f32.mrf.mxu0 }
 0x35e   :  { %v6209_v27 = vpop.f32.mrf.mxu1 }
 0x35f   :  { %v4404_v11 = vpop.f32.mrf.mxu0 }
 0x360   :  { %v4432_v41 = vpop.f32.mrf.mxu1 }
 0x363   :  { %v6211_v52 = vpop.f32.mrf.mxu0 }
 0x364   :  { %v6213_v15 = vpop.f32.mrf.mxu1 }
 0x365   :  { %v4407_v61 = vpop.f32.mrf.mxu0 }
 0x366   :  { %v4435_v53 = vpop.f32.mrf.mxu1  ;;  %v4646_v61 = vld [vmem:[%s6714_s7 + $0xa8] sm:$0xff]  }
 0x367   :  { %v6215_v16 = vpop.f32.mrf.mxu0 }
 0x368   :  { %v6217_v17 = vpop.f32.mrf.mxu1 }
 0x369   :  { %v4408_v51 = vpop.f32.mrf.mxu0 }
 0x36a   :  { %v4436_v40 = vpop.f32.mrf.mxu1 }
 0x36b   :  { %v2197_v63 = vpop.f32.mrf.mxu0 }
 0x36c   :  { %v2236_v44 = vadd.f32 %v2197_v63, %v2062_v13  ;;  %v2086_v63 = vadd.f32 %v6205_v42, %v6203_v1 }
 0x36d   :  { %v4447_v62 = vpop.f32.mrf.mxu0 }
 0x36e   :  { %v2253_v46 = vadd.f32 %v6222_v8, %v2236_v44 }
 0x36f   :  { %v2200_v58 = vpop.f32.mrf.mxu0 }
 0x370   :  { %v2263_v57 = vmax.f32 %v2253_v46, 0.0  ;;  %v2237_v38 = vadd.f32 %v2200_v58, %v2065_v10  ;;  %v2089_v46 = vadd.f32 %v6209_v27, %v6207_v56 }
 0x371   :  { %v4448_v12 = vpop.f32.mrf.mxu0 }
 0x372   :  { %v2273_v22 = vsel %vm5957_vm4, %v2263_v57, 0.0  ;;  %v2254_v43 = vadd.f32 %v6222_v8, %v2237_v38  ;;  %vm4800_vm4 = vmpackc.low %vm6011_vm7, %vm6035_vm8 }
 0x373   :  { %2283 = vst [vmem:[#allocation5 + $0x1] sm:$0xff] %v2273_v22  ;;  %v2205_v24 = vpop.f32.mrf.mxu0 }
 0x374   :  { %v2264_v47 = vmax.f32 %v2254_v43, 0.0  ;;  %v2238_v19 = vadd.f32 %v2205_v24, %v2070_v34  ;;  %v4648_v34 = vld [vmem:[%s6714_s7 + $0x98] sm:$0xff]  }
 0x375   :  { %v4451_v50 = vpop.f32.mrf.mxu0 }
 0x376   :  { %v2274_v37 = vsel %vm5946_vm3, %v2264_v47, 0.0  ;;  %v2255_v28 = vadd.f32 %v6222_v8, %v2238_v19  ;;  %v4795_v32 = vpack.c.bf16 %v2264_v47, %v2263_v57  ;;  %vm4797_vm3 = vmpackc.low %vm5980_vm5, %vm5987_vm6  ;;  %v2094_v19 = vadd.f32 %v6213_v15, %v6211_v52 }
 0x377   :  { %2284 = vst [vmem:[#allocation5 + $0x9] sm:$0xff] %v2274_v37  ;;  %v2208_v7 = vpop.f32.mrf.mxu0 }
 0x378   :  { %v2265_v55 = vmax.f32 %v2255_v28, 0.0  ;;  %v2239_v20 = vadd.f32 %v2208_v7, %v2073_v45  ;;  %4796 = vmatmul.mubr.msk.bf16.vlgmr.msra.gmra.mxu1 %vm4794_vm0, %v4795_v32  ;;  %v2097_v28 = vadd.f32 %v6217_v17, %v6215_v16 }
 0x379   :  { %v4452_v6 = vpop.f32.mrf.mxu0  ;;  %4538 = vmatpush3.bf16.msra.mxu1 %v4644_v29  ;;  %4485 = vmatprep.mubr.msk.bf16.mxu1 %vm4812_vm1, %v6802_v48 }
 0x37a   :  { %v2275_v26 = vsel %vm5987_vm6, %v2265_v55, 0.0  ;;  %v2256_v59 = vadd.f32 %v6222_v8, %v2239_v20  ;;  %4539 = vmatprep.subr.bf16.mxu1 %v6802_v48  ;;  %v2295_v11 = vld [vmem:[#allocation5] sm:$0xff]  ;;  %vm4806_vm6 = vmpackc.low %vm4810_vm14, %vm6090_vm12 }
 0x37b   :  { %2285 = vst [vmem:[#allocation5 + $0x11] sm:$0xff] %v2275_v26  ;;  %v2213_v21 = vpop.f32.mrf.mxu0 }
 0x37c   :  { %v2266_v5 = vmax.f32 %v2256_v59, 0.0  ;;  %v2240_v36 = vadd.f32 %v2213_v21, %v2078_v0  ;;  %v4650_v0 = vld [vmem:[%s6714_s7 + $0x88] sm:$0xff]  }
 0x37d   :  { %v4455_v35 = vpop.f32.mrf.mxu0  ;;  %4540 = vmatpush3.bf16.msra.mxu1 %v4645_v30 }
 0x37e   :  { %v2276_v49 = vsel %vm5980_vm5, %v2266_v5, 0.0  ;;  %v2257_v2 = vadd.f32 %v6222_v8, %v2240_v36  ;;  %v2296_v41 = vld [vmem:[#allocation5 + $0x8] sm:$0xff]  ;;  %4541 = vmatprep.subr.bf16.mxu1 %v6802_v48  ;;  %v4798_v39 = vpack.c.bf16 %v2266_v5, %v2265_v55  ;;  %vm4803_vm5 = vmpackc.low %vm6053_vm9, %vm6075_vm10 }
 0x37f   :  { %2286 = vst [vmem:[#allocation5 + $0x19] sm:$0xff] %v2276_v49  ;;  %v2216_v53 = vpop.f32.mrf.mxu0  ;;  %v2305_v51 = vpack.c.bf16 %v2296_v41, %v2295_v11 }
 0x380   :  { %v2267_v40 = vmax.f32 %v2257_v2, 0.0  ;;  %v2241_v13 = vadd.f32 %v2216_v53, %v2081_v3  ;;  %4799 = vmatmul.mubr.msk.bf16.gmra.mxu1 %vm4797_vm3, %v4798_v39 }
 0x381   :  { %v4456_v60 = vpop.f32.mrf.mxu0  ;;  %4518 = vmatmul.mubr.bf16.vlgmr.msra.gmra.mxu0 %v2305_v51  ;;  %4542 = vmatpush3.bf16.msra.mxu1 %v4646_v61  ;;  %v2600_v61 = vld [vmem:[#allocation5 + $0x2] sm:$0xff] }
 0x382   :  { %v2277_v44 = vsel %vm6035_vm8, %v2267_v40, 0.0  ;;  %v2258_v62 = vadd.f32 %v6222_v8, %v2241_v13  ;;  %4521 = vmatprep.mubr.msk.bf16.mxu0 %vm4812_vm1, %v6802_v48  ;;  %4489 = vmatprep.mubr.msk.bf16.mxu1 %vm4812_vm1, %v6802_v48  ;;  %v2297_v38 = vld [vmem:[#allocation5 + $0x10] sm:$0xff] }
 0x383   :  { %2287 = vst [vmem:[#allocation5 + $0x21] sm:$0xff] %v2277_v44  ;;  %v2221_v25 = vpop.f32.mrf.mxu0  ;;  %4543 = vmatprep.subr.bf16.mxu1 %v6802_v48  ;;  %v2601_v4 = vld [vmem:[#allocation5 + $0xa] sm:$0xff] }
 0x384   :  { %v2268_v1 = vmax.f32 %v2258_v62, 0.0  ;;  %v2242_v42 = vadd.f32 %v2221_v25, %v2086_v63  ;;  %v2610_v53 = vpack.c.bf16 %v2601_v4, %v2600_v61 }
 0x385   :  { %v4459_v10 = vpop.f32.mrf.mxu0  ;;  %4544 = vmatpush3.bf16.msra.mxu1 %v4647_v31 }
 0x386   :  { %v2278_v58 = vsel %vm6011_vm7, %v2268_v1, 0.0  ;;  %v2259_v57 = vadd.f32 %v6222_v8, %v2242_v42  ;;  %v2298_v12 = vld [vmem:[#allocation5 + $0x18] sm:$0xff]  ;;  %4545 = vmatprep.subr.bf16.mxu1 %v6802_v48  ;;  %v4801_v27 = vpack.c.bf16 %v2268_v1, %v2267_v40 }
 0x387   :  { %2288 = vst [vmem:[#allocation5 + $0x29] sm:$0xff] %v2278_v58  ;;  %v2224_v22 = vpop.f32.mrf.mxu0  ;;  %v2306_v43 = vpack.c.bf16 %v2298_v12, %v2297_v38  ;;  %v2602_v40 = vld [vmem:[#allocation5 + $0x12] sm:$0xff] }
 0x388   :  { %v2269_v24 = vmax.f32 %v2259_v57, 0.0  ;;  %v2243_v47 = vadd.f32 %v2224_v22, %v2089_v46  ;;  %4802 = vmatmul.mubr.msk.bf16.gmra.mxu1 %vm4800_vm4, %v4801_v27 }
 0x389   :  { %v4460_v56 = vpop.f32.mrf.mxu0  ;;  %4522 = vmatmul.mubr.bf16.gmra.mxu0 %v2306_v43  ;;  %4546 = vmatpush3.bf16.msra.mxu1 %v4648_v34 }
 0x38a   :  { %v2279_v50 = vsel %vm6075_vm10, %v2269_v24, 0.0  ;;  %v2260_v45 = vadd.f32 %v6222_v8, %v2243_v47  ;;  %4525 = vmatprep.mubr.msk.bf16.mxu0 %vm4812_vm1, %v6802_v48  ;;  %4493 = vmatprep.mubr.msk.bf16.mxu1 %vm4812_vm1, %v6802_v48  ;;  %v2299_v55 = vld [vmem:[#allocation5 + $0x20] sm:$0xff] }
 0x38b   :  { %2289 = vst [vmem:[#allocation5 + $0x31] sm:$0xff] %v2279_v50  ;;  %v2229_v14 = vpop.f32.mrf.mxu0  ;;  %4547 = vmatprep.subr.bf16.mxu1 %v6802_v48  ;;  %v2603_v51 = vld [vmem:[#allocation5 + $0x1a] sm:$0xff] }
 0x38c   :  { %v2270_v52 = vmax.f32 %v2260_v45, 0.0  ;;  %v2244_v15 = vadd.f32 %v2229_v14, %v2094_v19  ;;  %v2611_v13 = vpack.c.bf16 %v2603_v51, %v2602_v40  ;;  %v4654_v40 = vld [vmem:[%s6717_s9 + $0x74] ss:$8 sps:$4 sm:$0xff]  }
 0x38d   :  { %v4463_v37 = vpop.f32.mrf.mxu0  ;;  %4548 = vmatpush3.bf16.msra.mxu1 %v4649_v9  ;;  %2929 = vmatprep.subr.bf16.mxu0 %v4654_v40 }
 0x38e   :  { %v2280_v29 = vsel %vm6053_vm9, %v2270_v52, 0.0  ;;  %v2261_v7 = vadd.f32 %v6222_v8, %v2244_v15  ;;  %v2300_v20 = vld [vmem:[#allocation5 + $0x28] sm:$0xff]  ;;  %4549 = vmatprep.subr.bf16.mxu1 %v6802_v48  ;;  %v4804_v17 = vpack.c.bf16 %v2270_v52, %v2269_v24 }
 0x38f   :  { %2290 = vst [vmem:[#allocation5 + $0x39] sm:$0xff] %v2280_v29  ;;  %v2232_v6 = vpop.f32.mrf.mxu0  ;;  %v2307_v32 = vpack.c.bf16 %v2300_v20, %v2299_v55  ;;  %v2604_v60 = vld [vmem:[#allocation5 + $0x22] sm:$0xff] }
 0x390   :  { %v2271_v26 = vmax.f32 %v2261_v7, 0.0  ;;  %v2245_v59 = vadd.f32 %v2232_v6, %v2097_v28  ;;  %4805 = vmatmul.mubr.msk.bf16.gmra.mxu1 %vm4803_vm5, %v4804_v17 }
 0x391   :  { %v4464_v16 = vpop.f32.mrf.mxu0  ;;  %4526 = vmatmul.mubr.bf16.gmra.mxu0 %v2307_v32  ;;  %4497 = vmatprep.mubr.msk.bf16.mxu1 %vm4812_vm1, %v6802_v48 }
 0x392   :  { %v2281_v30 = vsel %vm6090_vm12, %v2271_v26, 0.0  ;;  %v2262_v21 = vadd.f32 %v6222_v8, %v2245_v59  ;;  %4529 = vmatprep.mubr.msk.bf16.mxu0 %vm4812_vm1, %v6802_v48  ;;  %4550 = vmatpush3.bf16.msra.mxu1 %v4650_v0  ;;  %v2301_v36 = vld [vmem:[#allocation5 + $0x30] sm:$0xff] }
 0x393   :  { %2291 = vst [vmem:[#allocation5 + $0x41] sm:$0xff] %v2281_v30  ;;  %4551 = vmatprep.subr.bf16.mxu1 %v6802_v48  ;;  %v2605_v18 = vld [vmem:[#allocation5 + $0x2a] sm:$0xff] }
 0x394   :  { %v2272_v33 = vmax.f32 %v2262_v21, 0.0  ;;  %v2612_v39 = vpack.c.bf16 %v2605_v18, %v2604_v60  ;;  %v4655_v60 = vld [vmem:[%s6717_s9 + $0x30] ss:$8 sps:$4 sm:$0xff]  }
 0x396   :  { %v2282_v5 = vsel %vm6100_vm13, %v2272_v33, 0.0  ;;  %v2302_v8 = vld [vmem:[#allocation5 + $0x38] sm:$0xff]  ;;  %4552 = vmatpush3.bf16.msra.mxu1 %v4651_v23 }
 0x397   :  { %2292 = vst [vmem:[#allocation5 + $0x49] sm:$0x3f] %v2282_v5  ;;  %v2308_v35 = vpack.c.bf16 %v2302_v8, %v2301_v36  ;;  %v2606_v44 = vld [vmem:[#allocation5 + $0x32] sm:$0xff] }
 0x399   :  { %4530 = vmatmul.mubr.bf16.gmra.mxu0 %v2308_v35  ;;  %v6365_v35 = vld [vmem:[%s6716_s8] ss:$0 sm:$0xff] }
 0x39a   :  { %4533 = vmatprep.mubr.msk.bf16.mxu0 %vm4812_vm1, %v6802_v48  ;;  %v2303_v49 = vld [vmem:[#allocation5 + $0x40] sm:$0xff] }
 0x39b   :  { %v2607_v63 = vld [vmem:[#allocation5 + $0x3a] sm:$0xff] }
 0x39c   :  { %v2613_v62 = vpack.c.bf16 %v2607_v63, %v2606_v44 }
 0x39e   :  { %v2335_v3 = vld [vmem:[#allocation5 + $0x49] sm:$0x3f] }
 0x39f   :  { %v2304_v2 = vld [vmem:[#allocation5 + $0x48] sm:$0x3f]  ;;  %v4807_v41 = vpack.c.bf16 %v2335_v3, %v2271_v26 }
 0x3a0   :  { %v2309_v11 = vpack.c.bf16 %v2304_v2, %v2303_v49  ;;  %v2608_v31 = vld [vmem:[#allocation5 + $0x42] sm:$0xff]  ;;  %v2609_v25 = vld [vmem:[#allocation5 + $0x4a] sm:$0x3f] }
 0x3a1   :  { %4808 = vmatmul.mubr.msk.bf16.gmra.mxu1 %vm4806_vm6, %v4807_v41  ;;  %v2614_v1 = vpack.c.bf16 %v2609_v25, %v2608_v31 }
 0x3a2   :  { %4534 = vmatmul.mubr.bf16.gmra.mxu0 %v2309_v11  ;;  %4553 = vmatprep.mubr.msk.bf16.mxu1 %vm4812_vm1, %v6802_v48 }
 0x3a9   :  { %4554 = vmatmul.mubr.bf16.vlgmr.msra.gmra.mxu1 %v2610_v53  ;;  %v4652_v53 = vld [vmem:[%s6717_s9 + $0x70] ss:$8 sps:$4 sm:$0xff]  }
 0x3aa   :  { %4557 = vmatprep.mubr.msk.bf16.mxu1 %vm4812_vm1, %v6802_v48  ;;  %2930 = vmatpush1.bf16.msra.mxu0 %v4652_v53  ;;  %v4672_v53 = vld [vmem:[%s6717_s9 + $0x44] ss:$8 sps:$4 sm:$0xff]  }
 0x3b1   :  { %4558 = vmatmul.mubr.bf16.gmra.mxu1 %v2611_v13 }
 0x3b2   :  { %4561 = vmatprep.mubr.msk.bf16.mxu1 %vm4812_vm1, %v6802_v48 }
 0x3b9   :  { %4562 = vmatmul.mubr.bf16.gmra.mxu1 %v2612_v39  ;;  %v4657_v39 = vld [vmem:[%s6717_s9 + $0x34] ss:$8 sps:$4 sm:$0xff]  }
 0x3ba   :  { %4565 = vmatprep.mubr.msk.bf16.mxu1 %vm4812_vm1, %v6802_v48  ;;  %3013 = vmatprep.subr.bf16.mxu1 %v4657_v39 }
 0x3bb   :  { %3014 = vmatpush1.bf16.msra.mxu1 %v4655_v60  ;;  %v4678_v60 = vld [vmem:[%s6717_s9 + $0xb4] ss:$8 sps:$4 sm:$0xff]  }
 0x3c1   :  { %4566 = vmatmul.mubr.bf16.gmra.mxu1 %v2613_v62 }
 0x3c2   :  { %4569 = vmatprep.mubr.msk.bf16.mxu1 %vm4812_vm1, %v6802_v48 }
 0x3c9   :  { %4570 = vmatmul.mubr.bf16.gmra.mxu1 %v2614_v1 }
 0x438   :  { %v2440_v42 = vpop.f32.mrf.mxu1 }
 0x43a   :  { %v4483_v10 = vpop.f32.mrf.mxu1 }
 0x43c   :  { %v2443_v46 = vpop.f32.mrf.mxu1 }
 0x43e   :  { %v4484_v58 = vpop.f32.mrf.mxu1 }
 0x440   :  { %v2448_v38 = vpop.f32.mrf.mxu1 }
 0x441   :  { %v2561_v57 = vpop.f32.mrf.mxu0 }
 0x442   :  { %v4487_v34 = vpop.f32.mrf.mxu1  ;;  %v2562_v36 = vadd.f32 %v2561_v57, %v2440_v42  ;;  %v4658_v57 = vld [vmem:[%s6717_s9 + $0x60] ss:$8 sps:$4 sm:$0xff]  }
 0x443   :  { %v4519_v12 = vpop.f32.mrf.mxu0 }
 0x444   :  { %v6340_v43 = vpop.f32.mrf.mxu1 }
 0x445   :  { %v2564_v22 = vpop.f32.mrf.mxu0 }
 0x446   :  { %v4488_v47 = vpop.f32.mrf.mxu1  ;;  %v2565_v2 = vadd.f32 %v2564_v22, %v2443_v46 }
 0x447   :  { %v4520_v24 = vpop.f32.mrf.mxu0 }
 0x448   :  { %v2456_v27 = vpop.f32.mrf.mxu1 }
 0x449   :  { %v2569_v56 = vpop.f32.mrf.mxu0 }
 0x44a   :  { %v4491_v19 = vpop.f32.mrf.mxu1  ;;  %v2570_v13 = vadd.f32 %v2569_v56, %v2448_v38  ;;  %v4660_v38 = vld [vmem:[%s6717_s9 + $0x64] ss:$8 sps:$4 sm:$0xff]   ;;  %v4661_v56 = vld [vmem:[%s6717_s9 + $0x20] ss:$8 sps:$4 sm:$0xff]  }
 0x44b   :  { %v4523_v48 = vpop.f32.mrf.mxu0  ;;  %2931 = vmatprep.subr.bf16.mxu0 %v4660_v38 }
 0x44c   :  { %v6344_v45 = vpop.f32.mrf.mxu1  ;;  %2932 = vmatpush1.bf16.msra.mxu0 %v4658_v57 }
 0x44d   :  { %v6342_v50 = vpop.f32.mrf.mxu0 }
 0x44e   :  { %v4492_v14 = vpop.f32.mrf.mxu1 }
 0x44f   :  { %v4524_v9 = vpop.f32.mrf.mxu0 }
 0x450   :  { %v6346_v15 = vpop.f32.mrf.mxu1 }
 0x451   :  { %v2577_v52 = vpop.f32.mrf.mxu0 }
 0x452   :  { %v4495_v28 = vpop.f32.mrf.mxu1  ;;  %v2578_v46 = vadd.f32 %v2577_v52, %v2456_v27  ;;  %v4663_v27 = vld [vmem:[%s6717_s9 + $0x24] ss:$8 sps:$4 sm:$0xff]  }
 0x453   :  { %v4527_v37 = vpop.f32.mrf.mxu0  ;;  %3015 = vmatprep.subr.bf16.mxu1 %v4663_v27 }
 0x454   :  { %v6348_v7 = vpop.f32.mrf.mxu1  ;;  %3016 = vmatpush1.bf16.msra.mxu1 %v4661_v56 }
 0x455   :  { %v2580_v29 = vpop.f32.mrf.mxu0 }
 0x456   :  { %v4496_v20 = vpop.f32.mrf.mxu1  ;;  %v2581_v22 = vadd.f32 %v2580_v29, %v6344_v45 }
 0x457   :  { %v4528_v55 = vpop.f32.mrf.mxu0 }
 0x458   :  { %v2573_v55 = vadd.f32 %v6342_v50, %v6340_v43 }
 0x459   :  { %v6350_v6 = vpop.f32.mrf.mxu0 }
 0x45a   :  { %v2586_v45 = vadd.f32 %v6350_v6, %v6346_v15 }
 0x45b   :  { %v4531_v32 = vpop.f32.mrf.mxu0 }
 0x45c   :  { %v4664_v32 = vld [vmem:[%s6717_s9 + $0x50] ss:$8 sps:$4 sm:$0xff]  }
 0x45d   :  { %v6352_v0 = vpop.f32.mrf.mxu0 }
 0x45e   :  { %v2589_v20 = vadd.f32 %v6352_v0, %v6348_v7  ;;  %v4667_v0 = vld [vmem:[%s6717_s9 + $0x10] ss:$8 sps:$4 sm:$0xff]  }
 0x45f   :  { %v4532_v26 = vpop.f32.mrf.mxu0 }
 0x460   :  { %v4666_v26 = vld [vmem:[%s6717_s9 + $0x54] ss:$8 sps:$4 sm:$0xff]  }
 0x461   :  { %v6354_v59 = vpop.f32.mrf.mxu1  ;;  %2933 = vmatprep.subr.bf16.mxu0 %v4666_v26  ;;  %v4690_v26 = vld [vmem:[%s6717_s9 + $0xe4] ss:$8 sps:$4 sm:$0xff]  }
 0x462   :  { %v6356_v16 = vpop.f32.mrf.mxu0  ;;  %2934 = vmatpush1.bf16.msra.mxu0 %v4664_v32  ;;  %v4687_v32 = vld [vmem:[%s6717_s9 + $0x94] ss:$8 sps:$4 sm:$0xff]  }
 0x463   :  { %v4499_v17 = vpop.f32.mrf.mxu1  ;;  %2935 = vmatprep.subr.bf16.mxu0 %v4672_v53 }
 0x464   :  { %v4535_v30 = vpop.f32.mrf.mxu0  ;;  %v4669_v17 = vld [vmem:[%s6717_s9 + $0x14] ss:$8 sps:$4 sm:$0xff]  }
 0x465   :  { %v6358_v21 = vpop.f32.mrf.mxu1  ;;  %3017 = vmatprep.subr.bf16.mxu1 %v4669_v17 }
 0x466   :  { %v6360_v23 = vpop.f32.mrf.mxu0  ;;  %3018 = vmatpush1.bf16.msra.mxu1 %v4667_v0  ;;  %v4696_v0 = vld [vmem:[%s6717_s9 + $0xd4] ss:$8 sps:$4 sm:$0xff]  }
 0x467   :  { %v4500_v33 = vpop.f32.mrf.mxu1 }
 0x468   :  { %v4536_v5 = vpop.f32.mrf.mxu0 }
 0x469   :  { %v2714_v8 = vpop.f32.mrf.mxu1 }
 0x46a   :  { %v2753_v3 = vadd.f32 %v2714_v8, %v2562_v36 }
 0x46b   :  { %v4555_v49 = vpop.f32.mrf.mxu1 }
 0x46c   :  { %v6368_v11 = vadd.f32 %v6365_v35, %v2753_v3  ;;  %v2594_v49 = vadd.f32 %v6356_v16, %v6354_v59  ;;  %v4673_v59 = vld [vmem:[%s6717_s9] ss:$8 sps:$4 sm:$0xff]   ;;  %v4675_v16 = vld [vmem:[%s6717_s9 + $0x4] ss:$8 sps:$4 sm:$0xff]  }
 0x46d   :  { %v2717_v41 = vpop.f32.mrf.mxu1  ;;  %3019 = vmatprep.subr.bf16.mxu1 %v4675_v16  ;;  %v4708_v16 = vld [vmem:[%s6718_s11 + $0x54] ss:$8 sps:$4 sm:$0xff]  }
 0x46e   :  { %v2780_v4 = vmax.f32 %v6368_v11, 0.0  ;;  %v2754_v61 = vadd.f32 %v2717_v41, %v2565_v2  ;;  %v2597_v2 = vadd.f32 %v6360_v23, %v6358_v21  ;;  %v4813_v23 = vmov 0   ;;  %3020 = vmatpush1.bf16.msra.mxu1 %v4673_v59 }
 0x46f   :  { %v4556_v51 = vpop.f32.mrf.mxu1  ;;  %2953 = vmatprep.mubr.bf16.mxu0 %v4813_v23  ;;  %3037 = vmatprep.mubr.bf16.mxu1 %v4813_v23 }
 0x470   :  { %v6378_v18 = vadd.f32 %v6365_v35, %v2754_v61  ;;  %2800 = vrot.lane.b32.xlu0 %v2780_v4, %s4811_s4  ;;  %v4670_v61 = vld [vmem:[%s6717_s9 + $0x40] ss:$8 sps:$4 sm:$0xff]  }
 0x471   :  { %v2722_v63 = vpop.f32.mrf.mxu1  ;;  %2936 = vmatpush1.bf16.msra.mxu0 %v4670_v61  ;;  %v4700_v61 = vld [vmem:[%s6718_s11 + $0x70] ss:$8 sps:$4 sm:$0xff]  }
 0x472   :  { %v2781_v44 = vmax.f32 %v6378_v18, 0.0  ;;  %v2755_v62 = vadd.f32 %v2722_v63, %v2570_v13  ;;  %3112 = vmatprep.subr.bf16.mxu0 %v4678_v60  ;;  %v4709_v60 = vld [vmem:[%s6718_s11 + $0x40] ss:$8 sps:$4 sm:$0xff]  }
 0x473   :  { %v4559_v31 = vpop.f32.mrf.mxu1 }
 0x474   :  { %v6391_v25 = vadd.f32 %v6365_v35, %v2755_v62  ;;  %2802 = vrot.lane.b32.xlu1 %v2781_v44, %s4811_s4 }
 0x475   :  { %v2725_v1 = vpop.f32.mrf.mxu1 }
 0x476   :  { %v2782_v42 = vmax.f32 %v6391_v25, 0.0  ;;  %v2756_v43 = vadd.f32 %v2725_v1, %v2573_v55  ;;  %v4684_v1 = vld [vmem:[%s6717_s9 + $0xf4] ss:$8 sps:$4 sm:$0xff]  }
 0x477   :  { %v4560_v10 = vpop.f32.mrf.mxu1  ;;  %3213 = vmatprep.subr.bf16.mxu1 %v4684_v1  ;;  %v4720_v1 = vld [vmem:[%s6718_s11 + $0x14] ss:$8 sps:$4 sm:$0xff]  }
 0x478   :  { %2804 = vrot.lane.b32.xlu0 %v2782_v42, %s4811_s4  ;;  %v2773_v36 = vadd.f32 %v6365_v35, %v2756_v43  ;;  %v4685_v43 = vld [vmem:[%s6717_s9 + $0x90] ss:$8 sps:$4 sm:$0xff]  }
 0x479   :  { %v2730_v58 = vpop.f32.mrf.mxu1 }
 0x47a   :  { %v2757_v12 = vadd.f32 %v2730_v58, %v2578_v46  ;;  %v2783_v51 = vmax.f32 %v2773_v36, 0.0 }
 0x47b   :  { %v4563_v34 = vpop.f32.mrf.mxu1 }
 0x47c   :  { %v6408_v24 = vadd.f32 %v6365_v35, %v2757_v12 }
 0x47d   :  { %v2733_v47 = vpop.f32.mrf.mxu1 }
 0x47e   :  { %v2784_v48 = vmax.f32 %v6408_v24, 0.0  ;;  %v2758_v19 = vadd.f32 %v2733_v47, %v2581_v22 }
 0x47f   :  { %v4564_v9 = vpop.f32.mrf.mxu1 }
 0x480   :  { %v6420_v14 = vadd.f32 %v6365_v35, %v2758_v19  ;;  %2808 = vrot.lane.b32.xlu1 %v2784_v48, %s4811_s4 }
 0x481   :  { %v2738_v52 = vpop.f32.mrf.mxu1 }
 0x482   :  { %v2785_v37 = vmax.f32 %v6420_v14, 0.0  ;;  %v2759_v28 = vadd.f32 %v2738_v52, %v2586_v45  ;;  %v4676_v14 = vld [vmem:[%s6717_s9 + $0xb0] ss:$8 sps:$4 sm:$0xff]  }
 0x483   :  { %v4567_v29 = vpop.f32.mrf.mxu1 }
 0x484   :  { %v6431_v15 = vadd.f32 %v6365_v35, %v2759_v28  ;;  %2810 = vrot.lane.b32.xlu0 %v2785_v37, %s4811_s4 }
 0x485   :  { %v2741_v6 = vpop.f32.mrf.mxu1 }
 0x486   :  { %v2786_v50 = vmax.f32 %v6431_v15, 0.0  ;;  %v2760_v7 = vadd.f32 %v2741_v6, %v2589_v20  ;;  %v4679_v20 = vld [vmem:[%s6717_s9 + $0xa0] ss:$8 sps:$4 sm:$0xff]   ;;  %v4682_v15 = vld [vmem:[%s6717_s9 + $0xf0] ss:$8 sps:$4 sm:$0xff]  }
 0x487   :  { %v4568_v30 = vpop.f32.mrf.mxu1 }
 0x488   :  { %v2777_v33 = vadd.f32 %v6365_v35, %v2760_v7  ;;  %2812 = vrot.lane.b32.xlu1 %v2786_v50, %s4811_s4  ;;  %v4693_v7 = vld [vmem:[%s6717_s9 + $0x84] ss:$8 sps:$4 sm:$0xff]  }
 0x489   :  { %v2746_v5 = vpop.f32.mrf.mxu1 }
 0x48a   :  { %v2787_v8 = vmax.f32 %v2777_v33, 0.0  ;;  %v2761_v40 = vadd.f32 %v2746_v5, %v2594_v49  ;;  %v4691_v33 = vld [vmem:[%s6717_s9 + $0x80] ss:$8 sps:$4 sm:$0xff]   ;;  %v4694_v5 = vld [vmem:[%s6717_s9 + $0xd0] ss:$8 sps:$4 sm:$0xff]  }
 0x48b   :  { %v4571_v3 = vpop.f32.mrf.mxu1 }
 0x48c   :  { %2814 = vrot.lane.b32.xlu0 %v2787_v8, %s4811_s4  ;;  %v2778_v63 = vadd.f32 %v6365_v35, %v2761_v40  ;;  %v4702_v3 = vld [vmem:[%s6718_s11 + $0x74] ss:$8 sps:$4 sm:$0xff]   ;;  %v4705_v40 = vld [vmem:[%s6718_s11 + $0x64] ss:$8 sps:$4 sm:$0xff]  }
 0x48d   :  { %v2749_v41 = vpop.f32.mrf.mxu1 }
 0x48e   :  { %v2762_v13 = vadd.f32 %v2749_v41, %v2597_v2  ;;  %v2788_v31 = vmax.f32 %v2778_v63, 0.0  ;;  %v4697_v41 = vld [vmem:[%s6717_s9 + $0xc0] ss:$8 sps:$4 sm:$0xff]   ;;  %v4712_v63 = vld [vmem:[%s6718_s11 + $0x30] ss:$8 sps:$4 sm:$0xff]  }
 0x48f   :  { %v4572_v21 = vpop.f32.mrf.mxu1 }
 0x490   :  { %v2779_v39 = vadd.f32 %v6365_v35, %v2762_v13  ;;  %2806 = vrot.lane.b32.xlu0 %v2783_v51, %s4811_s4  ;;  %v4703_v13 = vld [vmem:[%s6718_s11 + $0x60] ss:$8 sps:$4 sm:$0xff]   ;;  %v4706_v21 = vld [vmem:[%s6718_s11 + $0x50] ss:$8 sps:$4 sm:$0xff]  }
 0x492   :  { %v2789_v62 = vmax.f32 %v2779_v39, 0.0  ;;  %v4714_v39 = vld [vmem:[%s6718_s11 + $0x34] ss:$8 sps:$4 sm:$0xff]  }
 0x494   :  { %2818 = vrot.lane.b32.xlu1 %v2789_v62, %s4811_s4 }
 0x498   :  { %2816 = vrot.lane.b32.xlu1 %v2788_v31, %s4811_s4 }
 0x4e2   :  { %v2801_v10 = vpop.permute.xlu0 %2800 }
 0x4e3   :  { %v2830_v46 = vmax.f32 %v2780_v4, %v2801_v10  ;;  %v4718_v10 = vld [vmem:[%s6718_s11 + $0x10] ss:$8 sps:$4 sm:$0xff]  }
 0x4e5   :  { %2840 = vst.msk [vmem:[#allocation6] sm:$0xff] %vm1685_vm2, %v2830_v46  ;;  %v4723_v46 = vld [vmem:[%s6718_s11 + $0x4] ss:$8 sps:$4 sm:$0xff]  }
 0x4e6   :  { %v2803_v35 = vpop.permute.xlu1 %2802 }
 0x4e7   :  { %v2831_v58 = vmax.f32 %v2781_v44, %v2803_v35  ;;  %v4721_v35 = vld [vmem:[%s6718_s11] ss:$8 sps:$4 sm:$0xff]  }
 0x4e9   :  { %2841 = vst.msk [vmem:[#allocation6 + $0x8] sm:$0xff] %vm1685_vm2, %v2831_v58  ;;  %v4726_v58 = vld [vmem:[%s6718_s11 + $0xf4] ss:$8 sps:$4 sm:$0xff]  }
 0x4ea   :  { %v2805_v57 = vpop.permute.xlu0 %2804 }
 0x4eb   :  { %v2832_v38 = vmax.f32 %v2782_v42, %v2805_v57  ;;  %v4724_v57 = vld [vmem:[%s6718_s11 + $0xf0] ss:$8 sps:$4 sm:$0xff]  }
 0x4ed   :  { %2842 = vst.msk [vmem:[#allocation6 + $0x10] sm:$0xff] %vm1685_vm2, %v2832_v38  ;;  %v4727_v38 = vld [vmem:[%s6718_s11 + $0xe0] ss:$8 sps:$4 sm:$0xff]  }
 0x4f2   :  { %v2809_v12 = vpop.permute.xlu1 %2808 }
 0x4f3   :  { %v2834_v34 = vmax.f32 %v2784_v48, %v2809_v12  ;;  %v4729_v12 = vld [vmem:[%s6718_s11 + $0xe4] ss:$8 sps:$4 sm:$0xff]  }
 0x4f5   :  { %2844 = vst.msk [vmem:[#allocation6 + $0x20] sm:$0xff] %vm1685_vm2, %v2834_v34  ;;  %v4730_v34 = vld [vmem:[%s6718_s11 + $0xd0] ss:$8 sps:$4 sm:$0xff]  }
 0x4f6   :  { %v2811_v11 = vpop.permute.xlu0 %2810 }
 0x4f7   :  { %v2835_v4 = vmax.f32 %v2785_v37, %v2811_v11  ;;  %v4681_v37 = vld [vmem:[%s6717_s9 + $0xa4] ss:$8 sps:$4 sm:$0xff]   ;;  %v4732_v11 = vld [vmem:[%s6718_s11 + $0xd4] ss:$8 sps:$4 sm:$0xff]  }
 0x4f9   :  { %2845 = vst.msk [vmem:[#allocation6 + $0x28] sm:$0xff] %vm1685_vm2, %v2835_v4  ;;  %v4733_v4 = vld [vmem:[%s6718_s11 + $0xc0] ss:$8 sps:$4 sm:$0xff]  }
 0x4fa   :  { %v2813_v18 = vpop.permute.xlu1 %2812 }
 0x4fb   :  { %v2836_v44 = vmax.f32 %v2786_v50, %v2813_v18  ;;  %v4688_v50 = vld [vmem:[%s6717_s9 + $0xe0] ss:$8 sps:$4 sm:$0xff]   ;;  %v4735_v18 = vld [vmem:[%s6718_s11 + $0xc4] ss:$8 sps:$4 sm:$0xff]  }
 0x4fd   :  { %2846 = vst.msk [vmem:[#allocation6 + $0x30] sm:$0xff] %vm1685_vm2, %v2836_v44  ;;  %v4736_v44 = vld [vmem:[%s6718_s11 + $0xb0] ss:$8 sps:$4 sm:$0xff]  }
 0x4fe   :  { %v2815_v25 = vpop.permute.xlu0 %2814 }
 0x4ff   :  { %v2837_v42 = vmax.f32 %v2787_v8, %v2815_v25  ;;  %v4699_v8 = vld [vmem:[%s6717_s9 + $0xc4] ss:$8 sps:$4 sm:$0xff]   ;;  %v4738_v25 = vld [vmem:[%s6718_s11 + $0xb4] ss:$8 sps:$4 sm:$0xff]  }
 0x501   :  { %2847 = vst.msk [vmem:[#allocation6 + $0x38] sm:$0xff] %vm1685_vm2, %v2837_v42  ;;  %v4741_v42 = vld [vmem:[%s6718_s11 + $0xa4] ss:$8 sps:$4 sm:$0xff]  }
 0x502   :  { %v2807_v22 = vpop.permute.xlu0 %2806 }
 0x503   :  { %v2833_v47 = vmax.f32 %v2783_v51, %v2807_v22  ;;  %v4739_v22 = vld [vmem:[%s6718_s11 + $0xa0] ss:$8 sps:$4 sm:$0xff]  }
 0x505   :  { %2843 = vst.msk [vmem:[#allocation6 + $0x18] sm:$0xff] %vm1685_vm2, %v2833_v47  ;;  %v4744_v47 = vld [vmem:[%s6718_s11 + $0x94] ss:$8 sps:$4 sm:$0xff]  }
 0x506   :  { %v2819_v24 = vpop.permute.xlu1 %2818 }
 0x507   :  { %v2839_v56 = vmax.f32 %v2789_v62, %v2819_v24  ;;  %v4717_v62 = vld [vmem:[%s6718_s11 + $0x24] ss:$8 sps:$4 sm:$0xff]   ;;  %v4742_v24 = vld [vmem:[%s6718_s11 + $0x90] ss:$8 sps:$4 sm:$0xff]  }
 0x509   :  { %2849 = vst.msk [vmem:[#allocation6 + $0x48] sm:$0x3f] %vm1705_vm11, %v2839_v56  ;;  %v4745_v56 = vld [vmem:[%s6718_s11 + $0x80] ss:$8 sps:$4 sm:$0xff]  }
 0x50a   :  { %v2817_v27 = vpop.permute.xlu1 %2816 }
 0x50b   :  { %v2838_v48 = vmax.f32 %v2788_v31, %v2817_v27  ;;  %v4715_v31 = vld [vmem:[%s6718_s11 + $0x20] ss:$8 sps:$4 sm:$0xff]   ;;  %v4747_v27 = vld [vmem:[%s6718_s11 + $0x84] ss:$8 sps:$4 sm:$0xff]  }
 0x50d   :  { %2848 = vst.msk [vmem:[#allocation6 + $0x40] sm:$0xff] %vm1685_vm2, %v2838_v48  ;;  %v4748_v48 = vld [vmem:[%s6719_s13 + $0x78] sm:$0xff]  }
 0x510   :  { %v2864_v19 = vld [vmem:[#allocation6 + $0x2] ss:$10 sm:$0xff]  ;;  %v2866_v9 = vld [vmem:[#allocation6 + $0x3] ss:$10 sm:$0xff] }
 0x511   :  { %v2867_v45 = vmax.f32 %v2864_v19, %v2866_v9  ;;  %v4749_v19 = vld [vmem:[%s6719_s13 + $0x38] sm:$0xff]   ;;  %v4750_v9 = vld [vmem:[%s6719_s13 + $0x70] sm:$0xff]  }
 0x513   :  { %v2868_v52 = vpack.c.bf16 %v2867_v45, %v2867_v45  ;;  %v4751_v45 = vld [vmem:[%s6719_s13 + $0x30] sm:$0xff]  }
 0x514   :  { %v2850_v28 = vld [vmem:[#allocation6] ss:$10 sm:$0xff]  ;;  %v2852_v29 = vld [vmem:[#allocation6 + $0x1] ss:$10 sm:$0xff] }
 0x515   :  { %3921 = vmatmul.mubr.msk.bf16.vlgmr.msra.gmra.mxu0 %vm1685_vm2, %v2868_v52  ;;  %v2853_v55 = vmax.f32 %v2850_v28, %v2852_v29  ;;  %v3047_v17 = vld [vmem:[#allocation6 + $0x4] ss:$10 sm:$0xff]  ;;  %v3049_v30 = vld [vmem:[#allocation6 + $0x5] ss:$10 sm:$0xff] }
 0x516   :  { %3113 = vmatpush1.bf16.msra.mxu0 %v4676_v14  ;;  %3136 = vmatprep.mubr.bf16.mxu0 %v4813_v23  ;;  %v3050_v36 = vmax.f32 %v3047_v17, %v3049_v30  ;;  %v3148_v49 = vld [vmem:[#allocation6 + $0x6] ss:$10 sm:$0xff]  ;;  %v3150_v2 = vld [vmem:[#allocation6 + $0x7] ss:$10 sm:$0xff]  ;;  %v3252_v30 = vsub.s32 0, %v5190_v54 }
 0x517   :  { %3114 = vmatprep.subr.bf16.mxu0 %v4681_v37  ;;  %v2854_v6 = vpack.c.bf16 %v2853_v55, %v2853_v55  ;;  %v3151_v51 = vmax.f32 %v3148_v49, %v3150_v2  ;;  %v4752_v14 = vld [vmem:[%s6719_s13 + $0x68] sm:$0xff]   ;;  %v4754_v37 = vld [vmem:[%s6719_s13 + $0x60] sm:$0xff]   ;;  %v4756_v29 = vld [vmem:[%s6719_s13 + $0x58] sm:$0xff]  }
 0x518   :  { %v3051_v53 = vpack.c.bf16 %v3050_v36, %v3050_v36  ;;  %v4753_v52 = vld [vmem:[%s6719_s13 + $0x28] sm:$0xff]   ;;  %v4755_v28 = vld [vmem:[%s6719_s13 + $0x20] sm:$0xff]   ;;  %v4757_v55 = vld [vmem:[%s6719_s13 + $0x18] sm:$0xff]  }
 0x519   :  { %3930 = vmatmul.mubr.msk.bf16.vlgmr.msra.gmra.mxu1 %vm1685_vm2, %v2854_v6  ;;  %v3152_v59 = vpack.c.bf16 %v3151_v51, %v3151_v51 }
 0x51a   :  { %3115 = vmatpush1.bf16.msra.mxu0 %v4679_v20  ;;  %3214 = vmatpush1.bf16.msra.mxu1 %v4682_v15  ;;  %v4758_v20 = vld [vmem:[%s6719_s13 + $0x50] sm:$0xff]  }
 0x51b   :  { %3116 = vmatprep.subr.bf16.mxu0 %v4687_v32  ;;  %3215 = vmatprep.subr.bf16.mxu1 %v4690_v26  ;;  %v4759_v15 = vld [vmem:[%s6719_s13 + $0x10] sm:$0xff]  }
 0x51c   :  { %3237 = vmatprep.mubr.bf16.mxu1 %v4813_v23  ;;  %v4711_v23 = vld [vmem:[%s6718_s11 + $0x44] ss:$8 sps:$4 sm:$0xff]  }
 0x51e   :  { %3117 = vmatpush1.bf16.msra.mxu0 %v4685_v43  ;;  %3216 = vmatpush1.bf16.msra.mxu1 %v4688_v50 }
 0x51f   :  { %3118 = vmatprep.subr.bf16.mxu0 %v4693_v7  ;;  %3217 = vmatprep.subr.bf16.mxu1 %v4696_v0 }
 0x522   :  { %3119 = vmatpush1.bf16.msra.mxu0 %v4691_v33  ;;  %3218 = vmatpush1.bf16.msra.mxu1 %v4694_v5  ;;  %v3248_v5 = vld [vmem:[%s6720_s10] sm:$0x3] }
 0x523   :  { %3219 = vmatprep.subr.bf16.mxu1 %v4699_v8  ;;  %3470 = vmatprep.subr.bf16.mxu0 %v4702_v3  ;;  %v3256_v8 = vsub.s32 1, %v5190_v54 }
 0x525   :  { %3947 = vmatmul.mubr.msk.bf16.vlgmr.msra.gmra.mxu0 %vm1685_vm2, %v3051_v53 }
 0x526   :  { %3220 = vmatpush1.bf16.msra.mxu1 %v4697_v41  ;;  %3471 = vmatpush1.bf16.msra.mxu0 %v4700_v61  ;;  %v3253_v41 = vrot.slane %v3248_v5, %v3252_v30 }
 0x527   :  { %3472 = vmatprep.subr.bf16.mxu0 %v4705_v40  ;;  %4173 = vmatprep.subr.bf16.mxu1 %v4748_v48 }
 0x529   :  { %3964 = vmatmul.mubr.msk.bf16.vlgmr.msra.gmra.mxu1 %vm1685_vm2, %v3152_v59 }
 0x52a   :  { %3473 = vmatpush1.bf16.msra.mxu0 %v4703_v13  ;;  %4174 = vmatpush3.bf16.msra.mxu1 %v4749_v19  ;;  %v3257_v13 = vrot.slane %v3248_v5, %v3256_v8 }
 0x52b   :  { %3474 = vmatprep.subr.bf16.mxu0 %v4708_v16  ;;  %4175 = vmatprep.subr.bf16.mxu1 %v4750_v9 }
 0x52e   :  { %3475 = vmatpush1.bf16.msra.mxu0 %v4706_v21  ;;  %4176 = vmatpush3.bf16.msra.mxu1 %v4751_v45 }
 0x52f   :  { %3476 = vmatprep.subr.bf16.mxu0 %v4711_v23  ;;  %4177 = vmatprep.subr.bf16.mxu1 %v4752_v14 }
 0x532   :  { %3477 = vmatpush1.bf16.msra.mxu0 %v4709_v60  ;;  %4178 = vmatpush3.bf16.msra.mxu1 %v4753_v52 }
 0x533   :  { %3478 = vmatprep.subr.bf16.mxu0 %v4714_v39  ;;  %4179 = vmatprep.subr.bf16.mxu1 %v4754_v37 }
 0x536   :  { %3479 = vmatpush1.bf16.msra.mxu0 %v4712_v63  ;;  %4180 = vmatpush3.bf16.msra.mxu1 %v4755_v28 }
 0x537   :  { %3480 = vmatprep.subr.bf16.mxu0 %v4717_v62  ;;  %4181 = vmatprep.subr.bf16.mxu1 %v4756_v29 }
 0x53a   :  { %3481 = vmatpush1.bf16.msra.mxu0 %v4715_v31  ;;  %4182 = vmatpush3.bf16.msra.mxu1 %v4757_v55 }
 0x53b   :  { %3482 = vmatprep.subr.bf16.mxu0 %v4720_v1  ;;  %4183 = vmatprep.subr.bf16.mxu1 %v4758_v20 }
 0x53e   :  { %3483 = vmatpush1.bf16.msra.mxu0 %v4718_v10  ;;  %4184 = vmatpush3.bf16.msra.mxu1 %v4759_v15  ;;  %v4760_v10 = vld [vmem:[%s6719_s13 + $0x48] sm:$0xff]  }
 0x53f   :  { %3484 = vmatprep.subr.bf16.mxu0 %v4723_v46  ;;  %v4761_v46 = vld [vmem:[%s6719_s13 + $0x8] sm:$0xff]   ;;  %4185 = vmatprep.subr.bf16.mxu1 %v4760_v10 }
 0x542   :  { %3485 = vmatpush1.bf16.msra.mxu0 %v4721_v35  ;;  %4186 = vmatpush3.bf16.msra.mxu1 %v4761_v46  ;;  %v4762_v35 = vld [vmem:[%s6719_s13 + $0x40] sm:$0xff]  }
 0x543   :  { %3486 = vmatprep.subr.bf16.mxu0 %v4726_v58  ;;  %v4763_v58 = vld [vmem:[%s6719_s13] sm:$0xff]   ;;  %4187 = vmatprep.subr.bf16.mxu1 %v4762_v35 }
 0x546   :  { %3487 = vmatpush2.bf16.msra.mxu0 %v4724_v57  ;;  %4188 = vmatpush3.bf16.msra.mxu1 %v4763_v58  ;;  %v3298_v57 = vld [vmem:[%s6721_s12] sm:$0x3] }
 0x547   :  { %3488 = vmatprep.subr.bf16.mxu0 %v4729_v12  ;;  %v3307_v12 = vrot.slane %v3298_v57, %v3256_v8 }
 0x54a   :  { %3489 = vmatpush2.bf16.msra.mxu0 %v4727_v38  ;;  %v3303_v38 = vrot.slane %v3298_v57, %v3252_v30 }
 0x54b   :  { %3490 = vmatprep.subr.bf16.mxu0 %v4732_v11 }
 0x54e   :  { %3491 = vmatpush2.bf16.msra.mxu0 %v4730_v34 }
 0x54f   :  { %3492 = vmatprep.subr.bf16.mxu0 %v4735_v18 }
 0x552   :  { %3493 = vmatpush2.bf16.msra.mxu0 %v4733_v4 }
 0x553   :  { %3494 = vmatprep.subr.bf16.mxu0 %v4738_v25 }
 0x556   :  { %3495 = vmatpush2.bf16.msra.mxu0 %v4736_v44 }
 0x557   :  { %3496 = vmatprep.subr.bf16.mxu0 %v4741_v42 }
 0x55a   :  { %3497 = vmatpush2.bf16.msra.mxu0 %v4739_v22 }
 0x55b   :  { %3498 = vmatprep.subr.bf16.mxu0 %v4744_v47 }
 0x55e   :  { %3499 = vmatpush2.bf16.msra.mxu0 %v4742_v24 }
 0x55f   :  { %3500 = vmatprep.subr.bf16.mxu0 %v4747_v27  ;;  %v3997_v27 = vld [vmem:[%s6722_s14] ss:$0 sm:$0xff] }
 0x562   :  { %3501 = vmatpush2.bf16.msra.mxu0 %v4745_v56 }
 0x5d5   :  { %v2955_v6 = vpop.f32.mrf.mxu0 }
 0x5d7   :  { %v2957_v32 = vpop.f32.mrf.mxu0 }
 0x5d9   :  { %v2959_v26 = vpop.f32.mrf.mxu0  ;;  %v3039_v43 = vpop.f32.mrf.mxu1 }
 0x5da   :  { %v3040_v36 = vadd.f32 %v3039_v43, %v2955_v6 }
 0x5db   :  { %v2960_v50 = vpop.f32.mrf.mxu0  ;;  %v3041_v7 = vpop.f32.mrf.mxu1 }
 0x5dc   :  { %v3042_v49 = vadd.f32 %v3041_v7, %v2957_v32 }
 0x5dd   :  { %v3043_v0 = vpop.f32.mrf.mxu1 }
 0x5df   :  { %v3044_v17 = vpop.f32.mrf.mxu1 }
 0x5e5   :  { %v3138_v33 = vpop.f32.mrf.mxu0 }
 0x5e6   :  { %v3145_v2 = vadd.f32 %v3138_v33, %v3040_v36 }
 0x5e7   :  { %v3140_v3 = vpop.f32.mrf.mxu0 }
 0x5e8   :  { %v3146_v51 = vadd.f32 %v3140_v3, %v3042_v49 }
 0x5e9   :  { %v3142_v61 = vpop.f32.mrf.mxu0  ;;  %v3239_v53 = vpop.f32.mrf.mxu1 }
 0x5ea   :  { %v3246_v40 = vadd.f32 %v3239_v53, %v3145_v2 }
 0x5eb   :  { %v3143_v59 = vpop.f32.mrf.mxu0  ;;  %v3241_v16 = vpop.f32.mrf.mxu1 }
 0x5ec   :  { %v3260_v21 = vadd.f32 %v3253_v41, %v3246_v40  ;;  %v3247_v23 = vadd.f32 %v3241_v16, %v3146_v51 }
 0x5ed   :  { %v3243_v60 = vpop.f32.mrf.mxu1 }
 0x5ee   :  { %v3261_v39 = vadd.f32 %v3257_v13, %v3247_v23  ;;  %v3262_v63 = vmax.f32 %v3260_v21, 0.0 }
 0x5ef   :  { %v3244_v62 = vpop.f32.mrf.mxu1 }
 0x5f0   :  { %v3263_v31 = vmax.f32 %v3261_v39, 0.0  ;;  %v3264_v54 = vpack.c.bf16 %v3262_v63, %v3262_v63 }
 0x5f2   :  { %v3265_v1 = vpack.c.bf16 %v3263_v31, %v3263_v31 }
 0x5f4   :  { %3502 = vmatprep.mubr.bf16.mxu0 %v3265_v1 }
 0x5f5   :  { %3503 = vmatmul.mubr.bf16.vlgmr.msra.gmra.mxu0 %v3264_v54 }
 0x6b5   :  { %v3504_v34 = vpop.f32.mrf.mxu0 }
 0x6b6   :  { %v3505_v11 = vadd.f32 %v3504_v34, %v3303_v38 }
 0x6b7   :  { %v3506_v4 = vpop.f32.mrf.mxu0 }
 0x6b8   :  { %v3507_v18 = vadd.f32 %v3506_v4, %v3307_v12  ;;  %v3511_v44 = vmax.f32 %v3505_v11, 0.0 }
 0x6b9   :  { %v3508_v25 = vpop.f32.mrf.mxu0 }
 0x6ba   :  { %v3512_v42 = vmax.f32 %v3507_v18, 0.0  ;;  %v3513_v24 = vpack.c.bf16 %v3511_v44, %v3511_v44 }
 0x6bb   :  { %v3509_v22 = vpop.f32.mrf.mxu0 }
 0x6bc   :  { %v3514_v47 = vpack.c.bf16 %v3512_v42, %v3512_v42 }
 0x6be   :  { %3682 = vmatprep.mubr.bf16.mxu1 %v3514_v47 }
 0x6bf   :  { %3683 = vmatmul.mubr.bf16.vlgmr.msra.gmra.mxu1 %v3513_v24 }
 0x77f   :  { %v4189_v56 = vpop.f32.mrf.mxu1 }
 0x781   :  { %v4190_v48 = vpop.f32.mrf.mxu1 }
 0x782   :  { %v4191_v19 = vadd.f32 %v4190_v48, %v4189_v56 }
 0x783   :  { %v4192_v9 = vpop.f32.mrf.mxu1 }
 0x784   :  { %v3685_v45 = vadd.f32 %v4191_v19, %v3997_v27 }
 0x785   :  { %v4193_v14 = vpop.f32.mrf.mxu1 }
 0x786   :  { %3690 = vst [vmem:[%s6723_s15] sm:$0xff] %v3685_v45 }

</bundles_post_ra>
